<compile_context>
chip_gen: v6e
topology: v6e:2x2x1
jax: 0.10.0
libtpu: 0.0.40
codegen_flags: <defaults>
</compile_context>

<pallas_src>
import functools

import jax
import jax.numpy as jnp
from jax import lax
from jax.experimental import pallas as pl
from jax.experimental.pallas import tpu as pltpu

C_MID = 16   # conv_G1 output channels
KH = KW = 3  # 3x3 kernels


def _round_up(x, m):
    return (x + m - 1) // m * m


def _pick_b_tile(n):
    """Largest divisor of n that is <= 8, but keep >= 2 grid steps when n > 1
    (so v7x's two TensorCores both get work)."""
    divisors = [d for d in range(1, min(n, 8) + 1) if n % d == 0]
    b = max(divisors)
    if n > 1 and n // b == 1:
        smaller = [d for d in divisors if n // d >= 2]
        if smaller:
            b = max(smaller)
    return b


# -----------------------------------------------------------------------------
# Fused kernel:
#   x_input = x - lam * fft_forback(x) + lam * PhiTb
#   g       = conv3x3(x_input, W1)            (1 -> 16 channels, padding=1)
#   out     = x_input + conv3x3(g, W2)        (16 -> 1 channels, padding=1)
# All image planes are flat (b_tile, H*W) with H*W on the lane axis.
# -----------------------------------------------------------------------------
def _fused_block_kernel(lam_ref, w1_ref, w2_ref, x_ref, f_ref, p_ref, out_ref,
                        pad_scr, *, H, W, b_tile, lpad):
    HW = H * W
    lam = lam_ref[0]

    # Zero the staging strip; its borders stay zero for the whole step, the
    # interior [lpad, lpad+HW) is overwritten (lane-aligned store) before use.
    pad_scr[...] = jnp.zeros(pad_scr.shape, jnp.float32)

    # ---- gradient step (elementwise, fused) --------------------------------
    xin = x_ref[0] - lam * f_ref[0] + lam * p_ref[0]          # (b_tile, HW)

    # ---- column-validity masks for the 3 horizontal tap offsets ------------
    col = lax.broadcasted_iota(jnp.int32, (b_tile, HW), 1) % W
    col_mask = (col >= 1, None, col <= (W - 2))               # kw = 0, 1, 2

    taps9 = [(kh, kw) for kh in range(KH) for kw in range(KW)]

    def shifted_taps(plane, wanted):
        """Zero-filled copies plane_flat[p + (kh-1)*W + (kw-1)] for the
        requested taps (out-of-image sources are 0), built from the
        zero-bordered staging strip with static slices."""
        pad_scr[:, lpad:lpad + HW] = plane
        outs = []
        for (kh, kw) in wanted:
            start = lpad + (kh - 1) * W + (kw - 1)
            s = pad_scr[:, start:start + HW]
            m = col_mask[kw]
            outs.append(s if m is None else jnp.where(m, s, 0.0))
        return outs

    # ---- conv_G1: 1 -> 16 channels ------------------------------------------
    # The 9 shifted views of x_input are built once and reused by all channels.
    sx = shifted_taps(xin, taps9)
    g = []
    for c in range(C_MID):
        acc = w1_ref[c * 9] * sx[0]
        for k in range(1, 9):
            acc = acc + w1_ref[c * 9 + k] * sx[k]
        g.append(acc)

    # ---- conv_G2: 16 -> 1 channel, + residual -------------------------------
    # out = xin + sum_{tap} shift_tap( sum_c w2[c,tap] * g[c] )  -> 9 shifts.
    out = xin
    for k, (kh, kw) in enumerate(taps9):
        t = w2_ref[k] * g[0]
        for c in range(1, C_MID):
            t = t + w2_ref[c * 9 + k] * g[c]
        (st,) = shifted_taps(t, [(kh, kw)])
        out = out + st

    out_ref[0] = out


# -----------------------------------------------------------------------------
# Wrapper (FFT operator, flattening, parameter packing)
# -----------------------------------------------------------------------------
def basic_block_forward(x, phitb, mask, lam, w1, w2, *, b_tile=None):
    """x, phitb: (N,1,H,W) f32; mask: (H,W) f32; w1: (16,1,3,3); w2: (1,16,3,3)."""
    N, C, H, W = x.shape
    assert C == 1
    HW = H * W

    # fft_forback(x, mask, sigma=0.1, add_noise=False) == real(ifft2(fft2(x)*mask))
    # (sigma unused since add_noise=False).  No Pallas FFT -> plain JAX.
    fftfb = jnp.real(jnp.fft.ifft2(jnp.fft.fft2(x[:, 0]) * mask[None])).astype(jnp.float32)

    if b_tile is None:
        b_tile = _pick_b_tile(N)
    assert N % b_tile == 0
    nb = N // b_tile

    as_blocks = lambda a: a.astype(jnp.float32).reshape(nb, b_tile, HW)
    xr, fr, pr = as_blocks(x), as_blocks(fftfb), as_blocks(phitb)

    lam_a = jnp.asarray(lam, jnp.float32).reshape((1,))
    w1_flat = w1.astype(jnp.float32).reshape(C_MID * KH * KW)   # (16,1,3,3) -> (144,)
    w2_flat = w2.astype(jnp.float32).reshape(C_MID * KH * KW)   # (1,16,3,3) -> (144,)

    lpad = _round_up(W + 1, 128)   # zero border, lane-aligned interior store

    smem = pl.BlockSpec(memory_space=pltpu.MemorySpace.SMEM)
    blk = pl.BlockSpec((1, b_tile, HW), lambda n: (n, 0, 0))

    out = pl.pallas_call(
        functools.partial(_fused_block_kernel, H=H, W=W, b_tile=b_tile, lpad=lpad),
        grid=(nb,),
        in_specs=[smem, smem, smem, blk, blk, blk],
        out_specs=blk,
        out_shape=jax.ShapeDtypeStruct((nb, b_tile, HW), jnp.float32),
        scratch_shapes=[pltpu.VMEM((b_tile, lpad + HW + lpad), jnp.float32)],
        compiler_params=pltpu.CompilerParams(dimension_semantics=("parallel",)),
    )(lam_a, w1_flat, w2_flat, xr, fr, pr)

    return out.reshape(N, 1, H, W)


# -----------------------------------------------------------------------------
# Pure-JAX reference (for correctness check)
# -----------------------------------------------------------------------------
def reference_forward(x, phitb, mask, lam, w1, w2):
    fftfb = jnp.real(jnp.fft.ifft2(jnp.fft.fft2(x[:, 0]) * mask[None]))
    fftfb = fftfb[:, None].astype(jnp.float32)
    xi = x - lam * fftfb + lam * phitb
    dn = ("NCHW", "OIHW", "NCHW")
    g = jax.lax.conv_general_dilated(xi, w1, (1, 1), ((1, 1), (1, 1)),
                                     dimension_numbers=dn)
    g = jax.lax.conv_general_dilated(g, w2, (1, 1), ((1, 1), (1, 1)),
                                     dimension_numbers=dn)
    return xi + g


if __name__ == "__main__":
    key = jax.random.PRNGKey(0)
    k1, k2, k3, k4, k5 = jax.random.split(key, 5)

    N, H, W = 2, 16, 16
    x = jax.random.normal(k1, (N, 1, H, W), jnp.float32)
    phitb = jax.random.normal(k2, (N, 1, H, W), jnp.float32)
    mask = jax.random.bernoulli(k3, 0.5, (H, W)).astype(jnp.float32)

    # Deterministic parameter init (matches module __init__ shapes):
    # lambda_step = 0.5 ; xavier_normal_ std = sqrt(2 / (fan_in + fan_out))
    lam = jnp.float32(0.5)
    std = (2.0 / (KH * KW * 1 + KH * KW * C_MID)) ** 0.5
    w1 = (std * jax.random.normal(k4, (C_MID, 1, KH, KW))).astype(jnp.float32)
    w2 = (std * jax.random.normal(k5, (1, C_MID, KH, KW))).astype(jnp.float32)

    fwd = jax.jit(basic_block_forward)
    out = jax.block_until_ready(fwd(x, phitb, mask, lam, w1, w2))

    ref = reference_forward(x, phitb, mask, lam, w1, w2)
    assert out.shape == (N, 1, H, W)
    max_err = float(jnp.abs(out - ref).max())
    assert jnp.allclose(out, ref, atol=1e-4, rtol=1e-4), max_err

    print("KERNEL_OK")
</pallas_src>

<mosaic_0001>
module attributes {stable_mosaic.version = 11 : i64} {
  func.func @_fused_block_kernel(%arg0: i32, %arg1: memref<1xf32, #tpu.memory_space<smem>>, %arg2: memref<144xf32, #tpu.memory_space<smem>>, %arg3: memref<144xf32, #tpu.memory_space<smem>>, %arg4: memref<1x1x256xf32, #tpu.memory_space<vmem>>, %arg5: memref<1x1x256xf32, #tpu.memory_space<vmem>>, %arg6: memref<1x1x256xf32, #tpu.memory_space<vmem>>, %arg7: memref<1x1x256xf32, #tpu.memory_space<vmem>>, %arg8: memref<1x512xf32, #tpu.memory_space<vmem>>) attributes {dimension_semantics = [#tpu.dimension_semantics<parallel>], iteration_bounds = array<i64: 2>, scalar_prefetch = 0 : i64, scratch_operands = 1 : i64, tpu.core_type = #tpu.core_type<tc>, window_params = [{transform_indices = @transform_0, window_bounds = array<i64: 1>}, {transform_indices = @transform_1, window_bounds = array<i64: 144>}, {transform_indices = @transform_2, window_bounds = array<i64: 144>}, {transform_indices = @transform_3, window_bounds = array<i64: 1, 1, 256>}, {transform_indices = @transform_4, window_bounds = array<i64: 1, 1, 256>}, {transform_indices = @transform_5, window_bounds = array<i64: 1, 1, 256>}, {transform_indices = @transform_6, window_bounds = array<i64: 1, 1, 256>}]} {
    %c0 = arith.constant 0 : index
    %0 = memref.load %arg1[%c0] : memref<1xf32, #tpu.memory_space<smem>>
    %cst = arith.constant 0.000000e+00 : f32
    %1 = vector.broadcast %cst : f32 to vector<1x512xf32>
    %c0_0 = arith.constant 0 : index
    %c0_1 = arith.constant 0 : index
    %2 = vector.load %arg8[%c0_0, %c0_1] : memref<1x512xf32, #tpu.memory_space<vmem>>, vector<1x512xf32>
    tpu.vector_store %arg8[%c0_0, %c0_1], %1 {strides = array<i32>} : memref<1x512xf32, #tpu.memory_space<vmem>>, vector<1x512xf32>,
    %c0_2 = arith.constant 0 : index
    %c0_3 = arith.constant 0 : index
    %c0_4 = arith.constant 0 : index
    %3 = vector.load %arg4[%c0_2, %c0_3, %c0_4] : memref<1x1x256xf32, #tpu.memory_space<vmem>>, vector<1x1x256xf32>
    %4 = vector.shape_cast %3 : vector<1x1x256xf32> to vector<1x256xf32>
    %c0_5 = arith.constant 0 : index
    %c0_6 = arith.constant 0 : index
    %c0_7 = arith.constant 0 : index
    %5 = vector.load %arg5[%c0_5, %c0_6, %c0_7] : memref<1x1x256xf32, #tpu.memory_space<vmem>>, vector<1x1x256xf32>
    %6 = vector.shape_cast %5 : vector<1x1x256xf32> to vector<1x256xf32>
    %7 = vector.broadcast %0 : f32 to vector<1x256xf32>
    %8 = arith.mulf %7, %6 : vector<1x256xf32>
    %9 = arith.subf %4, %8 : vector<1x256xf32>
    %c0_8 = arith.constant 0 : index
    %c0_9 = arith.constant 0 : index
    %c0_10 = arith.constant 0 : index
    %10 = vector.load %arg6[%c0_8, %c0_9, %c0_10] : memref<1x1x256xf32, #tpu.memory_space<vmem>>, vector<1x1x256xf32>
    %11 = vector.shape_cast %10 : vector<1x1x256xf32> to vector<1x256xf32>
    %12 = vector.broadcast %0 : f32 to vector<1x256xf32>
    %13 = arith.mulf %12, %11 : vector<1x256xf32>
    %14 = arith.addf %9, %13 : vector<1x256xf32>
    %15 = tpu.iota {dimensions = array<i32: 1>} : vector<1x256xi32>
    %c16_i32 = arith.constant 16 : i32
    %c0_i32 = arith.constant 0 : i32
    %16 = arith.cmpi eq, %c16_i32, %c0_i32 : i32
    %c1_i32 = arith.constant 1 : i32
    %17 = arith.select %16, %c1_i32, %c16_i32 : i32
    %18 = vector.broadcast %17 : i32 to vector<1x256xi32>
    %19 = arith.remsi %15, %18 : vector<1x256xi32>
    %c0_i32_11 = arith.constant 0 : i32
    %20 = vector.broadcast %c0_i32_11 : i32 to vector<1x256xi32>
    %21 = arith.cmpi ne, %19, %20 : vector<1x256xi32>
    %c0_i32_12 = arith.constant 0 : i32
    %22 = vector.broadcast %c0_i32_12 : i32 to vector<1x256xi32>
    %23 = arith.cmpi slt, %19, %22 : vector<1x256xi32>
    %c0_i32_13 = arith.constant 0 : i32
    %24 = arith.cmpi slt, %17, %c0_i32_13 : i32
    %25 = vector.broadcast %24 : i1 to vector<1x256xi1>
    %26 = vector.broadcast %25 : vector<1x256xi1> to vector<1x256xi1>
    %27 = arith.xori %23, %26 : vector<1x256xi1>
    %28 = arith.andi %27, %21 : vector<1x256xi1>
    %29 = vector.broadcast %17 : i32 to vector<1x256xi32>
    %30 = arith.addi %19, %29 : vector<1x256xi32>
    %31 = arith.select %28, %30, %19 : vector<1x256xi1>, vector<1x256xi32>
    %c1_i32_14 = arith.constant 1 : i32
    %32 = vector.broadcast %c1_i32_14 : i32 to vector<1x256xi32>
    %33 = arith.cmpi sge, %31, %32 : vector<1x256xi32>
    %c14_i32 = arith.constant 14 : i32
    %34 = vector.broadcast %c14_i32 : i32 to vector<1x256xi32>
    %35 = arith.cmpi sle, %31, %34 : vector<1x256xi32>
    %c0_15 = arith.constant 0 : index
    %c128 = arith.constant 128 : index
    %36 = vector.load %arg8[%c0_15, %c128] : memref<1x512xf32, #tpu.memory_space<vmem>>, vector<1x256xf32>
    tpu.vector_store %arg8[%c0_15, %c128], %14 {strides = array<i32>} : memref<1x512xf32, #tpu.memory_space<vmem>>, vector<1x256xf32>,
    %c0_16 = arith.constant 0 : index
    %c111 = arith.constant 111 : index
    %37 = vector.load %arg8[%c0_16, %c111] : memref<1x512xf32, #tpu.memory_space<vmem>>, vector<1x256xf32>
    %cst_17 = arith.constant 0.000000e+00 : f32
    %38 = vector.broadcast %cst_17 : f32 to vector<1x256xf32>
    %39 = arith.select %33, %37, %38 : vector<1x256xi1>, vector<1x256xf32>
    %c0_18 = arith.constant 0 : index
    %c112 = arith.constant 112 : index
    %40 = vector.load %arg8[%c0_18, %c112] : memref<1x512xf32, #tpu.memory_space<vmem>>, vector<1x256xf32>
    %c0_19 = arith.constant 0 : index
    %c113 = arith.constant 113 : index
    %41 = vector.load %arg8[%c0_19, %c113] : memref<1x512xf32, #tpu.memory_space<vmem>>, vector<1x256xf32>
    %cst_20 = arith.constant 0.000000e+00 : f32
    %42 = vector.broadcast %cst_20 : f32 to vector<1x256xf32>
    %43 = arith.select %35, %41, %42 : vector<1x256xi1>, vector<1x256xf32>
    %c0_21 = arith.constant 0 : index
    %c127 = arith.constant 127 : index
    %44 = vector.load %arg8[%c0_21, %c127] : memref<1x512xf32, #tpu.memory_space<vmem>>, vector<1x256xf32>
    %cst_22 = arith.constant 0.000000e+00 : f32
    %45 = vector.broadcast %cst_22 : f32 to vector<1x256xf32>
    %46 = arith.select %33, %44, %45 : vector<1x256xi1>, vector<1x256xf32>
    %c0_23 = arith.constant 0 : index
    %c128_24 = arith.constant 128 : index
    %47 = vector.load %arg8[%c0_23, %c128_24] : memref<1x512xf32, #tpu.memory_space<vmem>>, vector<1x256xf32>
    %c0_25 = arith.constant 0 : index
    %c129 = arith.constant 129 : index
    %48 = vector.load %arg8[%c0_25, %c129] : memref<1x512xf32, #tpu.memory_space<vmem>>, vector<1x256xf32>
    %cst_26 = arith.constant 0.000000e+00 : f32
    %49 = vector.broadcast %cst_26 : f32 to vector<1x256xf32>
    %50 = arith.select %35, %48, %49 : vector<1x256xi1>, vector<1x256xf32>
    %c0_27 = arith.constant 0 : index
    %c143 = arith.constant 143 : index
    %51 = vector.load %arg8[%c0_27, %c143] : memref<1x512xf32, #tpu.memory_space<vmem>>, vector<1x256xf32>
    %cst_28 = arith.constant 0.000000e+00 : f32
    %52 = vector.broadcast %cst_28 : f32 to vector<1x256xf32>
    %53 = arith.select %33, %51, %52 : vector<1x256xi1>, vector<1x256xf32>
    %c0_29 = arith.constant 0 : index
    %c144 = arith.constant 144 : index
    %54 = vector.load %arg8[%c0_29, %c144] : memref<1x512xf32, #tpu.memory_space<vmem>>, vector<1x256xf32>
    %c0_30 = arith.constant 0 : index
    %c145 = arith.constant 145 : index
    %55 = vector.load %arg8[%c0_30, %c145] : memref<1x512xf32, #tpu.memory_space<vmem>>, vector<1x256xf32>
    %cst_31 = arith.constant 0.000000e+00 : f32
    %56 = vector.broadcast %cst_31 : f32 to vector<1x256xf32>
    %57 = arith.select %35, %55, %56 : vector<1x256xi1>, vector<1x256xf32>
    %c0_32 = arith.constant 0 : index
    %58 = memref.load %arg2[%c0_32] : memref<144xf32, #tpu.memory_space<smem>>
    %59 = vector.broadcast %58 : f32 to vector<1x256xf32>
    %60 = arith.mulf %59, %39 : vector<1x256xf32>
    %c1 = arith.constant 1 : index
    %61 = memref.load %arg2[%c1] : memref<144xf32, #tpu.memory_space<smem>>
    %62 = vector.broadcast %61 : f32 to vector<1x256xf32>
    %63 = arith.mulf %62, %40 : vector<1x256xf32>
    %64 = arith.addf %60, %63 : vector<1x256xf32>
    %c2 = arith.constant 2 : index
    %65 = memref.load %arg2[%c2] : memref<144xf32, #tpu.memory_space<smem>>
    %66 = vector.broadcast %65 : f32 to vector<1x256xf32>
    %67 = arith.mulf %66, %43 : vector<1x256xf32>
    %68 = arith.addf %64, %67 : vector<1x256xf32>
    %c3 = arith.constant 3 : index
    %69 = memref.load %arg2[%c3] : memref<144xf32, #tpu.memory_space<smem>>
    %70 = vector.broadcast %69 : f32 to vector<1x256xf32>
    %71 = arith.mulf %70, %46 : vector<1x256xf32>
    %72 = arith.addf %68, %71 : vector<1x256xf32>
    %c4 = arith.constant 4 : index
    %73 = memref.load %arg2[%c4] : memref<144xf32, #tpu.memory_space<smem>>
    %74 = vector.broadcast %73 : f32 to vector<1x256xf32>
    %75 = arith.mulf %74, %47 : vector<1x256xf32>
    %76 = arith.addf %72, %75 : vector<1x256xf32>
    %c5 = arith.constant 5 : index
    %77 = memref.load %arg2[%c5] : memref<144xf32, #tpu.memory_space<smem>>
    %78 = vector.broadcast %77 : f32 to vector<1x256xf32>
    %79 = arith.mulf %78, %50 : vector<1x256xf32>
    %80 = arith.addf %76, %79 : vector<1x256xf32>
    %c6 = arith.constant 6 : index
    %81 = memref.load %arg2[%c6] : memref<144xf32, #tpu.memory_space<smem>>
    %82 = vector.broadcast %81 : f32 to vector<1x256xf32>
    %83 = arith.mulf %82, %53 : vector<1x256xf32>
    %84 = arith.addf %80, %83 : vector<1x256xf32>
    %c7 = arith.constant 7 : index
    %85 = memref.load %arg2[%c7] : memref<144xf32, #tpu.memory_space<smem>>
    %86 = vector.broadcast %85 : f32 to vector<1x256xf32>
    %87 = arith.mulf %86, %54 : vector<1x256xf32>
    %88 = arith.addf %84, %87 : vector<1x256xf32>
    %c8 = arith.constant 8 : index
    %89 = memref.load %arg2[%c8] : memref<144xf32, #tpu.memory_space<smem>>
    %90 = vector.broadcast %89 : f32 to vector<1x256xf32>
    %91 = arith.mulf %90, %57 : vector<1x256xf32>
    %92 = arith.addf %88, %91 : vector<1x256xf32>
    %c9 = arith.constant 9 : index
    %93 = memref.load %arg2[%c9] : memref<144xf32, #tpu.memory_space<smem>>
    %94 = vector.broadcast %93 : f32 to vector<1x256xf32>
    %95 = arith.mulf %94, %39 : vector<1x256xf32>
    %c10 = arith.constant 10 : index
    %96 = memref.load %arg2[%c10] : memref<144xf32, #tpu.memory_space<smem>>
    %97 = vector.broadcast %96 : f32 to vector<1x256xf32>
    %98 = arith.mulf %97, %40 : vector<1x256xf32>
    %99 = arith.addf %95, %98 : vector<1x256xf32>
    %c11 = arith.constant 11 : index
    %100 = memref.load %arg2[%c11] : memref<144xf32, #tpu.memory_space<smem>>
    %101 = vector.broadcast %100 : f32 to vector<1x256xf32>
    %102 = arith.mulf %101, %43 : vector<1x256xf32>
    %103 = arith.addf %99, %102 : vector<1x256xf32>
    %c12 = arith.constant 12 : index
    %104 = memref.load %arg2[%c12] : memref<144xf32, #tpu.memory_space<smem>>
    %105 = vector.broadcast %104 : f32 to vector<1x256xf32>
    %106 = arith.mulf %105, %46 : vector<1x256xf32>
    %107 = arith.addf %103, %106 : vector<1x256xf32>
    %c13 = arith.constant 13 : index
    %108 = memref.load %arg2[%c13] : memref<144xf32, #tpu.memory_space<smem>>
    %109 = vector.broadcast %108 : f32 to vector<1x256xf32>
    %110 = arith.mulf %109, %47 : vector<1x256xf32>
    %111 = arith.addf %107, %110 : vector<1x256xf32>
    %c14 = arith.constant 14 : index
    %112 = memref.load %arg2[%c14] : memref<144xf32, #tpu.memory_space<smem>>
    %113 = vector.broadcast %112 : f32 to vector<1x256xf32>
    %114 = arith.mulf %113, %50 : vector<1x256xf32>
    %115 = arith.addf %111, %114 : vector<1x256xf32>
    %c15 = arith.constant 15 : index
    %116 = memref.load %arg2[%c15] : memref<144xf32, #tpu.memory_space<smem>>
    %117 = vector.broadcast %116 : f32 to vector<1x256xf32>
    %118 = arith.mulf %117, %53 : vector<1x256xf32>
    %119 = arith.addf %115, %118 : vector<1x256xf32>
    %c16 = arith.constant 16 : index
    %120 = memref.load %arg2[%c16] : memref<144xf32, #tpu.memory_space<smem>>
    %121 = vector.broadcast %120 : f32 to vector<1x256xf32>
    %122 = arith.mulf %121, %54 : vector<1x256xf32>
    %123 = arith.addf %119, %122 : vector<1x256xf32>
    %c17 = arith.constant 17 : index
    %124 = memref.load %arg2[%c17] : memref<144xf32, #tpu.memory_space<smem>>
    %125 = vector.broadcast %124 : f32 to vector<1x256xf32>
    %126 = arith.mulf %125, %57 : vector<1x256xf32>
    %127 = arith.addf %123, %126 : vector<1x256xf32>
    %c18 = arith.constant 18 : index
    %128 = memref.load %arg2[%c18] : memref<144xf32, #tpu.memory_space<smem>>
    %129 = vector.broadcast %128 : f32 to vector<1x256xf32>
    %130 = arith.mulf %129, %39 : vector<1x256xf32>
    %c19 = arith.constant 19 : index
    %131 = memref.load %arg2[%c19] : memref<144xf32, #tpu.memory_space<smem>>
    %132 = vector.broadcast %131 : f32 to vector<1x256xf32>
    %133 = arith.mulf %132, %40 : vector<1x256xf32>
    %134 = arith.addf %130, %133 : vector<1x256xf32>
    %c20 = arith.constant 20 : index
    %135 = memref.load %arg2[%c20] : memref<144xf32, #tpu.memory_space<smem>>
    %136 = vector.broadcast %135 : f32 to vector<1x256xf32>
    %137 = arith.mulf %136, %43 : vector<1x256xf32>
    %138 = arith.addf %134, %137 : vector<1x256xf32>
    %c21 = arith.constant 21 : index
    %139 = memref.load %arg2[%c21] : memref<144xf32, #tpu.memory_space<smem>>
    %140 = vector.broadcast %139 : f32 to vector<1x256xf32>
    %141 = arith.mulf %140, %46 : vector<1x256xf32>
    %142 = arith.addf %138, %141 : vector<1x256xf32>
    %c22 = arith.constant 22 : index
    %143 = memref.load %arg2[%c22] : memref<144xf32, #tpu.memory_space<smem>>
    %144 = vector.broadcast %143 : f32 to vector<1x256xf32>
    %145 = arith.mulf %144, %47 : vector<1x256xf32>
    %146 = arith.addf %142, %145 : vector<1x256xf32>
    %c23 = arith.constant 23 : index
    %147 = memref.load %arg2[%c23] : memref<144xf32, #tpu.memory_space<smem>>
    %148 = vector.broadcast %147 : f32 to vector<1x256xf32>
    %149 = arith.mulf %148, %50 : vector<1x256xf32>
    %150 = arith.addf %146, %149 : vector<1x256xf32>
    %c24 = arith.constant 24 : index
    %151 = memref.load %arg2[%c24] : memref<144xf32, #tpu.memory_space<smem>>
    %152 = vector.broadcast %151 : f32 to vector<1x256xf32>
    %153 = arith.mulf %152, %53 : vector<1x256xf32>
    %154 = arith.addf %150, %153 : vector<1x256xf32>
    %c25 = arith.constant 25 : index
    %155 = memref.load %arg2[%c25] : memref<144xf32, #tpu.memory_space<smem>>
    %156 = vector.broadcast %155 : f32 to vector<1x256xf32>
    %157 = arith.mulf %156, %54 : vector<1x256xf32>
    %158 = arith.addf %154, %157 : vector<1x256xf32>
    %c26 = arith.constant 26 : index
    %159 = memref.load %arg2[%c26] : memref<144xf32, #tpu.memory_space<smem>>
    %160 = vector.broadcast %159 : f32 to vector<1x256xf32>
    %161 = arith.mulf %160, %57 : vector<1x256xf32>
    %162 = arith.addf %158, %161 : vector<1x256xf32>
    %c27 = arith.constant 27 : index
    %163 = memref.load %arg2[%c27] : memref<144xf32, #tpu.memory_space<smem>>
    %164 = vector.broadcast %163 : f32 to vector<1x256xf32>
    %165 = arith.mulf %164, %39 : vector<1x256xf32>
    %c28 = arith.constant 28 : index
    %166 = memref.load %arg2[%c28] : memref<144xf32, #tpu.memory_space<smem>>
    %167 = vector.broadcast %166 : f32 to vector<1x256xf32>
    %168 = arith.mulf %167, %40 : vector<1x256xf32>
    %169 = arith.addf %165, %168 : vector<1x256xf32>
    %c29 = arith.constant 29 : index
    %170 = memref.load %arg2[%c29] : memref<144xf32, #tpu.memory_space<smem>>
    %171 = vector.broadcast %170 : f32 to vector<1x256xf32>
    %172 = arith.mulf %171, %43 : vector<1x256xf32>
    %173 = arith.addf %169, %172 : vector<1x256xf32>
    %c30 = arith.constant 30 : index
    %174 = memref.load %arg2[%c30] : memref<144xf32, #tpu.memory_space<smem>>
    %175 = vector.broadcast %174 : f32 to vector<1x256xf32>
    %176 = arith.mulf %175, %46 : vector<1x256xf32>
    %177 = arith.addf %173, %176 : vector<1x256xf32>
    %c31 = arith.constant 31 : index
    %178 = memref.load %arg2[%c31] : memref<144xf32, #tpu.memory_space<smem>>
    %179 = vector.broadcast %178 : f32 to vector<1x256xf32>
    %180 = arith.mulf %179, %47 : vector<1x256xf32>
    %181 = arith.addf %177, %180 : vector<1x256xf32>
    %c32 = arith.constant 32 : index
    %182 = memref.load %arg2[%c32] : memref<144xf32, #tpu.memory_space<smem>>
    %183 = vector.broadcast %182 : f32 to vector<1x256xf32>
    %184 = arith.mulf %183, %50 : vector<1x256xf32>
    %185 = arith.addf %181, %184 : vector<1x256xf32>
    %c33 = arith.constant 33 : index
    %186 = memref.load %arg2[%c33] : memref<144xf32, #tpu.memory_space<smem>>
    %187 = vector.broadcast %186 : f32 to vector<1x256xf32>
    %188 = arith.mulf %187, %53 : vector<1x256xf32>
    %189 = arith.addf %185, %188 : vector<1x256xf32>
    %c34 = arith.constant 34 : index
    %190 = memref.load %arg2[%c34] : memref<144xf32, #tpu.memory_space<smem>>
    %191 = vector.broadcast %190 : f32 to vector<1x256xf32>
    %192 = arith.mulf %191, %54 : vector<1x256xf32>
    %193 = arith.addf %189, %192 : vector<1x256xf32>
    %c35 = arith.constant 35 : index
    %194 = memref.load %arg2[%c35] : memref<144xf32, #tpu.memory_space<smem>>
    %195 = vector.broadcast %194 : f32 to vector<1x256xf32>
    %196 = arith.mulf %195, %57 : vector<1x256xf32>
    %197 = arith.addf %193, %196 : vector<1x256xf32>
    %c36 = arith.constant 36 : index
    %198 = memref.load %arg2[%c36] : memref<144xf32, #tpu.memory_space<smem>>
    %199 = vector.broadcast %198 : f32 to vector<1x256xf32>
    %200 = arith.mulf %199, %39 : vector<1x256xf32>
    %c37 = arith.constant 37 : index
    %201 = memref.load %arg2[%c37] : memref<144xf32, #tpu.memory_space<smem>>
    %202 = vector.broadcast %201 : f32 to vector<1x256xf32>
    %203 = arith.mulf %202, %40 : vector<1x256xf32>
    %204 = arith.addf %200, %203 : vector<1x256xf32>
    %c38 = arith.constant 38 : index
    %205 = memref.load %arg2[%c38] : memref<144xf32, #tpu.memory_space<smem>>
    %206 = vector.broadcast %205 : f32 to vector<1x256xf32>
    %207 = arith.mulf %206, %43 : vector<1x256xf32>
    %208 = arith.addf %204, %207 : vector<1x256xf32>
    %c39 = arith.constant 39 : index
    %209 = memref.load %arg2[%c39] : memref<144xf32, #tpu.memory_space<smem>>
    %210 = vector.broadcast %209 : f32 to vector<1x256xf32>
    %211 = arith.mulf %210, %46 : vector<1x256xf32>
    %212 = arith.addf %208, %211 : vector<1x256xf32>
    %c40 = arith.constant 40 : index
    %213 = memref.load %arg2[%c40] : memref<144xf32, #tpu.memory_space<smem>>
    %214 = vector.broadcast %213 : f32 to vector<1x256xf32>
    %215 = arith.mulf %214, %47 : vector<1x256xf32>
    %216 = arith.addf %212, %215 : vector<1x256xf32>
    %c41 = arith.constant 41 : index
    %217 = memref.load %arg2[%c41] : memref<144xf32, #tpu.memory_space<smem>>
    %218 = vector.broadcast %217 : f32 to vector<1x256xf32>
    %219 = arith.mulf %218, %50 : vector<1x256xf32>
    %220 = arith.addf %216, %219 : vector<1x256xf32>
    %c42 = arith.constant 42 : index
    %221 = memref.load %arg2[%c42] : memref<144xf32, #tpu.memory_space<smem>>
    %222 = vector.broadcast %221 : f32 to vector<1x256xf32>
    %223 = arith.mulf %222, %53 : vector<1x256xf32>
    %224 = arith.addf %220, %223 : vector<1x256xf32>
    %c43 = arith.constant 43 : index
    %225 = memref.load %arg2[%c43] : memref<144xf32, #tpu.memory_space<smem>>
    %226 = vector.broadcast %225 : f32 to vector<1x256xf32>
    %227 = arith.mulf %226, %54 : vector<1x256xf32>
    %228 = arith.addf %224, %227 : vector<1x256xf32>
    %c44 = arith.constant 44 : index
    %229 = memref.load %arg2[%c44] : memref<144xf32, #tpu.memory_space<smem>>
    %230 = vector.broadcast %229 : f32 to vector<1x256xf32>
    %231 = arith.mulf %230, %57 : vector<1x256xf32>
    %232 = arith.addf %228, %231 : vector<1x256xf32>
    %c45 = arith.constant 45 : index
    %233 = memref.load %arg2[%c45] : memref<144xf32, #tpu.memory_space<smem>>
    %234 = vector.broadcast %233 : f32 to vector<1x256xf32>
    %235 = arith.mulf %234, %39 : vector<1x256xf32>
    %c46 = arith.constant 46 : index
    %236 = memref.load %arg2[%c46] : memref<144xf32, #tpu.memory_space<smem>>
    %237 = vector.broadcast %236 : f32 to vector<1x256xf32>
    %238 = arith.mulf %237, %40 : vector<1x256xf32>
    %239 = arith.addf %235, %238 : vector<1x256xf32>
    %c47 = arith.constant 47 : index
    %240 = memref.load %arg2[%c47] : memref<144xf32, #tpu.memory_space<smem>>
    %241 = vector.broadcast %240 : f32 to vector<1x256xf32>
    %242 = arith.mulf %241, %43 : vector<1x256xf32>
    %243 = arith.addf %239, %242 : vector<1x256xf32>
    %c48 = arith.constant 48 : index
    %244 = memref.load %arg2[%c48] : memref<144xf32, #tpu.memory_space<smem>>
    %245 = vector.broadcast %244 : f32 to vector<1x256xf32>
    %246 = arith.mulf %245, %46 : vector<1x256xf32>
    %247 = arith.addf %243, %246 : vector<1x256xf32>
    %c49 = arith.constant 49 : index
    %248 = memref.load %arg2[%c49] : memref<144xf32, #tpu.memory_space<smem>>
    %249 = vector.broadcast %248 : f32 to vector<1x256xf32>
    %250 = arith.mulf %249, %47 : vector<1x256xf32>
    %251 = arith.addf %247, %250 : vector<1x256xf32>
    %c50 = arith.constant 50 : index
    %252 = memref.load %arg2[%c50] : memref<144xf32, #tpu.memory_space<smem>>
    %253 = vector.broadcast %252 : f32 to vector<1x256xf32>
    %254 = arith.mulf %253, %50 : vector<1x256xf32>
    %255 = arith.addf %251, %254 : vector<1x256xf32>
    %c51 = arith.constant 51 : index
    %256 = memref.load %arg2[%c51] : memref<144xf32, #tpu.memory_space<smem>>
    %257 = vector.broadcast %256 : f32 to vector<1x256xf32>
    %258 = arith.mulf %257, %53 : vector<1x256xf32>
    %259 = arith.addf %255, %258 : vector<1x256xf32>
    %c52 = arith.constant 52 : index
    %260 = memref.load %arg2[%c52] : memref<144xf32, #tpu.memory_space<smem>>
    %261 = vector.broadcast %260 : f32 to vector<1x256xf32>
    %262 = arith.mulf %261, %54 : vector<1x256xf32>
    %263 = arith.addf %259, %262 : vector<1x256xf32>
    %c53 = arith.constant 53 : index
    %264 = memref.load %arg2[%c53] : memref<144xf32, #tpu.memory_space<smem>>
    %265 = vector.broadcast %264 : f32 to vector<1x256xf32>
    %266 = arith.mulf %265, %57 : vector<1x256xf32>
    %267 = arith.addf %263, %266 : vector<1x256xf32>
    %c54 = arith.constant 54 : index
    %268 = memref.load %arg2[%c54] : memref<144xf32, #tpu.memory_space<smem>>
    %269 = vector.broadcast %268 : f32 to vector<1x256xf32>
    %270 = arith.mulf %269, %39 : vector<1x256xf32>
    %c55 = arith.constant 55 : index
    %271 = memref.load %arg2[%c55] : memref<144xf32, #tpu.memory_space<smem>>
    %272 = vector.broadcast %271 : f32 to vector<1x256xf32>
    %273 = arith.mulf %272, %40 : vector<1x256xf32>
    %274 = arith.addf %270, %273 : vector<1x256xf32>
    %c56 = arith.constant 56 : index
    %275 = memref.load %arg2[%c56] : memref<144xf32, #tpu.memory_space<smem>>
    %276 = vector.broadcast %275 : f32 to vector<1x256xf32>
    %277 = arith.mulf %276, %43 : vector<1x256xf32>
    %278 = arith.addf %274, %277 : vector<1x256xf32>
    %c57 = arith.constant 57 : index
    %279 = memref.load %arg2[%c57] : memref<144xf32, #tpu.memory_space<smem>>
    %280 = vector.broadcast %279 : f32 to vector<1x256xf32>
    %281 = arith.mulf %280, %46 : vector<1x256xf32>
    %282 = arith.addf %278, %281 : vector<1x256xf32>
    %c58 = arith.constant 58 : index
    %283 = memref.load %arg2[%c58] : memref<144xf32, #tpu.memory_space<smem>>
    %284 = vector.broadcast %283 : f32 to vector<1x256xf32>
    %285 = arith.mulf %284, %47 : vector<1x256xf32>
    %286 = arith.addf %282, %285 : vector<1x256xf32>
    %c59 = arith.constant 59 : index
    %287 = memref.load %arg2[%c59] : memref<144xf32, #tpu.memory_space<smem>>
    %288 = vector.broadcast %287 : f32 to vector<1x256xf32>
    %289 = arith.mulf %288, %50 : vector<1x256xf32>
    %290 = arith.addf %286, %289 : vector<1x256xf32>
    %c60 = arith.constant 60 : index
    %291 = memref.load %arg2[%c60] : memref<144xf32, #tpu.memory_space<smem>>
    %292 = vector.broadcast %291 : f32 to vector<1x256xf32>
    %293 = arith.mulf %292, %53 : vector<1x256xf32>
    %294 = arith.addf %290, %293 : vector<1x256xf32>
    %c61 = arith.constant 61 : index
    %295 = memref.load %arg2[%c61] : memref<144xf32, #tpu.memory_space<smem>>
    %296 = vector.broadcast %295 : f32 to vector<1x256xf32>
    %297 = arith.mulf %296, %54 : vector<1x256xf32>
    %298 = arith.addf %294, %297 : vector<1x256xf32>
    %c62 = arith.constant 62 : index
    %299 = memref.load %arg2[%c62] : memref<144xf32, #tpu.memory_space<smem>>
    %300 = vector.broadcast %299 : f32 to vector<1x256xf32>
    %301 = arith.mulf %300, %57 : vector<1x256xf32>
    %302 = arith.addf %298, %301 : vector<1x256xf32>
    %c63 = arith.constant 63 : index
    %303 = memref.load %arg2[%c63] : memref<144xf32, #tpu.memory_space<smem>>
    %304 = vector.broadcast %303 : f32 to vector<1x256xf32>
    %305 = arith.mulf %304, %39 : vector<1x256xf32>
    %c64 = arith.constant 64 : index
    %306 = memref.load %arg2[%c64] : memref<144xf32, #tpu.memory_space<smem>>
    %307 = vector.broadcast %306 : f32 to vector<1x256xf32>
    %308 = arith.mulf %307, %40 : vector<1x256xf32>
    %309 = arith.addf %305, %308 : vector<1x256xf32>
    %c65 = arith.constant 65 : index
    %310 = memref.load %arg2[%c65] : memref<144xf32, #tpu.memory_space<smem>>
    %311 = vector.broadcast %310 : f32 to vector<1x256xf32>
    %312 = arith.mulf %311, %43 : vector<1x256xf32>
    %313 = arith.addf %309, %312 : vector<1x256xf32>
    %c66 = arith.constant 66 : index
    %314 = memref.load %arg2[%c66] : memref<144xf32, #tpu.memory_space<smem>>
    %315 = vector.broadcast %314 : f32 to vector<1x256xf32>
    %316 = arith.mulf %315, %46 : vector<1x256xf32>
    %317 = arith.addf %313, %316 : vector<1x256xf32>
    %c67 = arith.constant 67 : index
    %318 = memref.load %arg2[%c67] : memref<144xf32, #tpu.memory_space<smem>>
    %319 = vector.broadcast %318 : f32 to vector<1x256xf32>
    %320 = arith.mulf %319, %47 : vector<1x256xf32>
    %321 = arith.addf %317, %320 : vector<1x256xf32>
    %c68 = arith.constant 68 : index
    %322 = memref.load %arg2[%c68] : memref<144xf32, #tpu.memory_space<smem>>
    %323 = vector.broadcast %322 : f32 to vector<1x256xf32>
    %324 = arith.mulf %323, %50 : vector<1x256xf32>
    %325 = arith.addf %321, %324 : vector<1x256xf32>
    %c69 = arith.constant 69 : index
    %326 = memref.load %arg2[%c69] : memref<144xf32, #tpu.memory_space<smem>>
    %327 = vector.broadcast %326 : f32 to vector<1x256xf32>
    %328 = arith.mulf %327, %53 : vector<1x256xf32>
    %329 = arith.addf %325, %328 : vector<1x256xf32>
    %c70 = arith.constant 70 : index
    %330 = memref.load %arg2[%c70] : memref<144xf32, #tpu.memory_space<smem>>
    %331 = vector.broadcast %330 : f32 to vector<1x256xf32>
    %332 = arith.mulf %331, %54 : vector<1x256xf32>
    %333 = arith.addf %329, %332 : vector<1x256xf32>
    %c71 = arith.constant 71 : index
    %334 = memref.load %arg2[%c71] : memref<144xf32, #tpu.memory_space<smem>>
    %335 = vector.broadcast %334 : f32 to vector<1x256xf32>
    %336 = arith.mulf %335, %57 : vector<1x256xf32>
    %337 = arith.addf %333, %336 : vector<1x256xf32>
    %c72 = arith.constant 72 : index
    %338 = memref.load %arg2[%c72] : memref<144xf32, #tpu.memory_space<smem>>
    %339 = vector.broadcast %338 : f32 to vector<1x256xf32>
    %340 = arith.mulf %339, %39 : vector<1x256xf32>
    %c73 = arith.constant 73 : index
    %341 = memref.load %arg2[%c73] : memref<144xf32, #tpu.memory_space<smem>>
    %342 = vector.broadcast %341 : f32 to vector<1x256xf32>
    %343 = arith.mulf %342, %40 : vector<1x256xf32>
    %344 = arith.addf %340, %343 : vector<1x256xf32>
    %c74 = arith.constant 74 : index
    %345 = memref.load %arg2[%c74] : memref<144xf32, #tpu.memory_space<smem>>
    %346 = vector.broadcast %345 : f32 to vector<1x256xf32>
    %347 = arith.mulf %346, %43 : vector<1x256xf32>
    %348 = arith.addf %344, %347 : vector<1x256xf32>
    %c75 = arith.constant 75 : index
    %349 = memref.load %arg2[%c75] : memref<144xf32, #tpu.memory_space<smem>>
    %350 = vector.broadcast %349 : f32 to vector<1x256xf32>
    %351 = arith.mulf %350, %46 : vector<1x256xf32>
    %352 = arith.addf %348, %351 : vector<1x256xf32>
    %c76 = arith.constant 76 : index
    %353 = memref.load %arg2[%c76] : memref<144xf32, #tpu.memory_space<smem>>
    %354 = vector.broadcast %353 : f32 to vector<1x256xf32>
    %355 = arith.mulf %354, %47 : vector<1x256xf32>
    %356 = arith.addf %352, %355 : vector<1x256xf32>
    %c77 = arith.constant 77 : index
    %357 = memref.load %arg2[%c77] : memref<144xf32, #tpu.memory_space<smem>>
    %358 = vector.broadcast %357 : f32 to vector<1x256xf32>
    %359 = arith.mulf %358, %50 : vector<1x256xf32>
    %360 = arith.addf %356, %359 : vector<1x256xf32>
    %c78 = arith.constant 78 : index
    %361 = memref.load %arg2[%c78] : memref<144xf32, #tpu.memory_space<smem>>
    %362 = vector.broadcast %361 : f32 to vector<1x256xf32>
    %363 = arith.mulf %362, %53 : vector<1x256xf32>
    %364 = arith.addf %360, %363 : vector<1x256xf32>
    %c79 = arith.constant 79 : index
    %365 = memref.load %arg2[%c79] : memref<144xf32, #tpu.memory_space<smem>>
    %366 = vector.broadcast %365 : f32 to vector<1x256xf32>
    %367 = arith.mulf %366, %54 : vector<1x256xf32>
    %368 = arith.addf %364, %367 : vector<1x256xf32>
    %c80 = arith.constant 80 : index
    %369 = memref.load %arg2[%c80] : memref<144xf32, #tpu.memory_space<smem>>
    %370 = vector.broadcast %369 : f32 to vector<1x256xf32>
    %371 = arith.mulf %370, %57 : vector<1x256xf32>
    %372 = arith.addf %368, %371 : vector<1x256xf32>
    %c81 = arith.constant 81 : index
    %373 = memref.load %arg2[%c81] : memref<144xf32, #tpu.memory_space<smem>>
    %374 = vector.broadcast %373 : f32 to vector<1x256xf32>
    %375 = arith.mulf %374, %39 : vector<1x256xf32>
    %c82 = arith.constant 82 : index
    %376 = memref.load %arg2[%c82] : memref<144xf32, #tpu.memory_space<smem>>
    %377 = vector.broadcast %376 : f32 to vector<1x256xf32>
    %378 = arith.mulf %377, %40 : vector<1x256xf32>
    %379 = arith.addf %375, %378 : vector<1x256xf32>
    %c83 = arith.constant 83 : index
    %380 = memref.load %arg2[%c83] : memref<144xf32, #tpu.memory_space<smem>>
    %381 = vector.broadcast %380 : f32 to vector<1x256xf32>
    %382 = arith.mulf %381, %43 : vector<1x256xf32>
    %383 = arith.addf %379, %382 : vector<1x256xf32>
    %c84 = arith.constant 84 : index
    %384 = memref.load %arg2[%c84] : memref<144xf32, #tpu.memory_space<smem>>
    %385 = vector.broadcast %384 : f32 to vector<1x256xf32>
    %386 = arith.mulf %385, %46 : vector<1x256xf32>
    %387 = arith.addf %383, %386 : vector<1x256xf32>
    %c85 = arith.constant 85 : index
    %388 = memref.load %arg2[%c85] : memref<144xf32, #tpu.memory_space<smem>>
    %389 = vector.broadcast %388 : f32 to vector<1x256xf32>
    %390 = arith.mulf %389, %47 : vector<1x256xf32>
    %391 = arith.addf %387, %390 : vector<1x256xf32>
    %c86 = arith.constant 86 : index
    %392 = memref.load %arg2[%c86] : memref<144xf32, #tpu.memory_space<smem>>
    %393 = vector.broadcast %392 : f32 to vector<1x256xf32>
    %394 = arith.mulf %393, %50 : vector<1x256xf32>
    %395 = arith.addf %391, %394 : vector<1x256xf32>
    %c87 = arith.constant 87 : index
    %396 = memref.load %arg2[%c87] : memref<144xf32, #tpu.memory_space<smem>>
    %397 = vector.broadcast %396 : f32 to vector<1x256xf32>
    %398 = arith.mulf %397, %53 : vector<1x256xf32>
    %399 = arith.addf %395, %398 : vector<1x256xf32>
    %c88 = arith.constant 88 : index
    %400 = memref.load %arg2[%c88] : memref<144xf32, #tpu.memory_space<smem>>
    %401 = vector.broadcast %400 : f32 to vector<1x256xf32>
    %402 = arith.mulf %401, %54 : vector<1x256xf32>
    %403 = arith.addf %399, %402 : vector<1x256xf32>
    %c89 = arith.constant 89 : index
    %404 = memref.load %arg2[%c89] : memref<144xf32, #tpu.memory_space<smem>>
    %405 = vector.broadcast %404 : f32 to vector<1x256xf32>
    %406 = arith.mulf %405, %57 : vector<1x256xf32>
    %407 = arith.addf %403, %406 : vector<1x256xf32>
    %c90 = arith.constant 90 : index
    %408 = memref.load %arg2[%c90] : memref<144xf32, #tpu.memory_space<smem>>
    %409 = vector.broadcast %408 : f32 to vector<1x256xf32>
    %410 = arith.mulf %409, %39 : vector<1x256xf32>
    %c91 = arith.constant 91 : index
    %411 = memref.load %arg2[%c91] : memref<144xf32, #tpu.memory_space<smem>>
    %412 = vector.broadcast %411 : f32 to vector<1x256xf32>
    %413 = arith.mulf %412, %40 : vector<1x256xf32>
    %414 = arith.addf %410, %413 : vector<1x256xf32>
    %c92 = arith.constant 92 : index
    %415 = memref.load %arg2[%c92] : memref<144xf32, #tpu.memory_space<smem>>
    %416 = vector.broadcast %415 : f32 to vector<1x256xf32>
    %417 = arith.mulf %416, %43 : vector<1x256xf32>
    %418 = arith.addf %414, %417 : vector<1x256xf32>
    %c93 = arith.constant 93 : index
    %419 = memref.load %arg2[%c93] : memref<144xf32, #tpu.memory_space<smem>>
    %420 = vector.broadcast %419 : f32 to vector<1x256xf32>
    %421 = arith.mulf %420, %46 : vector<1x256xf32>
    %422 = arith.addf %418, %421 : vector<1x256xf32>
    %c94 = arith.constant 94 : index
    %423 = memref.load %arg2[%c94] : memref<144xf32, #tpu.memory_space<smem>>
    %424 = vector.broadcast %423 : f32 to vector<1x256xf32>
    %425 = arith.mulf %424, %47 : vector<1x256xf32>
    %426 = arith.addf %422, %425 : vector<1x256xf32>
    %c95 = arith.constant 95 : index
    %427 = memref.load %arg2[%c95] : memref<144xf32, #tpu.memory_space<smem>>
    %428 = vector.broadcast %427 : f32 to vector<1x256xf32>
    %429 = arith.mulf %428, %50 : vector<1x256xf32>
    %430 = arith.addf %426, %429 : vector<1x256xf32>
    %c96 = arith.constant 96 : index
    %431 = memref.load %arg2[%c96] : memref<144xf32, #tpu.memory_space<smem>>
    %432 = vector.broadcast %431 : f32 to vector<1x256xf32>
    %433 = arith.mulf %432, %53 : vector<1x256xf32>
    %434 = arith.addf %430, %433 : vector<1x256xf32>
    %c97 = arith.constant 97 : index
    %435 = memref.load %arg2[%c97] : memref<144xf32, #tpu.memory_space<smem>>
    %436 = vector.broadcast %435 : f32 to vector<1x256xf32>
    %437 = arith.mulf %436, %54 : vector<1x256xf32>
    %438 = arith.addf %434, %437 : vector<1x256xf32>
    %c98 = arith.constant 98 : index
    %439 = memref.load %arg2[%c98] : memref<144xf32, #tpu.memory_space<smem>>
    %440 = vector.broadcast %439 : f32 to vector<1x256xf32>
    %441 = arith.mulf %440, %57 : vector<1x256xf32>
    %442 = arith.addf %438, %441 : vector<1x256xf32>
    %c99 = arith.constant 99 : index
    %443 = memref.load %arg2[%c99] : memref<144xf32, #tpu.memory_space<smem>>
    %444 = vector.broadcast %443 : f32 to vector<1x256xf32>
    %445 = arith.mulf %444, %39 : vector<1x256xf32>
    %c100 = arith.constant 100 : index
    %446 = memref.load %arg2[%c100] : memref<144xf32, #tpu.memory_space<smem>>
    %447 = vector.broadcast %446 : f32 to vector<1x256xf32>
    %448 = arith.mulf %447, %40 : vector<1x256xf32>
    %449 = arith.addf %445, %448 : vector<1x256xf32>
    %c101 = arith.constant 101 : index
    %450 = memref.load %arg2[%c101] : memref<144xf32, #tpu.memory_space<smem>>
    %451 = vector.broadcast %450 : f32 to vector<1x256xf32>
    %452 = arith.mulf %451, %43 : vector<1x256xf32>
    %453 = arith.addf %449, %452 : vector<1x256xf32>
    %c102 = arith.constant 102 : index
    %454 = memref.load %arg2[%c102] : memref<144xf32, #tpu.memory_space<smem>>
    %455 = vector.broadcast %454 : f32 to vector<1x256xf32>
    %456 = arith.mulf %455, %46 : vector<1x256xf32>
    %457 = arith.addf %453, %456 : vector<1x256xf32>
    %c103 = arith.constant 103 : index
    %458 = memref.load %arg2[%c103] : memref<144xf32, #tpu.memory_space<smem>>
    %459 = vector.broadcast %458 : f32 to vector<1x256xf32>
    %460 = arith.mulf %459, %47 : vector<1x256xf32>
    %461 = arith.addf %457, %460 : vector<1x256xf32>
    %c104 = arith.constant 104 : index
    %462 = memref.load %arg2[%c104] : memref<144xf32, #tpu.memory_space<smem>>
    %463 = vector.broadcast %462 : f32 to vector<1x256xf32>
    %464 = arith.mulf %463, %50 : vector<1x256xf32>
    %465 = arith.addf %461, %464 : vector<1x256xf32>
    %c105 = arith.constant 105 : index
    %466 = memref.load %arg2[%c105] : memref<144xf32, #tpu.memory_space<smem>>
    %467 = vector.broadcast %466 : f32 to vector<1x256xf32>
    %468 = arith.mulf %467, %53 : vector<1x256xf32>
    %469 = arith.addf %465, %468 : vector<1x256xf32>
    %c106 = arith.constant 106 : index
    %470 = memref.load %arg2[%c106] : memref<144xf32, #tpu.memory_space<smem>>
    %471 = vector.broadcast %470 : f32 to vector<1x256xf32>
    %472 = arith.mulf %471, %54 : vector<1x256xf32>
    %473 = arith.addf %469, %472 : vector<1x256xf32>
    %c107 = arith.constant 107 : index
    %474 = memref.load %arg2[%c107] : memref<144xf32, #tpu.memory_space<smem>>
    %475 = vector.broadcast %474 : f32 to vector<1x256xf32>
    %476 = arith.mulf %475, %57 : vector<1x256xf32>
    %477 = arith.addf %473, %476 : vector<1x256xf32>
    %c108 = arith.constant 108 : index
    %478 = memref.load %arg2[%c108] : memref<144xf32, #tpu.memory_space<smem>>
    %479 = vector.broadcast %478 : f32 to vector<1x256xf32>
    %480 = arith.mulf %479, %39 : vector<1x256xf32>
    %c109 = arith.constant 109 : index
    %481 = memref.load %arg2[%c109] : memref<144xf32, #tpu.memory_space<smem>>
    %482 = vector.broadcast %481 : f32 to vector<1x256xf32>
    %483 = arith.mulf %482, %40 : vector<1x256xf32>
    %484 = arith.addf %480, %483 : vector<1x256xf32>
    %c110 = arith.constant 110 : index
    %485 = memref.load %arg2[%c110] : memref<144xf32, #tpu.memory_space<smem>>
    %486 = vector.broadcast %485 : f32 to vector<1x256xf32>
    %487 = arith.mulf %486, %43 : vector<1x256xf32>
    %488 = arith.addf %484, %487 : vector<1x256xf32>
    %c111_33 = arith.constant 111 : index
    %489 = memref.load %arg2[%c111_33] : memref<144xf32, #tpu.memory_space<smem>>
    %490 = vector.broadcast %489 : f32 to vector<1x256xf32>
    %491 = arith.mulf %490, %46 : vector<1x256xf32>
    %492 = arith.addf %488, %491 : vector<1x256xf32>
    %c112_34 = arith.constant 112 : index
    %493 = memref.load %arg2[%c112_34] : memref<144xf32, #tpu.memory_space<smem>>
    %494 = vector.broadcast %493 : f32 to vector<1x256xf32>
    %495 = arith.mulf %494, %47 : vector<1x256xf32>
    %496 = arith.addf %492, %495 : vector<1x256xf32>
    %c113_35 = arith.constant 113 : index
    %497 = memref.load %arg2[%c113_35] : memref<144xf32, #tpu.memory_space<smem>>
    %498 = vector.broadcast %497 : f32 to vector<1x256xf32>
    %499 = arith.mulf %498, %50 : vector<1x256xf32>
    %500 = arith.addf %496, %499 : vector<1x256xf32>
    %c114 = arith.constant 114 : index
    %501 = memref.load %arg2[%c114] : memref<144xf32, #tpu.memory_space<smem>>
    %502 = vector.broadcast %501 : f32 to vector<1x256xf32>
    %503 = arith.mulf %502, %53 : vector<1x256xf32>
    %504 = arith.addf %500, %503 : vector<1x256xf32>
    %c115 = arith.constant 115 : index
    %505 = memref.load %arg2[%c115] : memref<144xf32, #tpu.memory_space<smem>>
    %506 = vector.broadcast %505 : f32 to vector<1x256xf32>
    %507 = arith.mulf %506, %54 : vector<1x256xf32>
    %508 = arith.addf %504, %507 : vector<1x256xf32>
    %c116 = arith.constant 116 : index
    %509 = memref.load %arg2[%c116] : memref<144xf32, #tpu.memory_space<smem>>
    %510 = vector.broadcast %509 : f32 to vector<1x256xf32>
    %511 = arith.mulf %510, %57 : vector<1x256xf32>
    %512 = arith.addf %508, %511 : vector<1x256xf32>
    %c117 = arith.constant 117 : index
    %513 = memref.load %arg2[%c117] : memref<144xf32, #tpu.memory_space<smem>>
    %514 = vector.broadcast %513 : f32 to vector<1x256xf32>
    %515 = arith.mulf %514, %39 : vector<1x256xf32>
    %c118 = arith.constant 118 : index
    %516 = memref.load %arg2[%c118] : memref<144xf32, #tpu.memory_space<smem>>
    %517 = vector.broadcast %516 : f32 to vector<1x256xf32>
    %518 = arith.mulf %517, %40 : vector<1x256xf32>
    %519 = arith.addf %515, %518 : vector<1x256xf32>
    %c119 = arith.constant 119 : index
    %520 = memref.load %arg2[%c119] : memref<144xf32, #tpu.memory_space<smem>>
    %521 = vector.broadcast %520 : f32 to vector<1x256xf32>
    %522 = arith.mulf %521, %43 : vector<1x256xf32>
    %523 = arith.addf %519, %522 : vector<1x256xf32>
    %c120 = arith.constant 120 : index
    %524 = memref.load %arg2[%c120] : memref<144xf32, #tpu.memory_space<smem>>
    %525 = vector.broadcast %524 : f32 to vector<1x256xf32>
    %526 = arith.mulf %525, %46 : vector<1x256xf32>
    %527 = arith.addf %523, %526 : vector<1x256xf32>
    %c121 = arith.constant 121 : index
    %528 = memref.load %arg2[%c121] : memref<144xf32, #tpu.memory_space<smem>>
    %529 = vector.broadcast %528 : f32 to vector<1x256xf32>
    %530 = arith.mulf %529, %47 : vector<1x256xf32>
    %531 = arith.addf %527, %530 : vector<1x256xf32>
    %c122 = arith.constant 122 : index
    %532 = memref.load %arg2[%c122] : memref<144xf32, #tpu.memory_space<smem>>
    %533 = vector.broadcast %532 : f32 to vector<1x256xf32>
    %534 = arith.mulf %533, %50 : vector<1x256xf32>
    %535 = arith.addf %531, %534 : vector<1x256xf32>
    %c123 = arith.constant 123 : index
    %536 = memref.load %arg2[%c123] : memref<144xf32, #tpu.memory_space<smem>>
    %537 = vector.broadcast %536 : f32 to vector<1x256xf32>
    %538 = arith.mulf %537, %53 : vector<1x256xf32>
    %539 = arith.addf %535, %538 : vector<1x256xf32>
    %c124 = arith.constant 124 : index
    %540 = memref.load %arg2[%c124] : memref<144xf32, #tpu.memory_space<smem>>
    %541 = vector.broadcast %540 : f32 to vector<1x256xf32>
    %542 = arith.mulf %541, %54 : vector<1x256xf32>
    %543 = arith.addf %539, %542 : vector<1x256xf32>
    %c125 = arith.constant 125 : index
    %544 = memref.load %arg2[%c125] : memref<144xf32, #tpu.memory_space<smem>>
    %545 = vector.broadcast %544 : f32 to vector<1x256xf32>
    %546 = arith.mulf %545, %57 : vector<1x256xf32>
    %547 = arith.addf %543, %546 : vector<1x256xf32>
    %c126 = arith.constant 126 : index
    %548 = memref.load %arg2[%c126] : memref<144xf32, #tpu.memory_space<smem>>
    %549 = vector.broadcast %548 : f32 to vector<1x256xf32>
    %550 = arith.mulf %549, %39 : vector<1x256xf32>
    %c127_36 = arith.constant 127 : index
    %551 = memref.load %arg2[%c127_36] : memref<144xf32, #tpu.memory_space<smem>>
    %552 = vector.broadcast %551 : f32 to vector<1x256xf32>
    %553 = arith.mulf %552, %40 : vector<1x256xf32>
    %554 = arith.addf %550, %553 : vector<1x256xf32>
    %c128_37 = arith.constant 128 : index
    %555 = memref.load %arg2[%c128_37] : memref<144xf32, #tpu.memory_space<smem>>
    %556 = vector.broadcast %555 : f32 to vector<1x256xf32>
    %557 = arith.mulf %556, %43 : vector<1x256xf32>
    %558 = arith.addf %554, %557 : vector<1x256xf32>
    %c129_38 = arith.constant 129 : index
    %559 = memref.load %arg2[%c129_38] : memref<144xf32, #tpu.memory_space<smem>>
    %560 = vector.broadcast %559 : f32 to vector<1x256xf32>
    %561 = arith.mulf %560, %46 : vector<1x256xf32>
    %562 = arith.addf %558, %561 : vector<1x256xf32>
    %c130 = arith.constant 130 : index
    %563 = memref.load %arg2[%c130] : memref<144xf32, #tpu.memory_space<smem>>
    %564 = vector.broadcast %563 : f32 to vector<1x256xf32>
    %565 = arith.mulf %564, %47 : vector<1x256xf32>
    %566 = arith.addf %562, %565 : vector<1x256xf32>
    %c131 = arith.constant 131 : index
    %567 = memref.load %arg2[%c131] : memref<144xf32, #tpu.memory_space<smem>>
    %568 = vector.broadcast %567 : f32 to vector<1x256xf32>
    %569 = arith.mulf %568, %50 : vector<1x256xf32>
    %570 = arith.addf %566, %569 : vector<1x256xf32>
    %c132 = arith.constant 132 : index
    %571 = memref.load %arg2[%c132] : memref<144xf32, #tpu.memory_space<smem>>
    %572 = vector.broadcast %571 : f32 to vector<1x256xf32>
    %573 = arith.mulf %572, %53 : vector<1x256xf32>
    %574 = arith.addf %570, %573 : vector<1x256xf32>
    %c133 = arith.constant 133 : index
    %575 = memref.load %arg2[%c133] : memref<144xf32, #tpu.memory_space<smem>>
    %576 = vector.broadcast %575 : f32 to vector<1x256xf32>
    %577 = arith.mulf %576, %54 : vector<1x256xf32>
    %578 = arith.addf %574, %577 : vector<1x256xf32>
    %c134 = arith.constant 134 : index
    %579 = memref.load %arg2[%c134] : memref<144xf32, #tpu.memory_space<smem>>
    %580 = vector.broadcast %579 : f32 to vector<1x256xf32>
    %581 = arith.mulf %580, %57 : vector<1x256xf32>
    %582 = arith.addf %578, %581 : vector<1x256xf32>
    %c135 = arith.constant 135 : index
    %583 = memref.load %arg2[%c135] : memref<144xf32, #tpu.memory_space<smem>>
    %584 = vector.broadcast %583 : f32 to vector<1x256xf32>
    %585 = arith.mulf %584, %39 : vector<1x256xf32>
    %c136 = arith.constant 136 : index
    %586 = memref.load %arg2[%c136] : memref<144xf32, #tpu.memory_space<smem>>
    %587 = vector.broadcast %586 : f32 to vector<1x256xf32>
    %588 = arith.mulf %587, %40 : vector<1x256xf32>
    %589 = arith.addf %585, %588 : vector<1x256xf32>
    %c137 = arith.constant 137 : index
    %590 = memref.load %arg2[%c137] : memref<144xf32, #tpu.memory_space<smem>>
    %591 = vector.broadcast %590 : f32 to vector<1x256xf32>
    %592 = arith.mulf %591, %43 : vector<1x256xf32>
    %593 = arith.addf %589, %592 : vector<1x256xf32>
    %c138 = arith.constant 138 : index
    %594 = memref.load %arg2[%c138] : memref<144xf32, #tpu.memory_space<smem>>
    %595 = vector.broadcast %594 : f32 to vector<1x256xf32>
    %596 = arith.mulf %595, %46 : vector<1x256xf32>
    %597 = arith.addf %593, %596 : vector<1x256xf32>
    %c139 = arith.constant 139 : index
    %598 = memref.load %arg2[%c139] : memref<144xf32, #tpu.memory_space<smem>>
    %599 = vector.broadcast %598 : f32 to vector<1x256xf32>
    %600 = arith.mulf %599, %47 : vector<1x256xf32>
    %601 = arith.addf %597, %600 : vector<1x256xf32>
    %c140 = arith.constant 140 : index
    %602 = memref.load %arg2[%c140] : memref<144xf32, #tpu.memory_space<smem>>
    %603 = vector.broadcast %602 : f32 to vector<1x256xf32>
    %604 = arith.mulf %603, %50 : vector<1x256xf32>
    %605 = arith.addf %601, %604 : vector<1x256xf32>
    %c141 = arith.constant 141 : index
    %606 = memref.load %arg2[%c141] : memref<144xf32, #tpu.memory_space<smem>>
    %607 = vector.broadcast %606 : f32 to vector<1x256xf32>
    %608 = arith.mulf %607, %53 : vector<1x256xf32>
    %609 = arith.addf %605, %608 : vector<1x256xf32>
    %c142 = arith.constant 142 : index
    %610 = memref.load %arg2[%c142] : memref<144xf32, #tpu.memory_space<smem>>
    %611 = vector.broadcast %610 : f32 to vector<1x256xf32>
    %612 = arith.mulf %611, %54 : vector<1x256xf32>
    %613 = arith.addf %609, %612 : vector<1x256xf32>
    %c143_39 = arith.constant 143 : index
    %614 = memref.load %arg2[%c143_39] : memref<144xf32, #tpu.memory_space<smem>>
    %615 = vector.broadcast %614 : f32 to vector<1x256xf32>
    %616 = arith.mulf %615, %57 : vector<1x256xf32>
    %617 = arith.addf %613, %616 : vector<1x256xf32>
    %c0_40 = arith.constant 0 : index
    %618 = memref.load %arg3[%c0_40] : memref<144xf32, #tpu.memory_space<smem>>
    %619 = vector.broadcast %618 : f32 to vector<1x256xf32>
    %620 = arith.mulf %619, %92 : vector<1x256xf32>
    %c9_41 = arith.constant 9 : index
    %621 = memref.load %arg3[%c9_41] : memref<144xf32, #tpu.memory_space<smem>>
    %622 = vector.broadcast %621 : f32 to vector<1x256xf32>
    %623 = arith.mulf %622, %127 : vector<1x256xf32>
    %624 = arith.addf %620, %623 : vector<1x256xf32>
    %c18_42 = arith.constant 18 : index
    %625 = memref.load %arg3[%c18_42] : memref<144xf32, #tpu.memory_space<smem>>
    %626 = vector.broadcast %625 : f32 to vector<1x256xf32>
    %627 = arith.mulf %626, %162 : vector<1x256xf32>
    %628 = arith.addf %624, %627 : vector<1x256xf32>
    %c27_43 = arith.constant 27 : index
    %629 = memref.load %arg3[%c27_43] : memref<144xf32, #tpu.memory_space<smem>>
    %630 = vector.broadcast %629 : f32 to vector<1x256xf32>
    %631 = arith.mulf %630, %197 : vector<1x256xf32>
    %632 = arith.addf %628, %631 : vector<1x256xf32>
    %c36_44 = arith.constant 36 : index
    %633 = memref.load %arg3[%c36_44] : memref<144xf32, #tpu.memory_space<smem>>
    %634 = vector.broadcast %633 : f32 to vector<1x256xf32>
    %635 = arith.mulf %634, %232 : vector<1x256xf32>
    %636 = arith.addf %632, %635 : vector<1x256xf32>
    %c45_45 = arith.constant 45 : index
    %637 = memref.load %arg3[%c45_45] : memref<144xf32, #tpu.memory_space<smem>>
    %638 = vector.broadcast %637 : f32 to vector<1x256xf32>
    %639 = arith.mulf %638, %267 : vector<1x256xf32>
    %640 = arith.addf %636, %639 : vector<1x256xf32>
    %c54_46 = arith.constant 54 : index
    %641 = memref.load %arg3[%c54_46] : memref<144xf32, #tpu.memory_space<smem>>
    %642 = vector.broadcast %641 : f32 to vector<1x256xf32>
    %643 = arith.mulf %642, %302 : vector<1x256xf32>
    %644 = arith.addf %640, %643 : vector<1x256xf32>
    %c63_47 = arith.constant 63 : index
    %645 = memref.load %arg3[%c63_47] : memref<144xf32, #tpu.memory_space<smem>>
    %646 = vector.broadcast %645 : f32 to vector<1x256xf32>
    %647 = arith.mulf %646, %337 : vector<1x256xf32>
    %648 = arith.addf %644, %647 : vector<1x256xf32>
    %c72_48 = arith.constant 72 : index
    %649 = memref.load %arg3[%c72_48] : memref<144xf32, #tpu.memory_space<smem>>
    %650 = vector.broadcast %649 : f32 to vector<1x256xf32>
    %651 = arith.mulf %650, %372 : vector<1x256xf32>
    %652 = arith.addf %648, %651 : vector<1x256xf32>
    %c81_49 = arith.constant 81 : index
    %653 = memref.load %arg3[%c81_49] : memref<144xf32, #tpu.memory_space<smem>>
    %654 = vector.broadcast %653 : f32 to vector<1x256xf32>
    %655 = arith.mulf %654, %407 : vector<1x256xf32>
    %656 = arith.addf %652, %655 : vector<1x256xf32>
    %c90_50 = arith.constant 90 : index
    %657 = memref.load %arg3[%c90_50] : memref<144xf32, #tpu.memory_space<smem>>
    %658 = vector.broadcast %657 : f32 to vector<1x256xf32>
    %659 = arith.mulf %658, %442 : vector<1x256xf32>
    %660 = arith.addf %656, %659 : vector<1x256xf32>
    %c99_51 = arith.constant 99 : index
    %661 = memref.load %arg3[%c99_51] : memref<144xf32, #tpu.memory_space<smem>>
    %662 = vector.broadcast %661 : f32 to vector<1x256xf32>
    %663 = arith.mulf %662, %477 : vector<1x256xf32>
    %664 = arith.addf %660, %663 : vector<1x256xf32>
    %c108_52 = arith.constant 108 : index
    %665 = memref.load %arg3[%c108_52] : memref<144xf32, #tpu.memory_space<smem>>
    %666 = vector.broadcast %665 : f32 to vector<1x256xf32>
    %667 = arith.mulf %666, %512 : vector<1x256xf32>
    %668 = arith.addf %664, %667 : vector<1x256xf32>
    %c117_53 = arith.constant 117 : index
    %669 = memref.load %arg3[%c117_53] : memref<144xf32, #tpu.memory_space<smem>>
    %670 = vector.broadcast %669 : f32 to vector<1x256xf32>
    %671 = arith.mulf %670, %547 : vector<1x256xf32>
    %672 = arith.addf %668, %671 : vector<1x256xf32>
    %c126_54 = arith.constant 126 : index
    %673 = memref.load %arg3[%c126_54] : memref<144xf32, #tpu.memory_space<smem>>
    %674 = vector.broadcast %673 : f32 to vector<1x256xf32>
    %675 = arith.mulf %674, %582 : vector<1x256xf32>
    %676 = arith.addf %672, %675 : vector<1x256xf32>
    %c135_55 = arith.constant 135 : index
    %677 = memref.load %arg3[%c135_55] : memref<144xf32, #tpu.memory_space<smem>>
    %678 = vector.broadcast %677 : f32 to vector<1x256xf32>
    %679 = arith.mulf %678, %617 : vector<1x256xf32>
    %680 = arith.addf %676, %679 : vector<1x256xf32>
    %c0_56 = arith.constant 0 : index
    %c128_57 = arith.constant 128 : index
    %681 = vector.load %arg8[%c0_56, %c128_57] : memref<1x512xf32, #tpu.memory_space<vmem>>, vector<1x256xf32>
    tpu.vector_store %arg8[%c0_56, %c128_57], %680 {strides = array<i32>} : memref<1x512xf32, #tpu.memory_space<vmem>>, vector<1x256xf32>,
    %c0_58 = arith.constant 0 : index
    %c111_59 = arith.constant 111 : index
    %682 = vector.load %arg8[%c0_58, %c111_59] : memref<1x512xf32, #tpu.memory_space<vmem>>, vector<1x256xf32>
    %cst_60 = arith.constant 0.000000e+00 : f32
    %683 = vector.broadcast %cst_60 : f32 to vector<1x256xf32>
    %684 = arith.select %33, %682, %683 : vector<1x256xi1>, vector<1x256xf32>
    %685 = arith.addf %14, %684 : vector<1x256xf32>
    %c1_61 = arith.constant 1 : index
    %686 = memref.load %arg3[%c1_61] : memref<144xf32, #tpu.memory_space<smem>>
    %687 = vector.broadcast %686 : f32 to vector<1x256xf32>
    %688 = arith.mulf %687, %92 : vector<1x256xf32>
    %c10_62 = arith.constant 10 : index
    %689 = memref.load %arg3[%c10_62] : memref<144xf32, #tpu.memory_space<smem>>
    %690 = vector.broadcast %689 : f32 to vector<1x256xf32>
    %691 = arith.mulf %690, %127 : vector<1x256xf32>
    %692 = arith.addf %688, %691 : vector<1x256xf32>
    %c19_63 = arith.constant 19 : index
    %693 = memref.load %arg3[%c19_63] : memref<144xf32, #tpu.memory_space<smem>>
    %694 = vector.broadcast %693 : f32 to vector<1x256xf32>
    %695 = arith.mulf %694, %162 : vector<1x256xf32>
    %696 = arith.addf %692, %695 : vector<1x256xf32>
    %c28_64 = arith.constant 28 : index
    %697 = memref.load %arg3[%c28_64] : memref<144xf32, #tpu.memory_space<smem>>
    %698 = vector.broadcast %697 : f32 to vector<1x256xf32>
    %699 = arith.mulf %698, %197 : vector<1x256xf32>
    %700 = arith.addf %696, %699 : vector<1x256xf32>
    %c37_65 = arith.constant 37 : index
    %701 = memref.load %arg3[%c37_65] : memref<144xf32, #tpu.memory_space<smem>>
    %702 = vector.broadcast %701 : f32 to vector<1x256xf32>
    %703 = arith.mulf %702, %232 : vector<1x256xf32>
    %704 = arith.addf %700, %703 : vector<1x256xf32>
    %c46_66 = arith.constant 46 : index
    %705 = memref.load %arg3[%c46_66] : memref<144xf32, #tpu.memory_space<smem>>
    %706 = vector.broadcast %705 : f32 to vector<1x256xf32>
    %707 = arith.mulf %706, %267 : vector<1x256xf32>
    %708 = arith.addf %704, %707 : vector<1x256xf32>
    %c55_67 = arith.constant 55 : index
    %709 = memref.load %arg3[%c55_67] : memref<144xf32, #tpu.memory_space<smem>>
    %710 = vector.broadcast %709 : f32 to vector<1x256xf32>
    %711 = arith.mulf %710, %302 : vector<1x256xf32>
    %712 = arith.addf %708, %711 : vector<1x256xf32>
    %c64_68 = arith.constant 64 : index
    %713 = memref.load %arg3[%c64_68] : memref<144xf32, #tpu.memory_space<smem>>
    %714 = vector.broadcast %713 : f32 to vector<1x256xf32>
    %715 = arith.mulf %714, %337 : vector<1x256xf32>
    %716 = arith.addf %712, %715 : vector<1x256xf32>
    %c73_69 = arith.constant 73 : index
    %717 = memref.load %arg3[%c73_69] : memref<144xf32, #tpu.memory_space<smem>>
    %718 = vector.broadcast %717 : f32 to vector<1x256xf32>
    %719 = arith.mulf %718, %372 : vector<1x256xf32>
    %720 = arith.addf %716, %719 : vector<1x256xf32>
    %c82_70 = arith.constant 82 : index
    %721 = memref.load %arg3[%c82_70] : memref<144xf32, #tpu.memory_space<smem>>
    %722 = vector.broadcast %721 : f32 to vector<1x256xf32>
    %723 = arith.mulf %722, %407 : vector<1x256xf32>
    %724 = arith.addf %720, %723 : vector<1x256xf32>
    %c91_71 = arith.constant 91 : index
    %725 = memref.load %arg3[%c91_71] : memref<144xf32, #tpu.memory_space<smem>>
    %726 = vector.broadcast %725 : f32 to vector<1x256xf32>
    %727 = arith.mulf %726, %442 : vector<1x256xf32>
    %728 = arith.addf %724, %727 : vector<1x256xf32>
    %c100_72 = arith.constant 100 : index
    %729 = memref.load %arg3[%c100_72] : memref<144xf32, #tpu.memory_space<smem>>
    %730 = vector.broadcast %729 : f32 to vector<1x256xf32>
    %731 = arith.mulf %730, %477 : vector<1x256xf32>
    %732 = arith.addf %728, %731 : vector<1x256xf32>
    %c109_73 = arith.constant 109 : index
    %733 = memref.load %arg3[%c109_73] : memref<144xf32, #tpu.memory_space<smem>>
    %734 = vector.broadcast %733 : f32 to vector<1x256xf32>
    %735 = arith.mulf %734, %512 : vector<1x256xf32>
    %736 = arith.addf %732, %735 : vector<1x256xf32>
    %c118_74 = arith.constant 118 : index
    %737 = memref.load %arg3[%c118_74] : memref<144xf32, #tpu.memory_space<smem>>
    %738 = vector.broadcast %737 : f32 to vector<1x256xf32>
    %739 = arith.mulf %738, %547 : vector<1x256xf32>
    %740 = arith.addf %736, %739 : vector<1x256xf32>
    %c127_75 = arith.constant 127 : index
    %741 = memref.load %arg3[%c127_75] : memref<144xf32, #tpu.memory_space<smem>>
    %742 = vector.broadcast %741 : f32 to vector<1x256xf32>
    %743 = arith.mulf %742, %582 : vector<1x256xf32>
    %744 = arith.addf %740, %743 : vector<1x256xf32>
    %c136_76 = arith.constant 136 : index
    %745 = memref.load %arg3[%c136_76] : memref<144xf32, #tpu.memory_space<smem>>
    %746 = vector.broadcast %745 : f32 to vector<1x256xf32>
    %747 = arith.mulf %746, %617 : vector<1x256xf32>
    %748 = arith.addf %744, %747 : vector<1x256xf32>
    %c0_77 = arith.constant 0 : index
    %c128_78 = arith.constant 128 : index
    %749 = vector.load %arg8[%c0_77, %c128_78] : memref<1x512xf32, #tpu.memory_space<vmem>>, vector<1x256xf32>
    tpu.vector_store %arg8[%c0_77, %c128_78], %748 {strides = array<i32>} : memref<1x512xf32, #tpu.memory_space<vmem>>, vector<1x256xf32>,
    %c0_79 = arith.constant 0 : index
    %c112_80 = arith.constant 112 : index
    %750 = vector.load %arg8[%c0_79, %c112_80] : memref<1x512xf32, #tpu.memory_space<vmem>>, vector<1x256xf32>
    %751 = arith.addf %685, %750 : vector<1x256xf32>
    %c2_81 = arith.constant 2 : index
    %752 = memref.load %arg3[%c2_81] : memref<144xf32, #tpu.memory_space<smem>>
    %753 = vector.broadcast %752 : f32 to vector<1x256xf32>
    %754 = arith.mulf %753, %92 : vector<1x256xf32>
    %c11_82 = arith.constant 11 : index
    %755 = memref.load %arg3[%c11_82] : memref<144xf32, #tpu.memory_space<smem>>
    %756 = vector.broadcast %755 : f32 to vector<1x256xf32>
    %757 = arith.mulf %756, %127 : vector<1x256xf32>
    %758 = arith.addf %754, %757 : vector<1x256xf32>
    %c20_83 = arith.constant 20 : index
    %759 = memref.load %arg3[%c20_83] : memref<144xf32, #tpu.memory_space<smem>>
    %760 = vector.broadcast %759 : f32 to vector<1x256xf32>
    %761 = arith.mulf %760, %162 : vector<1x256xf32>
    %762 = arith.addf %758, %761 : vector<1x256xf32>
    %c29_84 = arith.constant 29 : index
    %763 = memref.load %arg3[%c29_84] : memref<144xf32, #tpu.memory_space<smem>>
    %764 = vector.broadcast %763 : f32 to vector<1x256xf32>
    %765 = arith.mulf %764, %197 : vector<1x256xf32>
    %766 = arith.addf %762, %765 : vector<1x256xf32>
    %c38_85 = arith.constant 38 : index
    %767 = memref.load %arg3[%c38_85] : memref<144xf32, #tpu.memory_space<smem>>
    %768 = vector.broadcast %767 : f32 to vector<1x256xf32>
    %769 = arith.mulf %768, %232 : vector<1x256xf32>
    %770 = arith.addf %766, %769 : vector<1x256xf32>
    %c47_86 = arith.constant 47 : index
    %771 = memref.load %arg3[%c47_86] : memref<144xf32, #tpu.memory_space<smem>>
    %772 = vector.broadcast %771 : f32 to vector<1x256xf32>
    %773 = arith.mulf %772, %267 : vector<1x256xf32>
    %774 = arith.addf %770, %773 : vector<1x256xf32>
    %c56_87 = arith.constant 56 : index
    %775 = memref.load %arg3[%c56_87] : memref<144xf32, #tpu.memory_space<smem>>
    %776 = vector.broadcast %775 : f32 to vector<1x256xf32>
    %777 = arith.mulf %776, %302 : vector<1x256xf32>
    %778 = arith.addf %774, %777 : vector<1x256xf32>
    %c65_88 = arith.constant 65 : index
    %779 = memref.load %arg3[%c65_88] : memref<144xf32, #tpu.memory_space<smem>>
    %780 = vector.broadcast %779 : f32 to vector<1x256xf32>
    %781 = arith.mulf %780, %337 : vector<1x256xf32>
    %782 = arith.addf %778, %781 : vector<1x256xf32>
    %c74_89 = arith.constant 74 : index
    %783 = memref.load %arg3[%c74_89] : memref<144xf32, #tpu.memory_space<smem>>
    %784 = vector.broadcast %783 : f32 to vector<1x256xf32>
    %785 = arith.mulf %784, %372 : vector<1x256xf32>
    %786 = arith.addf %782, %785 : vector<1x256xf32>
    %c83_90 = arith.constant 83 : index
    %787 = memref.load %arg3[%c83_90] : memref<144xf32, #tpu.memory_space<smem>>
    %788 = vector.broadcast %787 : f32 to vector<1x256xf32>
    %789 = arith.mulf %788, %407 : vector<1x256xf32>
    %790 = arith.addf %786, %789 : vector<1x256xf32>
    %c92_91 = arith.constant 92 : index
    %791 = memref.load %arg3[%c92_91] : memref<144xf32, #tpu.memory_space<smem>>
    %792 = vector.broadcast %791 : f32 to vector<1x256xf32>
    %793 = arith.mulf %792, %442 : vector<1x256xf32>
    %794 = arith.addf %790, %793 : vector<1x256xf32>
    %c101_92 = arith.constant 101 : index
    %795 = memref.load %arg3[%c101_92] : memref<144xf32, #tpu.memory_space<smem>>
    %796 = vector.broadcast %795 : f32 to vector<1x256xf32>
    %797 = arith.mulf %796, %477 : vector<1x256xf32>
    %798 = arith.addf %794, %797 : vector<1x256xf32>
    %c110_93 = arith.constant 110 : index
    %799 = memref.load %arg3[%c110_93] : memref<144xf32, #tpu.memory_space<smem>>
    %800 = vector.broadcast %799 : f32 to vector<1x256xf32>
    %801 = arith.mulf %800, %512 : vector<1x256xf32>
    %802 = arith.addf %798, %801 : vector<1x256xf32>
    %c119_94 = arith.constant 119 : index
    %803 = memref.load %arg3[%c119_94] : memref<144xf32, #tpu.memory_space<smem>>
    %804 = vector.broadcast %803 : f32 to vector<1x256xf32>
    %805 = arith.mulf %804, %547 : vector<1x256xf32>
    %806 = arith.addf %802, %805 : vector<1x256xf32>
    %c128_95 = arith.constant 128 : index
    %807 = memref.load %arg3[%c128_95] : memref<144xf32, #tpu.memory_space<smem>>
    %808 = vector.broadcast %807 : f32 to vector<1x256xf32>
    %809 = arith.mulf %808, %582 : vector<1x256xf32>
    %810 = arith.addf %806, %809 : vector<1x256xf32>
    %c137_96 = arith.constant 137 : index
    %811 = memref.load %arg3[%c137_96] : memref<144xf32, #tpu.memory_space<smem>>
    %812 = vector.broadcast %811 : f32 to vector<1x256xf32>
    %813 = arith.mulf %812, %617 : vector<1x256xf32>
    %814 = arith.addf %810, %813 : vector<1x256xf32>
    %c0_97 = arith.constant 0 : index
    %c128_98 = arith.constant 128 : index
    %815 = vector.load %arg8[%c0_97, %c128_98] : memref<1x512xf32, #tpu.memory_space<vmem>>, vector<1x256xf32>
    tpu.vector_store %arg8[%c0_97, %c128_98], %814 {strides = array<i32>} : memref<1x512xf32, #tpu.memory_space<vmem>>, vector<1x256xf32>,
    %c0_99 = arith.constant 0 : index
    %c113_100 = arith.constant 113 : index
    %816 = vector.load %arg8[%c0_99, %c113_100] : memref<1x512xf32, #tpu.memory_space<vmem>>, vector<1x256xf32>
    %cst_101 = arith.constant 0.000000e+00 : f32
    %817 = vector.broadcast %cst_101 : f32 to vector<1x256xf32>
    %818 = arith.select %35, %816, %817 : vector<1x256xi1>, vector<1x256xf32>
    %819 = arith.addf %751, %818 : vector<1x256xf32>
    %c3_102 = arith.constant 3 : index
    %820 = memref.load %arg3[%c3_102] : memref<144xf32, #tpu.memory_space<smem>>
    %821 = vector.broadcast %820 : f32 to vector<1x256xf32>
    %822 = arith.mulf %821, %92 : vector<1x256xf32>
    %c12_103 = arith.constant 12 : index
    %823 = memref.load %arg3[%c12_103] : memref<144xf32, #tpu.memory_space<smem>>
    %824 = vector.broadcast %823 : f32 to vector<1x256xf32>
    %825 = arith.mulf %824, %127 : vector<1x256xf32>
    %826 = arith.addf %822, %825 : vector<1x256xf32>
    %c21_104 = arith.constant 21 : index
    %827 = memref.load %arg3[%c21_104] : memref<144xf32, #tpu.memory_space<smem>>
    %828 = vector.broadcast %827 : f32 to vector<1x256xf32>
    %829 = arith.mulf %828, %162 : vector<1x256xf32>
    %830 = arith.addf %826, %829 : vector<1x256xf32>
    %c30_105 = arith.constant 30 : index
    %831 = memref.load %arg3[%c30_105] : memref<144xf32, #tpu.memory_space<smem>>
    %832 = vector.broadcast %831 : f32 to vector<1x256xf32>
    %833 = arith.mulf %832, %197 : vector<1x256xf32>
    %834 = arith.addf %830, %833 : vector<1x256xf32>
    %c39_106 = arith.constant 39 : index
    %835 = memref.load %arg3[%c39_106] : memref<144xf32, #tpu.memory_space<smem>>
    %836 = vector.broadcast %835 : f32 to vector<1x256xf32>
    %837 = arith.mulf %836, %232 : vector<1x256xf32>
    %838 = arith.addf %834, %837 : vector<1x256xf32>
    %c48_107 = arith.constant 48 : index
    %839 = memref.load %arg3[%c48_107] : memref<144xf32, #tpu.memory_space<smem>>
    %840 = vector.broadcast %839 : f32 to vector<1x256xf32>
    %841 = arith.mulf %840, %267 : vector<1x256xf32>
    %842 = arith.addf %838, %841 : vector<1x256xf32>
    %c57_108 = arith.constant 57 : index
    %843 = memref.load %arg3[%c57_108] : memref<144xf32, #tpu.memory_space<smem>>
    %844 = vector.broadcast %843 : f32 to vector<1x256xf32>
    %845 = arith.mulf %844, %302 : vector<1x256xf32>
    %846 = arith.addf %842, %845 : vector<1x256xf32>
    %c66_109 = arith.constant 66 : index
    %847 = memref.load %arg3[%c66_109] : memref<144xf32, #tpu.memory_space<smem>>
    %848 = vector.broadcast %847 : f32 to vector<1x256xf32>
    %849 = arith.mulf %848, %337 : vector<1x256xf32>
    %850 = arith.addf %846, %849 : vector<1x256xf32>
    %c75_110 = arith.constant 75 : index
    %851 = memref.load %arg3[%c75_110] : memref<144xf32, #tpu.memory_space<smem>>
    %852 = vector.broadcast %851 : f32 to vector<1x256xf32>
    %853 = arith.mulf %852, %372 : vector<1x256xf32>
    %854 = arith.addf %850, %853 : vector<1x256xf32>
    %c84_111 = arith.constant 84 : index
    %855 = memref.load %arg3[%c84_111] : memref<144xf32, #tpu.memory_space<smem>>
    %856 = vector.broadcast %855 : f32 to vector<1x256xf32>
    %857 = arith.mulf %856, %407 : vector<1x256xf32>
    %858 = arith.addf %854, %857 : vector<1x256xf32>
    %c93_112 = arith.constant 93 : index
    %859 = memref.load %arg3[%c93_112] : memref<144xf32, #tpu.memory_space<smem>>
    %860 = vector.broadcast %859 : f32 to vector<1x256xf32>
    %861 = arith.mulf %860, %442 : vector<1x256xf32>
    %862 = arith.addf %858, %861 : vector<1x256xf32>
    %c102_113 = arith.constant 102 : index
    %863 = memref.load %arg3[%c102_113] : memref<144xf32, #tpu.memory_space<smem>>
    %864 = vector.broadcast %863 : f32 to vector<1x256xf32>
    %865 = arith.mulf %864, %477 : vector<1x256xf32>
    %866 = arith.addf %862, %865 : vector<1x256xf32>
    %c111_114 = arith.constant 111 : index
    %867 = memref.load %arg3[%c111_114] : memref<144xf32, #tpu.memory_space<smem>>
    %868 = vector.broadcast %867 : f32 to vector<1x256xf32>
    %869 = arith.mulf %868, %512 : vector<1x256xf32>
    %870 = arith.addf %866, %869 : vector<1x256xf32>
    %c120_115 = arith.constant 120 : index
    %871 = memref.load %arg3[%c120_115] : memref<144xf32, #tpu.memory_space<smem>>
    %872 = vector.broadcast %871 : f32 to vector<1x256xf32>
    %873 = arith.mulf %872, %547 : vector<1x256xf32>
    %874 = arith.addf %870, %873 : vector<1x256xf32>
    %c129_116 = arith.constant 129 : index
    %875 = memref.load %arg3[%c129_116] : memref<144xf32, #tpu.memory_space<smem>>
    %876 = vector.broadcast %875 : f32 to vector<1x256xf32>
    %877 = arith.mulf %876, %582 : vector<1x256xf32>
    %878 = arith.addf %874, %877 : vector<1x256xf32>
    %c138_117 = arith.constant 138 : index
    %879 = memref.load %arg3[%c138_117] : memref<144xf32, #tpu.memory_space<smem>>
    %880 = vector.broadcast %879 : f32 to vector<1x256xf32>
    %881 = arith.mulf %880, %617 : vector<1x256xf32>
    %882 = arith.addf %878, %881 : vector<1x256xf32>
    %c0_118 = arith.constant 0 : index
    %c128_119 = arith.constant 128 : index
    %883 = vector.load %arg8[%c0_118, %c128_119] : memref<1x512xf32, #tpu.memory_space<vmem>>, vector<1x256xf32>
    tpu.vector_store %arg8[%c0_118, %c128_119], %882 {strides = array<i32>} : memref<1x512xf32, #tpu.memory_space<vmem>>, vector<1x256xf32>,
    %c0_120 = arith.constant 0 : index
    %c127_121 = arith.constant 127 : index
    %884 = vector.load %arg8[%c0_120, %c127_121] : memref<1x512xf32, #tpu.memory_space<vmem>>, vector<1x256xf32>
    %cst_122 = arith.constant 0.000000e+00 : f32
    %885 = vector.broadcast %cst_122 : f32 to vector<1x256xf32>
    %886 = arith.select %33, %884, %885 : vector<1x256xi1>, vector<1x256xf32>
    %887 = arith.addf %819, %886 : vector<1x256xf32>
    %c4_123 = arith.constant 4 : index
    %888 = memref.load %arg3[%c4_123] : memref<144xf32, #tpu.memory_space<smem>>
    %889 = vector.broadcast %888 : f32 to vector<1x256xf32>
    %890 = arith.mulf %889, %92 : vector<1x256xf32>
    %c13_124 = arith.constant 13 : index
    %891 = memref.load %arg3[%c13_124] : memref<144xf32, #tpu.memory_space<smem>>
    %892 = vector.broadcast %891 : f32 to vector<1x256xf32>
    %893 = arith.mulf %892, %127 : vector<1x256xf32>
    %894 = arith.addf %890, %893 : vector<1x256xf32>
    %c22_125 = arith.constant 22 : index
    %895 = memref.load %arg3[%c22_125] : memref<144xf32, #tpu.memory_space<smem>>
    %896 = vector.broadcast %895 : f32 to vector<1x256xf32>
    %897 = arith.mulf %896, %162 : vector<1x256xf32>
    %898 = arith.addf %894, %897 : vector<1x256xf32>
    %c31_126 = arith.constant 31 : index
    %899 = memref.load %arg3[%c31_126] : memref<144xf32, #tpu.memory_space<smem>>
    %900 = vector.broadcast %899 : f32 to vector<1x256xf32>
    %901 = arith.mulf %900, %197 : vector<1x256xf32>
    %902 = arith.addf %898, %901 : vector<1x256xf32>
    %c40_127 = arith.constant 40 : index
    %903 = memref.load %arg3[%c40_127] : memref<144xf32, #tpu.memory_space<smem>>
    %904 = vector.broadcast %903 : f32 to vector<1x256xf32>
    %905 = arith.mulf %904, %232 : vector<1x256xf32>
    %906 = arith.addf %902, %905 : vector<1x256xf32>
    %c49_128 = arith.constant 49 : index
    %907 = memref.load %arg3[%c49_128] : memref<144xf32, #tpu.memory_space<smem>>
    %908 = vector.broadcast %907 : f32 to vector<1x256xf32>
    %909 = arith.mulf %908, %267 : vector<1x256xf32>
    %910 = arith.addf %906, %909 : vector<1x256xf32>
    %c58_129 = arith.constant 58 : index
    %911 = memref.load %arg3[%c58_129] : memref<144xf32, #tpu.memory_space<smem>>
    %912 = vector.broadcast %911 : f32 to vector<1x256xf32>
    %913 = arith.mulf %912, %302 : vector<1x256xf32>
    %914 = arith.addf %910, %913 : vector<1x256xf32>
    %c67_130 = arith.constant 67 : index
    %915 = memref.load %arg3[%c67_130] : memref<144xf32, #tpu.memory_space<smem>>
    %916 = vector.broadcast %915 : f32 to vector<1x256xf32>
    %917 = arith.mulf %916, %337 : vector<1x256xf32>
    %918 = arith.addf %914, %917 : vector<1x256xf32>
    %c76_131 = arith.constant 76 : index
    %919 = memref.load %arg3[%c76_131] : memref<144xf32, #tpu.memory_space<smem>>
    %920 = vector.broadcast %919 : f32 to vector<1x256xf32>
    %921 = arith.mulf %920, %372 : vector<1x256xf32>
    %922 = arith.addf %918, %921 : vector<1x256xf32>
    %c85_132 = arith.constant 85 : index
    %923 = memref.load %arg3[%c85_132] : memref<144xf32, #tpu.memory_space<smem>>
    %924 = vector.broadcast %923 : f32 to vector<1x256xf32>
    %925 = arith.mulf %924, %407 : vector<1x256xf32>
    %926 = arith.addf %922, %925 : vector<1x256xf32>
    %c94_133 = arith.constant 94 : index
    %927 = memref.load %arg3[%c94_133] : memref<144xf32, #tpu.memory_space<smem>>
    %928 = vector.broadcast %927 : f32 to vector<1x256xf32>
    %929 = arith.mulf %928, %442 : vector<1x256xf32>
    %930 = arith.addf %926, %929 : vector<1x256xf32>
    %c103_134 = arith.constant 103 : index
    %931 = memref.load %arg3[%c103_134] : memref<144xf32, #tpu.memory_space<smem>>
    %932 = vector.broadcast %931 : f32 to vector<1x256xf32>
    %933 = arith.mulf %932, %477 : vector<1x256xf32>
    %934 = arith.addf %930, %933 : vector<1x256xf32>
    %c112_135 = arith.constant 112 : index
    %935 = memref.load %arg3[%c112_135] : memref<144xf32, #tpu.memory_space<smem>>
    %936 = vector.broadcast %935 : f32 to vector<1x256xf32>
    %937 = arith.mulf %936, %512 : vector<1x256xf32>
    %938 = arith.addf %934, %937 : vector<1x256xf32>
    %c121_136 = arith.constant 121 : index
    %939 = memref.load %arg3[%c121_136] : memref<144xf32, #tpu.memory_space<smem>>
    %940 = vector.broadcast %939 : f32 to vector<1x256xf32>
    %941 = arith.mulf %940, %547 : vector<1x256xf32>
    %942 = arith.addf %938, %941 : vector<1x256xf32>
    %c130_137 = arith.constant 130 : index
    %943 = memref.load %arg3[%c130_137] : memref<144xf32, #tpu.memory_space<smem>>
    %944 = vector.broadcast %943 : f32 to vector<1x256xf32>
    %945 = arith.mulf %944, %582 : vector<1x256xf32>
    %946 = arith.addf %942, %945 : vector<1x256xf32>
    %c139_138 = arith.constant 139 : index
    %947 = memref.load %arg3[%c139_138] : memref<144xf32, #tpu.memory_space<smem>>
    %948 = vector.broadcast %947 : f32 to vector<1x256xf32>
    %949 = arith.mulf %948, %617 : vector<1x256xf32>
    %950 = arith.addf %946, %949 : vector<1x256xf32>
    %c0_139 = arith.constant 0 : index
    %c128_140 = arith.constant 128 : index
    %951 = vector.load %arg8[%c0_139, %c128_140] : memref<1x512xf32, #tpu.memory_space<vmem>>, vector<1x256xf32>
    tpu.vector_store %arg8[%c0_139, %c128_140], %950 {strides = array<i32>} : memref<1x512xf32, #tpu.memory_space<vmem>>, vector<1x256xf32>,
    %c0_141 = arith.constant 0 : index
    %c128_142 = arith.constant 128 : index
    %952 = vector.load %arg8[%c0_141, %c128_142] : memref<1x512xf32, #tpu.memory_space<vmem>>, vector<1x256xf32>
    %953 = arith.addf %887, %952 : vector<1x256xf32>
    %c5_143 = arith.constant 5 : index
    %954 = memref.load %arg3[%c5_143] : memref<144xf32, #tpu.memory_space<smem>>
    %955 = vector.broadcast %954 : f32 to vector<1x256xf32>
    %956 = arith.mulf %955, %92 : vector<1x256xf32>
    %c14_144 = arith.constant 14 : index
    %957 = memref.load %arg3[%c14_144] : memref<144xf32, #tpu.memory_space<smem>>
    %958 = vector.broadcast %957 : f32 to vector<1x256xf32>
    %959 = arith.mulf %958, %127 : vector<1x256xf32>
    %960 = arith.addf %956, %959 : vector<1x256xf32>
    %c23_145 = arith.constant 23 : index
    %961 = memref.load %arg3[%c23_145] : memref<144xf32, #tpu.memory_space<smem>>
    %962 = vector.broadcast %961 : f32 to vector<1x256xf32>
    %963 = arith.mulf %962, %162 : vector<1x256xf32>
    %964 = arith.addf %960, %963 : vector<1x256xf32>
    %c32_146 = arith.constant 32 : index
    %965 = memref.load %arg3[%c32_146] : memref<144xf32, #tpu.memory_space<smem>>
    %966 = vector.broadcast %965 : f32 to vector<1x256xf32>
    %967 = arith.mulf %966, %197 : vector<1x256xf32>
    %968 = arith.addf %964, %967 : vector<1x256xf32>
    %c41_147 = arith.constant 41 : index
    %969 = memref.load %arg3[%c41_147] : memref<144xf32, #tpu.memory_space<smem>>
    %970 = vector.broadcast %969 : f32 to vector<1x256xf32>
    %971 = arith.mulf %970, %232 : vector<1x256xf32>
    %972 = arith.addf %968, %971 : vector<1x256xf32>
    %c50_148 = arith.constant 50 : index
    %973 = memref.load %arg3[%c50_148] : memref<144xf32, #tpu.memory_space<smem>>
    %974 = vector.broadcast %973 : f32 to vector<1x256xf32>
    %975 = arith.mulf %974, %267 : vector<1x256xf32>
    %976 = arith.addf %972, %975 : vector<1x256xf32>
    %c59_149 = arith.constant 59 : index
    %977 = memref.load %arg3[%c59_149] : memref<144xf32, #tpu.memory_space<smem>>
    %978 = vector.broadcast %977 : f32 to vector<1x256xf32>
    %979 = arith.mulf %978, %302 : vector<1x256xf32>
    %980 = arith.addf %976, %979 : vector<1x256xf32>
    %c68_150 = arith.constant 68 : index
    %981 = memref.load %arg3[%c68_150] : memref<144xf32, #tpu.memory_space<smem>>
    %982 = vector.broadcast %981 : f32 to vector<1x256xf32>
    %983 = arith.mulf %982, %337 : vector<1x256xf32>
    %984 = arith.addf %980, %983 : vector<1x256xf32>
    %c77_151 = arith.constant 77 : index
    %985 = memref.load %arg3[%c77_151] : memref<144xf32, #tpu.memory_space<smem>>
    %986 = vector.broadcast %985 : f32 to vector<1x256xf32>
    %987 = arith.mulf %986, %372 : vector<1x256xf32>
    %988 = arith.addf %984, %987 : vector<1x256xf32>
    %c86_152 = arith.constant 86 : index
    %989 = memref.load %arg3[%c86_152] : memref<144xf32, #tpu.memory_space<smem>>
    %990 = vector.broadcast %989 : f32 to vector<1x256xf32>
    %991 = arith.mulf %990, %407 : vector<1x256xf32>
    %992 = arith.addf %988, %991 : vector<1x256xf32>
    %c95_153 = arith.constant 95 : index
    %993 = memref.load %arg3[%c95_153] : memref<144xf32, #tpu.memory_space<smem>>
    %994 = vector.broadcast %993 : f32 to vector<1x256xf32>
    %995 = arith.mulf %994, %442 : vector<1x256xf32>
    %996 = arith.addf %992, %995 : vector<1x256xf32>
    %c104_154 = arith.constant 104 : index
    %997 = memref.load %arg3[%c104_154] : memref<144xf32, #tpu.memory_space<smem>>
    %998 = vector.broadcast %997 : f32 to vector<1x256xf32>
    %999 = arith.mulf %998, %477 : vector<1x256xf32>
    %1000 = arith.addf %996, %999 : vector<1x256xf32>
    %c113_155 = arith.constant 113 : index
    %1001 = memref.load %arg3[%c113_155] : memref<144xf32, #tpu.memory_space<smem>>
    %1002 = vector.broadcast %1001 : f32 to vector<1x256xf32>
    %1003 = arith.mulf %1002, %512 : vector<1x256xf32>
    %1004 = arith.addf %1000, %1003 : vector<1x256xf32>
    %c122_156 = arith.constant 122 : index
    %1005 = memref.load %arg3[%c122_156] : memref<144xf32, #tpu.memory_space<smem>>
    %1006 = vector.broadcast %1005 : f32 to vector<1x256xf32>
    %1007 = arith.mulf %1006, %547 : vector<1x256xf32>
    %1008 = arith.addf %1004, %1007 : vector<1x256xf32>
    %c131_157 = arith.constant 131 : index
    %1009 = memref.load %arg3[%c131_157] : memref<144xf32, #tpu.memory_space<smem>>
    %1010 = vector.broadcast %1009 : f32 to vector<1x256xf32>
    %1011 = arith.mulf %1010, %582 : vector<1x256xf32>
    %1012 = arith.addf %1008, %1011 : vector<1x256xf32>
    %c140_158 = arith.constant 140 : index
    %1013 = memref.load %arg3[%c140_158] : memref<144xf32, #tpu.memory_space<smem>>
    %1014 = vector.broadcast %1013 : f32 to vector<1x256xf32>
    %1015 = arith.mulf %1014, %617 : vector<1x256xf32>
    %1016 = arith.addf %1012, %1015 : vector<1x256xf32>
    %c0_159 = arith.constant 0 : index
    %c128_160 = arith.constant 128 : index
    %1017 = vector.load %arg8[%c0_159, %c128_160] : memref<1x512xf32, #tpu.memory_space<vmem>>, vector<1x256xf32>
    tpu.vector_store %arg8[%c0_159, %c128_160], %1016 {strides = array<i32>} : memref<1x512xf32, #tpu.memory_space<vmem>>, vector<1x256xf32>,
    %c0_161 = arith.constant 0 : index
    %c129_162 = arith.constant 129 : index
    %1018 = vector.load %arg8[%c0_161, %c129_162] : memref<1x512xf32, #tpu.memory_space<vmem>>, vector<1x256xf32>
    %cst_163 = arith.constant 0.000000e+00 : f32
    %1019 = vector.broadcast %cst_163 : f32 to vector<1x256xf32>
    %1020 = arith.select %35, %1018, %1019 : vector<1x256xi1>, vector<1x256xf32>
    %1021 = arith.addf %953, %1020 : vector<1x256xf32>
    %c6_164 = arith.constant 6 : index
    %1022 = memref.load %arg3[%c6_164] : memref<144xf32, #tpu.memory_space<smem>>
    %1023 = vector.broadcast %1022 : f32 to vector<1x256xf32>
    %1024 = arith.mulf %1023, %92 : vector<1x256xf32>
    %c15_165 = arith.constant 15 : index
    %1025 = memref.load %arg3[%c15_165] : memref<144xf32, #tpu.memory_space<smem>>
    %1026 = vector.broadcast %1025 : f32 to vector<1x256xf32>
    %1027 = arith.mulf %1026, %127 : vector<1x256xf32>
    %1028 = arith.addf %1024, %1027 : vector<1x256xf32>
    %c24_166 = arith.constant 24 : index
    %1029 = memref.load %arg3[%c24_166] : memref<144xf32, #tpu.memory_space<smem>>
    %1030 = vector.broadcast %1029 : f32 to vector<1x256xf32>
    %1031 = arith.mulf %1030, %162 : vector<1x256xf32>
    %1032 = arith.addf %1028, %1031 : vector<1x256xf32>
    %c33_167 = arith.constant 33 : index
    %1033 = memref.load %arg3[%c33_167] : memref<144xf32, #tpu.memory_space<smem>>
    %1034 = vector.broadcast %1033 : f32 to vector<1x256xf32>
    %1035 = arith.mulf %1034, %197 : vector<1x256xf32>
    %1036 = arith.addf %1032, %1035 : vector<1x256xf32>
    %c42_168 = arith.constant 42 : index
    %1037 = memref.load %arg3[%c42_168] : memref<144xf32, #tpu.memory_space<smem>>
    %1038 = vector.broadcast %1037 : f32 to vector<1x256xf32>
    %1039 = arith.mulf %1038, %232 : vector<1x256xf32>
    %1040 = arith.addf %1036, %1039 : vector<1x256xf32>
    %c51_169 = arith.constant 51 : index
    %1041 = memref.load %arg3[%c51_169] : memref<144xf32, #tpu.memory_space<smem>>
    %1042 = vector.broadcast %1041 : f32 to vector<1x256xf32>
    %1043 = arith.mulf %1042, %267 : vector<1x256xf32>
    %1044 = arith.addf %1040, %1043 : vector<1x256xf32>
    %c60_170 = arith.constant 60 : index
    %1045 = memref.load %arg3[%c60_170] : memref<144xf32, #tpu.memory_space<smem>>
    %1046 = vector.broadcast %1045 : f32 to vector<1x256xf32>
    %1047 = arith.mulf %1046, %302 : vector<1x256xf32>
    %1048 = arith.addf %1044, %1047 : vector<1x256xf32>
    %c69_171 = arith.constant 69 : index
    %1049 = memref.load %arg3[%c69_171] : memref<144xf32, #tpu.memory_space<smem>>
    %1050 = vector.broadcast %1049 : f32 to vector<1x256xf32>
    %1051 = arith.mulf %1050, %337 : vector<1x256xf32>
    %1052 = arith.addf %1048, %1051 : vector<1x256xf32>
    %c78_172 = arith.constant 78 : index
    %1053 = memref.load %arg3[%c78_172] : memref<144xf32, #tpu.memory_space<smem>>
    %1054 = vector.broadcast %1053 : f32 to vector<1x256xf32>
    %1055 = arith.mulf %1054, %372 : vector<1x256xf32>
    %1056 = arith.addf %1052, %1055 : vector<1x256xf32>
    %c87_173 = arith.constant 87 : index
    %1057 = memref.load %arg3[%c87_173] : memref<144xf32, #tpu.memory_space<smem>>
    %1058 = vector.broadcast %1057 : f32 to vector<1x256xf32>
    %1059 = arith.mulf %1058, %407 : vector<1x256xf32>
    %1060 = arith.addf %1056, %1059 : vector<1x256xf32>
    %c96_174 = arith.constant 96 : index
    %1061 = memref.load %arg3[%c96_174] : memref<144xf32, #tpu.memory_space<smem>>
    %1062 = vector.broadcast %1061 : f32 to vector<1x256xf32>
    %1063 = arith.mulf %1062, %442 : vector<1x256xf32>
    %1064 = arith.addf %1060, %1063 : vector<1x256xf32>
    %c105_175 = arith.constant 105 : index
    %1065 = memref.load %arg3[%c105_175] : memref<144xf32, #tpu.memory_space<smem>>
    %1066 = vector.broadcast %1065 : f32 to vector<1x256xf32>
    %1067 = arith.mulf %1066, %477 : vector<1x256xf32>
    %1068 = arith.addf %1064, %1067 : vector<1x256xf32>
    %c114_176 = arith.constant 114 : index
    %1069 = memref.load %arg3[%c114_176] : memref<144xf32, #tpu.memory_space<smem>>
    %1070 = vector.broadcast %1069 : f32 to vector<1x256xf32>
    %1071 = arith.mulf %1070, %512 : vector<1x256xf32>
    %1072 = arith.addf %1068, %1071 : vector<1x256xf32>
    %c123_177 = arith.constant 123 : index
    %1073 = memref.load %arg3[%c123_177] : memref<144xf32, #tpu.memory_space<smem>>
    %1074 = vector.broadcast %1073 : f32 to vector<1x256xf32>
    %1075 = arith.mulf %1074, %547 : vector<1x256xf32>
    %1076 = arith.addf %1072, %1075 : vector<1x256xf32>
    %c132_178 = arith.constant 132 : index
    %1077 = memref.load %arg3[%c132_178] : memref<144xf32, #tpu.memory_space<smem>>
    %1078 = vector.broadcast %1077 : f32 to vector<1x256xf32>
    %1079 = arith.mulf %1078, %582 : vector<1x256xf32>
    %1080 = arith.addf %1076, %1079 : vector<1x256xf32>
    %c141_179 = arith.constant 141 : index
    %1081 = memref.load %arg3[%c141_179] : memref<144xf32, #tpu.memory_space<smem>>
    %1082 = vector.broadcast %1081 : f32 to vector<1x256xf32>
    %1083 = arith.mulf %1082, %617 : vector<1x256xf32>
    %1084 = arith.addf %1080, %1083 : vector<1x256xf32>
    %c0_180 = arith.constant 0 : index
    %c128_181 = arith.constant 128 : index
    %1085 = vector.load %arg8[%c0_180, %c128_181] : memref<1x512xf32, #tpu.memory_space<vmem>>, vector<1x256xf32>
    tpu.vector_store %arg8[%c0_180, %c128_181], %1084 {strides = array<i32>} : memref<1x512xf32, #tpu.memory_space<vmem>>, vector<1x256xf32>,
    %c0_182 = arith.constant 0 : index
    %c143_183 = arith.constant 143 : index
    %1086 = vector.load %arg8[%c0_182, %c143_183] : memref<1x512xf32, #tpu.memory_space<vmem>>, vector<1x256xf32>
    %cst_184 = arith.constant 0.000000e+00 : f32
    %1087 = vector.broadcast %cst_184 : f32 to vector<1x256xf32>
    %1088 = arith.select %33, %1086, %1087 : vector<1x256xi1>, vector<1x256xf32>
    %1089 = arith.addf %1021, %1088 : vector<1x256xf32>
    %c7_185 = arith.constant 7 : index
    %1090 = memref.load %arg3[%c7_185] : memref<144xf32, #tpu.memory_space<smem>>
    %1091 = vector.broadcast %1090 : f32 to vector<1x256xf32>
    %1092 = arith.mulf %1091, %92 : vector<1x256xf32>
    %c16_186 = arith.constant 16 : index
    %1093 = memref.load %arg3[%c16_186] : memref<144xf32, #tpu.memory_space<smem>>
    %1094 = vector.broadcast %1093 : f32 to vector<1x256xf32>
    %1095 = arith.mulf %1094, %127 : vector<1x256xf32>
    %1096 = arith.addf %1092, %1095 : vector<1x256xf32>
    %c25_187 = arith.constant 25 : index
    %1097 = memref.load %arg3[%c25_187] : memref<144xf32, #tpu.memory_space<smem>>
    %1098 = vector.broadcast %1097 : f32 to vector<1x256xf32>
    %1099 = arith.mulf %1098, %162 : vector<1x256xf32>
    %1100 = arith.addf %1096, %1099 : vector<1x256xf32>
    %c34_188 = arith.constant 34 : index
    %1101 = memref.load %arg3[%c34_188] : memref<144xf32, #tpu.memory_space<smem>>
    %1102 = vector.broadcast %1101 : f32 to vector<1x256xf32>
    %1103 = arith.mulf %1102, %197 : vector<1x256xf32>
    %1104 = arith.addf %1100, %1103 : vector<1x256xf32>
    %c43_189 = arith.constant 43 : index
    %1105 = memref.load %arg3[%c43_189] : memref<144xf32, #tpu.memory_space<smem>>
    %1106 = vector.broadcast %1105 : f32 to vector<1x256xf32>
    %1107 = arith.mulf %1106, %232 : vector<1x256xf32>
    %1108 = arith.addf %1104, %1107 : vector<1x256xf32>
    %c52_190 = arith.constant 52 : index
    %1109 = memref.load %arg3[%c52_190] : memref<144xf32, #tpu.memory_space<smem>>
    %1110 = vector.broadcast %1109 : f32 to vector<1x256xf32>
    %1111 = arith.mulf %1110, %267 : vector<1x256xf32>
    %1112 = arith.addf %1108, %1111 : vector<1x256xf32>
    %c61_191 = arith.constant 61 : index
    %1113 = memref.load %arg3[%c61_191] : memref<144xf32, #tpu.memory_space<smem>>
    %1114 = vector.broadcast %1113 : f32 to vector<1x256xf32>
    %1115 = arith.mulf %1114, %302 : vector<1x256xf32>
    %1116 = arith.addf %1112, %1115 : vector<1x256xf32>
    %c70_192 = arith.constant 70 : index
    %1117 = memref.load %arg3[%c70_192] : memref<144xf32, #tpu.memory_space<smem>>
    %1118 = vector.broadcast %1117 : f32 to vector<1x256xf32>
    %1119 = arith.mulf %1118, %337 : vector<1x256xf32>
    %1120 = arith.addf %1116, %1119 : vector<1x256xf32>
    %c79_193 = arith.constant 79 : index
    %1121 = memref.load %arg3[%c79_193] : memref<144xf32, #tpu.memory_space<smem>>
    %1122 = vector.broadcast %1121 : f32 to vector<1x256xf32>
    %1123 = arith.mulf %1122, %372 : vector<1x256xf32>
    %1124 = arith.addf %1120, %1123 : vector<1x256xf32>
    %c88_194 = arith.constant 88 : index
    %1125 = memref.load %arg3[%c88_194] : memref<144xf32, #tpu.memory_space<smem>>
    %1126 = vector.broadcast %1125 : f32 to vector<1x256xf32>
    %1127 = arith.mulf %1126, %407 : vector<1x256xf32>
    %1128 = arith.addf %1124, %1127 : vector<1x256xf32>
    %c97_195 = arith.constant 97 : index
    %1129 = memref.load %arg3[%c97_195] : memref<144xf32, #tpu.memory_space<smem>>
    %1130 = vector.broadcast %1129 : f32 to vector<1x256xf32>
    %1131 = arith.mulf %1130, %442 : vector<1x256xf32>
    %1132 = arith.addf %1128, %1131 : vector<1x256xf32>
    %c106_196 = arith.constant 106 : index
    %1133 = memref.load %arg3[%c106_196] : memref<144xf32, #tpu.memory_space<smem>>
    %1134 = vector.broadcast %1133 : f32 to vector<1x256xf32>
    %1135 = arith.mulf %1134, %477 : vector<1x256xf32>
    %1136 = arith.addf %1132, %1135 : vector<1x256xf32>
    %c115_197 = arith.constant 115 : index
    %1137 = memref.load %arg3[%c115_197] : memref<144xf32, #tpu.memory_space<smem>>
    %1138 = vector.broadcast %1137 : f32 to vector<1x256xf32>
    %1139 = arith.mulf %1138, %512 : vector<1x256xf32>
    %1140 = arith.addf %1136, %1139 : vector<1x256xf32>
    %c124_198 = arith.constant 124 : index
    %1141 = memref.load %arg3[%c124_198] : memref<144xf32, #tpu.memory_space<smem>>
    %1142 = vector.broadcast %1141 : f32 to vector<1x256xf32>
    %1143 = arith.mulf %1142, %547 : vector<1x256xf32>
    %1144 = arith.addf %1140, %1143 : vector<1x256xf32>
    %c133_199 = arith.constant 133 : index
    %1145 = memref.load %arg3[%c133_199] : memref<144xf32, #tpu.memory_space<smem>>
    %1146 = vector.broadcast %1145 : f32 to vector<1x256xf32>
    %1147 = arith.mulf %1146, %582 : vector<1x256xf32>
    %1148 = arith.addf %1144, %1147 : vector<1x256xf32>
    %c142_200 = arith.constant 142 : index
    %1149 = memref.load %arg3[%c142_200] : memref<144xf32, #tpu.memory_space<smem>>
    %1150 = vector.broadcast %1149 : f32 to vector<1x256xf32>
    %1151 = arith.mulf %1150, %617 : vector<1x256xf32>
    %1152 = arith.addf %1148, %1151 : vector<1x256xf32>
    %c0_201 = arith.constant 0 : index
    %c128_202 = arith.constant 128 : index
    %1153 = vector.load %arg8[%c0_201, %c128_202] : memref<1x512xf32, #tpu.memory_space<vmem>>, vector<1x256xf32>
    tpu.vector_store %arg8[%c0_201, %c128_202], %1152 {strides = array<i32>} : memref<1x512xf32, #tpu.memory_space<vmem>>, vector<1x256xf32>,
    %c0_203 = arith.constant 0 : index
    %c144_204 = arith.constant 144 : index
    %1154 = vector.load %arg8[%c0_203, %c144_204] : memref<1x512xf32, #tpu.memory_space<vmem>>, vector<1x256xf32>
    %1155 = arith.addf %1089, %1154 : vector<1x256xf32>
    %c8_205 = arith.constant 8 : index
    %1156 = memref.load %arg3[%c8_205] : memref<144xf32, #tpu.memory_space<smem>>
    %1157 = vector.broadcast %1156 : f32 to vector<1x256xf32>
    %1158 = arith.mulf %1157, %92 : vector<1x256xf32>
    %c17_206 = arith.constant 17 : index
    %1159 = memref.load %arg3[%c17_206] : memref<144xf32, #tpu.memory_space<smem>>
    %1160 = vector.broadcast %1159 : f32 to vector<1x256xf32>
    %1161 = arith.mulf %1160, %127 : vector<1x256xf32>
    %1162 = arith.addf %1158, %1161 : vector<1x256xf32>
    %c26_207 = arith.constant 26 : index
    %1163 = memref.load %arg3[%c26_207] : memref<144xf32, #tpu.memory_space<smem>>
    %1164 = vector.broadcast %1163 : f32 to vector<1x256xf32>
    %1165 = arith.mulf %1164, %162 : vector<1x256xf32>
    %1166 = arith.addf %1162, %1165 : vector<1x256xf32>
    %c35_208 = arith.constant 35 : index
    %1167 = memref.load %arg3[%c35_208] : memref<144xf32, #tpu.memory_space<smem>>
    %1168 = vector.broadcast %1167 : f32 to vector<1x256xf32>
    %1169 = arith.mulf %1168, %197 : vector<1x256xf32>
    %1170 = arith.addf %1166, %1169 : vector<1x256xf32>
    %c44_209 = arith.constant 44 : index
    %1171 = memref.load %arg3[%c44_209] : memref<144xf32, #tpu.memory_space<smem>>
    %1172 = vector.broadcast %1171 : f32 to vector<1x256xf32>
    %1173 = arith.mulf %1172, %232 : vector<1x256xf32>
    %1174 = arith.addf %1170, %1173 : vector<1x256xf32>
    %c53_210 = arith.constant 53 : index
    %1175 = memref.load %arg3[%c53_210] : memref<144xf32, #tpu.memory_space<smem>>
    %1176 = vector.broadcast %1175 : f32 to vector<1x256xf32>
    %1177 = arith.mulf %1176, %267 : vector<1x256xf32>
    %1178 = arith.addf %1174, %1177 : vector<1x256xf32>
    %c62_211 = arith.constant 62 : index
    %1179 = memref.load %arg3[%c62_211] : memref<144xf32, #tpu.memory_space<smem>>
    %1180 = vector.broadcast %1179 : f32 to vector<1x256xf32>
    %1181 = arith.mulf %1180, %302 : vector<1x256xf32>
    %1182 = arith.addf %1178, %1181 : vector<1x256xf32>
    %c71_212 = arith.constant 71 : index
    %1183 = memref.load %arg3[%c71_212] : memref<144xf32, #tpu.memory_space<smem>>
    %1184 = vector.broadcast %1183 : f32 to vector<1x256xf32>
    %1185 = arith.mulf %1184, %337 : vector<1x256xf32>
    %1186 = arith.addf %1182, %1185 : vector<1x256xf32>
    %c80_213 = arith.constant 80 : index
    %1187 = memref.load %arg3[%c80_213] : memref<144xf32, #tpu.memory_space<smem>>
    %1188 = vector.broadcast %1187 : f32 to vector<1x256xf32>
    %1189 = arith.mulf %1188, %372 : vector<1x256xf32>
    %1190 = arith.addf %1186, %1189 : vector<1x256xf32>
    %c89_214 = arith.constant 89 : index
    %1191 = memref.load %arg3[%c89_214] : memref<144xf32, #tpu.memory_space<smem>>
    %1192 = vector.broadcast %1191 : f32 to vector<1x256xf32>
    %1193 = arith.mulf %1192, %407 : vector<1x256xf32>
    %1194 = arith.addf %1190, %1193 : vector<1x256xf32>
    %c98_215 = arith.constant 98 : index
    %1195 = memref.load %arg3[%c98_215] : memref<144xf32, #tpu.memory_space<smem>>
    %1196 = vector.broadcast %1195 : f32 to vector<1x256xf32>
    %1197 = arith.mulf %1196, %442 : vector<1x256xf32>
    %1198 = arith.addf %1194, %1197 : vector<1x256xf32>
    %c107_216 = arith.constant 107 : index
    %1199 = memref.load %arg3[%c107_216] : memref<144xf32, #tpu.memory_space<smem>>
    %1200 = vector.broadcast %1199 : f32 to vector<1x256xf32>
    %1201 = arith.mulf %1200, %477 : vector<1x256xf32>
    %1202 = arith.addf %1198, %1201 : vector<1x256xf32>
    %c116_217 = arith.constant 116 : index
    %1203 = memref.load %arg3[%c116_217] : memref<144xf32, #tpu.memory_space<smem>>
    %1204 = vector.broadcast %1203 : f32 to vector<1x256xf32>
    %1205 = arith.mulf %1204, %512 : vector<1x256xf32>
    %1206 = arith.addf %1202, %1205 : vector<1x256xf32>
    %c125_218 = arith.constant 125 : index
    %1207 = memref.load %arg3[%c125_218] : memref<144xf32, #tpu.memory_space<smem>>
    %1208 = vector.broadcast %1207 : f32 to vector<1x256xf32>
    %1209 = arith.mulf %1208, %547 : vector<1x256xf32>
    %1210 = arith.addf %1206, %1209 : vector<1x256xf32>
    %c134_219 = arith.constant 134 : index
    %1211 = memref.load %arg3[%c134_219] : memref<144xf32, #tpu.memory_space<smem>>
    %1212 = vector.broadcast %1211 : f32 to vector<1x256xf32>
    %1213 = arith.mulf %1212, %582 : vector<1x256xf32>
    %1214 = arith.addf %1210, %1213 : vector<1x256xf32>
    %c143_220 = arith.constant 143 : index
    %1215 = memref.load %arg3[%c143_220] : memref<144xf32, #tpu.memory_space<smem>>
    %1216 = vector.broadcast %1215 : f32 to vector<1x256xf32>
    %1217 = arith.mulf %1216, %617 : vector<1x256xf32>
    %1218 = arith.addf %1214, %1217 : vector<1x256xf32>
    %c0_221 = arith.constant 0 : index
    %c128_222 = arith.constant 128 : index
    %1219 = vector.load %arg8[%c0_221, %c128_222] : memref<1x512xf32, #tpu.memory_space<vmem>>, vector<1x256xf32>
    tpu.vector_store %arg8[%c0_221, %c128_222], %1218 {strides = array<i32>} : memref<1x512xf32, #tpu.memory_space<vmem>>, vector<1x256xf32>,
    %c0_223 = arith.constant 0 : index
    %c145_224 = arith.constant 145 : index
    %1220 = vector.load %arg8[%c0_223, %c145_224] : memref<1x512xf32, #tpu.memory_space<vmem>>, vector<1x256xf32>
    %cst_225 = arith.constant 0.000000e+00 : f32
    %1221 = vector.broadcast %cst_225 : f32 to vector<1x256xf32>
    %1222 = arith.select %35, %1220, %1221 : vector<1x256xi1>, vector<1x256xf32>
    %1223 = arith.addf %1155, %1222 : vector<1x256xf32>
    %c0_226 = arith.constant 0 : index
    %c0_227 = arith.constant 0 : index
    %c0_228 = arith.constant 0 : index
    %1224 = vector.load %arg7[%c0_226, %c0_227, %c0_228] : memref<1x1x256xf32, #tpu.memory_space<vmem>>, vector<1x1x256xf32>
    %1225 = vector.shape_cast %1224 : vector<1x1x256xf32> to vector<1x256xf32>
    %1226 = vector.shape_cast %1223 : vector<1x256xf32> to vector<1x1x256xf32>
    tpu.vector_store %arg7[%c0_226, %c0_227, %c0_228], %1226 {strides = array<i32>} : memref<1x1x256xf32, #tpu.memory_space<vmem>>, vector<1x1x256xf32>,
    return
  }
  func.func @transform_0(%arg0: i32) -> i32 {
    %c0_i32 = arith.constant 0 : i32
    %c0_i32_0 = arith.constant 0 : i32
    return %c0_i32 : i32
  }
  func.func @transform_1(%arg0: i32) -> i32 {
    %c0_i32 = arith.constant 0 : i32
    %c0_i32_0 = arith.constant 0 : i32
    return %c0_i32 : i32
  }
  func.func @transform_2(%arg0: i32) -> i32 {
    %c0_i32 = arith.constant 0 : i32
    %c0_i32_0 = arith.constant 0 : i32
    return %c0_i32 : i32
  }
  func.func @transform_3(%arg0: i32) -> (i32, i32, i32) {
    %c0_i32 = arith.constant 0 : i32
    %c0_i32_0 = arith.constant 0 : i32
    %c0_i32_1 = arith.constant 0 : i32
    return %arg0, %c0_i32, %c0_i32_0 : i32, i32, i32
  }
  func.func @transform_4(%arg0: i32) -> (i32, i32, i32) {
    %c0_i32 = arith.constant 0 : i32
    %c0_i32_0 = arith.constant 0 : i32
    %c0_i32_1 = arith.constant 0 : i32
    return %arg0, %c0_i32, %c0_i32_0 : i32, i32, i32
  }
  func.func @transform_5(%arg0: i32) -> (i32, i32, i32) {
    %c0_i32 = arith.constant 0 : i32
    %c0_i32_0 = arith.constant 0 : i32
    %c0_i32_1 = arith.constant 0 : i32
    return %arg0, %c0_i32, %c0_i32_0 : i32, i32, i32
  }
  func.func @transform_6(%arg0: i32) -> (i32, i32, i32) {
    %c0_i32 = arith.constant 0 : i32
    %c0_i32_0 = arith.constant 0 : i32
    %c0_i32_1 = arith.constant 0 : i32
    return %arg0, %c0_i32, %c0_i32_0 : i32, i32, i32
  }
}

</mosaic_0001>

<bundles_post_ra>
// kernel: basic_block_forward.1
= control target key start
LH: loop header
LB: loop body
LE: loop exit
PB: predicated region body
PF: predicated region fallthrough
CT: control target
= control target key end

     0   :  { %s8015_s0 = inlined_call_operand.<no memory space> [shape: f32[1], index: 0, kind: input, shape index: {}]   ;;  %s8016_s1 = inlined_call_operand.vmem [shape: f32[144], index: 1, kind: input, shape index: {}]   ;;  %s8017_s2 = inlined_call_operand.vmem [shape: f32[144], index: 2, kind: input, shape index: {}]   ;;  %s8018_s3 = inlined_call_operand.vmem [shape: f32[2,1,256], index: 3, kind: input, shape index: {}]   ;;  %s8019_s4 = inlined_call_operand.vmem [shape: f32[2,1,256], index: 4, kind: input, shape index: {}]   ;;  %s8020_s5 = inlined_call_operand.vmem [shape: f32[2,1,256], index: 5, kind: input, shape index: {}]   ;;  %s8021_s6 = inlined_call_operand.vmem [shape: f32[2,1,256], index: 6, kind: output, shape index: {}]  }
   0x1   :  { %8292 = sst [smem:[#allocation183_spill]] %s8016_s1 }
   0x2   :  { %8293 = sst [smem:[#allocation184_spill]] %s8017_s2 }
   0x3   :  { %8294 = sst [smem:[#allocation185_spill]] %s8018_s3 }
   0x4   :  { %8295 = sst [smem:[#allocation186_spill]] %s8019_s4 }
   0x5   :  { %8296 = sst [smem:[#allocation187_spill]] %s8020_s5 }
   0x6   :  { %8297 = sst [smem:[#allocation188_spill]] %s8021_s6 }
   0x7   :  { %11 = sst [smem:[#allocation3]] %s8015_s0 }
   0x8   :  { %12 = vsyncpa [#allocation5], 0 }
   0x9   :  { %13 = vsyncpa [#allocation7], 0  ;;  %s4005_s23 = smov 0  }
   0xa LB: > { %8298 = sst [smem:[#allocation10_spill]] %s3953_s23  ;;  %s4011_s24 = sadd.s32 4294967295, %s3953_s23   ;;  %s3953_s23 = sphi %s4005_s23, %s19_s23  }
   0xb   : > { %p3569_p0 = scmp.ge.s32.totalorder %s3953_s23, 1  ;;  %p191_p1 = scmp.lt.s32.totalorder %s3953_s23, 3 }
   0xc   : > { %s8299_s1 = sld [smem:[#allocation183_spill]]  ;;  %p8022_p3 = scmp.eq.s32.totalorder %s4011_s24, 0 }
   0xd   : > { %p4018_p2 = pnand %p3569_p0, %p191_p1  ;;  %s8301_s2 = sld [smem:[#allocation184_spill]] }
   0xf   : > { %s8300_s27 = scalar_select %p4018_p2, 1, 0 }
  0x10   : > { %p3876_p4 = pneg %p4018_p2 }
  0x12   : > { %s207_s26 = sshll.u32 %s8299_s1, 4  ;;  %p4030_p5 = pnand %p8022_p3, %p3876_p4  ;;  %s208_s26 = int_to_ptr.vmem [resolvable:$true] %s207_s26 }
  0x13   : > { %s218_s30 = sshll.u32 %s8301_s2, 4  ;;  %s3909_s8 = scalar_lea.vmem %s208_s26, 32  ;;  %s219_s30 = int_to_ptr.vmem [resolvable:$true] %s218_s30 }
  0x14   : > { %p3910_p6 = scmp.ne.s32.totalorder %s208_s26, %s3909_s8  ;;  %p3911_p7 = pneg %p4030_p5 }
  0x15   : > { %p3917_p10 = scmp.lt.s32.totalorder %s208_s26, %s208_s26  ;;  %p3918_p11 = scmp.lt.s32.totalorder %s3909_s8, %s3909_s8 }
  0x16   : > { %p3912_p8 = pnand %p3911_p7, %p3910_p6 }
  0x17   : > { %p3919_p12 = por %p3918_p11, %p3917_p10 }
  0x18   : > { %p3913_p9 = pneg %p3912_p8 }
  0x1a   : > { %p3920_p13 = pnand %p3919_p12, %p3913_p9 }
  0x1c   : > { %3923 = shalt.err (!%p3920_p13)
}
  0x1d   : > { %s3955_s9 = smov [#allocation4]   ;;  %s3924_s10 = scalar_lea.vmem %s219_s30, 32 }
  0x1e   : > { %3879 = dma.vmem_to_smem (!%p4030_p5), %s208_s26, 32, %s3955_s9, [#allocation5]  }
  0x1f   : > { %p3925_p0 = scmp.ne.s32.totalorder %s219_s30, %s3924_s10  ;;  %p3932_p3 = scmp.lt.s32.totalorder %s219_s30, %s219_s30 }
  0x20   : > { %p3933_p2 = scmp.lt.s32.totalorder %s3924_s10, %s3924_s10 }
  0x21   : > { %p3927_p1 = pnand %p3925_p0, %p3911_p7 }
  0x22   : > { %p3934_p6 = por %p3933_p2, %p3932_p3 }
  0x23   : > { %p3928_p4 = pneg %p3927_p1 }
  0x25   : > { %p3935_p8 = pnand %p3934_p6, %p3928_p4 }
  0x27   : > { %3938 = shalt.err (!%p3935_p8)
}
  0x28   : > { %s3956_s11 = smov [#allocation6]   ;;  %p8303_p9 = scmp.ne.s32.totalorder %s8300_s27, 0 }
  0x29   : > { %3882 = dma.vmem_to_smem (!%p4030_p5), %s219_s30, 32, %s3956_s11, [#allocation7]  }
  0x2a   : > { %252 = sbr.rel (%p8303_p9) target bundleno = 934 (0x3a6), region = 44 }
  0x2f   : > { %p8304_p10 = scmp.eq.s32.totalorder %s4011_s24, 0 }
  0x31   : > { %3944 = dma.done.wait (%p8304_p10), [#allocation5], 32   ;;  %p8305_p11 = pmov %p8304_p10 }
  0x32   : > { %p8306_p7 = pmov %p8304_p10 }
  0x33   : > { %3946 = vsyncadd (%p8305_p11), [#allocation5], 4294967264 }
  0x34   : > { %3948 = dma.done.wait (%p8306_p7), [#allocation7], 32   ;;  %p8307_p2 = pmov %p8306_p7 }
  0x36   : > { %3950 = vsyncadd (%p8307_p2), [#allocation7], 4294967264 }
  0x37   : > { %262 = sfence }
  0x38   : > { %p293_p3 = scmp.lt.s32.totalorder %s4011_s24, 1  ;;  %s309_s12 = sld [smem:[#allocation3]]  ;;  %v310_v0 = vlaneseq  ;;  %v3957_v1 = vmov 0.0   ;;  %v8312_v9 = vmov 0  ;;  %vm377_vm2 = vcmask 138240  }
  0x39   : > { %s8309_s3 = sld [smem:[#allocation185_spill]]  ;;  %s8024_s17 = smov 17   ;;  %vm390_vm5 = vcmask 121856   ;;  %vm403_vm8 = vcmask 7168   ;;  %vm490_vm9 = vcmask 130048   ;;  %vm431_vm10 = vcmask 1039360  }
  0x3a   : > { %s9206_s24 = smov (!%p293_p3, %s4011_s24), 1  ;;  %vm312_vm0 = vcmp.lt.s32.totalorder %v310_v0, 512  ;;  %s8310_s4 = sld [smem:[#allocation186_spill]]  ;;  %vm4076_vm1 = vcmp.lt.s32.totalorder %v310_v0, 256  ;;  %v4092_v11 = vshrl.u32 %v310_v0, 7  ;;  %v4308_v49 = vand.u32 127, %v310_v0 }
  0x3b   : > { %314 = vst.msk [vmem:[#allocation2] sm:$0xf] %vm312_vm0, %v3957_v1  ;;  %s4053_s13 = sshll.u32 %s9206_s24, 1  ;;  %s8311_s5 = sld [smem:[#allocation187_spill]]  ;;  %v8313_v9 = vsel %vm4076_vm1, 4294967295, %v8312_v9  ;;  %vm444_vm11 = vcmask 924672  }
  0x3c   : > { %8308 = sst [smem:[#allocation11_spill]] %s4053_s13  ;;  %8314 = vst [vmem:[#allocation12_spill] sm:$0xff] %v8313_v9  ;;  %8316 = vst [vmem:[#allocation14_spill] sm:$0xff] %v4092_v11  ;;  %v4103_v12 = vsub.s32 0, %v4092_v11  ;;  %v4106_v13 = vsub.s32 2, %v4092_v11  ;;  %v4113_v14 = vsub.s32 1, %v4092_v11 }
  0x3d   : > { %s4067_s24 = sld [smem:[#allocation4 + $0x1]]  ;;  %s8032_s6 = smov 1   ;;  %v4325_v53 = vadd.s32 128, %v4308_v49  ;;  %v330_v1 = vand.u32 15, %v4308_v49  ;;  %vm457_vm12 = vcmask 908288   ;;  %vm559_vm13 = vcmask 916480  }
  0x3e   : > { %v317_v4 = vstv %s309_s12  ;;  %s4069_s25 = sld [smem:[#allocation4 + $0xa]]  ;;  %8317 = vst [vmem:[#allocation15_spill] sm:$0xff] %v4106_v13 }
  0x3f   : > { %s296_s16 = scalar_lea.vmem %s8309_s3, %s4053_s13  ;;  %s4071_s0 = sld [smem:[#allocation4 + $0x13]]  ;;  %vm4862_vm3 = vcmp.ge.s32.totalorder %v330_v1, 1  ;;  %vm4913_vm6 = vcmp.le.s32.totalorder %v330_v1, 14 }
  0x40   : > { %s300_s19 = scalar_lea.vmem %s8310_s4, %s4053_s13  ;;  %v315_v2 = vld [vmem:[%s296_s16] sm:$0x3]  ;;  %s4073_s26 = sld [smem:[#allocation4 + $0x1c]] }
  0x41   : > { %s304_s22 = scalar_lea.vmem %s8311_s5, %s4053_s13  ;;  %v316_v3 = vld [vmem:[%s300_s19] sm:$0x3]  ;;  %s4080_s27 = sld [smem:[#allocation4 + $0x25]] }
  0x42   : > { %v318_v5 = vmul.f32 %v317_v4, %v316_v3  ;;  %v320_v6 = vld [vmem:[%s304_s22] sm:$0x3]  ;;  %s4084_s28 = sld [smem:[#allocation4 + $0x2e]]  ;;  %s8027_s22 = smov 15  }
  0x43   : > { %v321_v7 = vmul.f32 %v320_v6, %v317_v4  ;;  %s4086_s29 = sld [smem:[#allocation4 + $0x37]]  ;;  %v469_v19 = vstv %s4067_s24 }
  0x44   : > { %v319_v8 = vsub.f32 %v315_v2, %v318_v5  ;;  %s4094_s30 = sld [smem:[#allocation4 + $0x7]]  ;;  %v577_v21 = vstv %s4069_s25  ;;  %v337_v2 = vand.u32 15, %v4325_v53 }
  0x45   : > { %s4096_s7 = sld [smem:[#allocation4 + $0x10]]  ;;  %v683_v27 = vstv %s4071_s0 }
  0x46   : > { %v4082_v10 = vadd.f32 %v321_v7, %v319_v8  ;;  %s4098_s8 = sld [smem:[#allocation4 + $0x40]]  ;;  %v789_v32 = vstv %s4073_s26  ;;  %vm4868_vm4 = vcmp.ge.s32.totalorder %v337_v2, 1  ;;  %vm4919_vm7 = vcmp.le.s32.totalorder %v337_v2, 14 }
  0x47   : > { %s4100_s9 = sld [smem:[#allocation4 + $0x19]]  ;;  %v895_v41 = vstv %s4080_s27 }
  0x48   : > { %8315 = vst [vmem:[#allocation13_spill] sm:$0xff] %v4082_v10  ;;  %356 = vst.msk [vmem:[#allocation2 + $0x1] sm:$0x3] %vm4076_vm1, %v4082_v10  ;;  %s4108_s10 = sld [smem:[#allocation4 + $0x49]]  ;;  %v1001_v48 = vstv %s4084_s28 }
  0x49   : > { %s4110_s11 = sld [smem:[#allocation4 + $0x22]]  ;;  %v1107_v51 = vstv %s4086_s29 }
  0x4a   : > { %s4115_s12 = sld [smem:[#allocation4 + $0x52]]  ;;  %v538_v52 = vstv %s4094_s30 }
  0x4b   : > { %s4119_s14 = sld [smem:[#allocation4 + $0x2b]]  ;;  %v645_v57 = vstv %s4096_s7 }
  0x4c   : > { %s4127_s15 = sld [smem:[#allocation4 + $0x5b]]  ;;  %v1213_v59 = vstv %s4098_s8 }
  0x4d   : > { %s4129_s16 = sld [smem:[#allocation4]]  ;;  %v751_v61 = vstv %s4100_s9 }
  0x4e   : > { %s4136_s18 = sld [smem:[#allocation4 + $0x2]]  ;;  %v1319_v62 = vstv %s4108_s10 }
  0x4f   : > { %v4117_v15 = vld [vmem:[#allocation2] sm:$0x7]  ;;  %s4138_s19 = sld [smem:[#allocation4 + $0x3]]  ;;  %v857_v6 = vstv %s4110_s11 }
  0x50   : > { %v4123_v16 = vrot.slane %v4117_v15, %v4106_v13  ;;  %v362_v17 = vrot.slane %v4117_v15, %v4103_v12  ;;  %v366_v18 = vrot.slane %v4117_v15, %v4113_v14  ;;  %s4140_s20 = sld [smem:[#allocation4 + $0x34]]  ;;  %v470_v20 = vmul.f32 %v469_v19, %v4117_v15  ;;  %v4239_v38 = vld [vmem:[#allocation2 + $0x1] sm:$0x7] }
  0x51   : > { %s4142_s21 = sld [smem:[#allocation4 + $0x64]]  ;;  %v578_v24 = vmul.f32 %v577_v21, %v4117_v15  ;;  %v684_v30 = vmul.f32 %v683_v27, %v4117_v15  ;;  %v790_v35 = vmul.f32 %v789_v32, %v4117_v15  ;;  %v4251_v39 = vrot.slane %v4239_v38, %v4103_v12 }
  0x52   : > { %375 = vrot.lane.b32.xlu1 %v4123_v16, %s8024_s17  ;;  %371 = vrot.lane.b32.xlu0 %v362_v17, %s8024_s17  ;;  %s4146_s1 = sld [smem:[#allocation4 + $0x9]]  ;;  %v475_v22 = vrot.slane %v470_v20, %v4103_v12  ;;  %v479_v23 = vrot.slane %v470_v20, %v4113_v14  ;;  %v483_v25 = vrot.slane %v470_v20, %v4106_v13 }
  0x53   : > { %8318 = sst [smem:[#allocation16_spill]] %s4129_s16  ;;  %v583_v26 = vrot.slane %v578_v24, %v4103_v12  ;;  %v587_v28 = vrot.slane %v578_v24, %v4113_v14  ;;  %v591_v29 = vrot.slane %v578_v24, %v4106_v13  ;;  %v689_v31 = vrot.slane %v684_v30, %v4103_v12 }
  0x54   : > { %8319 = sst [smem:[#allocation17_spill]] %s4136_s18  ;;  %v697_v33 = vrot.slane %v684_v30, %v4106_v13  ;;  %v693_v34 = vrot.slane %v684_v30, %v4113_v14  ;;  %v799_v36 = vrot.slane %v790_v35, %v4113_v14  ;;  %v795_v37 = vrot.slane %v790_v35, %v4103_v12 }
  0x55   : > { %8320 = sst [smem:[#allocation18_spill]] %s4138_s19  ;;  %v803_v40 = vrot.slane %v790_v35, %v4106_v13  ;;  %v4268_v42 = vrot.slane %v4239_v38, %v4106_v13  ;;  %v4272_v43 = vrot.slane %v4239_v38, %v4113_v14  ;;  %v896_v44 = vmul.f32 %v895_v41, %v4117_v15 }
  0x56   : > { %384 = vrot.lane.b32.xlu1 %v362_v17, %s8027_s22  ;;  %373 = vrot.lane.b32.xlu0 %v366_v18, %s8024_s17  ;;  %s4149_s2 = sld [smem:[#allocation4 + $0xb]]  ;;  %v1002_v50 = vmul.f32 %v1001_v48, %v4117_v15  ;;  %v1108_v56 = vmul.f32 %v1107_v51, %v4117_v15  ;;  %v4342_v58 = vmul.f32 %v538_v52, %v4239_v38  ;;  %v963_v24 = vstv %s4119_s14 }
  0x57   : > { %s4151_s3 = sld [smem:[#allocation4 + $0xc]]  ;;  %v905_v45 = vrot.slane %v896_v44, %v4113_v14  ;;  %v901_v46 = vrot.slane %v896_v44, %v4103_v12  ;;  %v909_v47 = vrot.slane %v896_v44, %v4106_v13  ;;  %v4348_v60 = vmul.f32 %v645_v57, %v4239_v38 }
  0x58   : > { %8321 = sst [smem:[#allocation19_spill]] %s4146_s1  ;;  %v1011_v54 = vrot.slane %v1002_v50, %v4113_v14  ;;  %v1007_v55 = vrot.slane %v1002_v50, %v4103_v12  ;;  %v1113_v63 = vrot.slane %v1108_v56, %v4103_v12  ;;  %v1015_v0 = vrot.slane %v1002_v50, %v4106_v13 }
  0x59   : > { %s4153_s4 = sld [smem:[#allocation4 + $0x3d]]  ;;  %v1121_v3 = vrot.slane %v1108_v56, %v4106_v13  ;;  %v1117_v4 = vrot.slane %v1108_v56, %v4113_v14  ;;  %v4365_v5 = vmul.f32 %v1213_v59, %v4117_v15  ;;  %v544_v7 = vrot.slane %v4342_v58, %v4103_v12 }
  0x5a   : > { %388 = vrot.lane.b32.xlu1 %v4123_v16, %s8027_s22  ;;  %386 = vrot.lane.b32.xlu0 %v366_v18, %s8027_s22  ;;  %s4159_s5 = sld [smem:[#allocation4 + $0x12]]  ;;  %v4373_v8 = vmul.f32 %v751_v61, %v4239_v38  ;;  %v548_v19 = vrot.slane %v4342_v58, %v4113_v14  ;;  %v655_v20 = vrot.slane %v4348_v60, %v4113_v14  ;;  %v465_v48 = vstv %s4129_s16  ;;  %s8078_s16 = smov 111  }
  0x5b   : > { %s4162_s17 = sld [smem:[#allocation4 + $0x14]]  ;;  %v651_v21 = vrot.slane %v4348_v60, %v4103_v12  ;;  %v1227_v27 = vrot.slane %v4365_v5, %v4106_v13 }
  0x5c   : > { %8322 = sst [smem:[#allocation20_spill]] %s4149_s2  ;;  %v761_v30 = vrot.slane %v4373_v8, %v4113_v14 }
  0x5d   : > { %8323 = sst [smem:[#allocation21_spill]] %s4151_s3  ;;  %s8392_s3 = smov 111  }
  0x5e   : > { %s4164_s23 = sld [smem:[#allocation4 + $0x15]]  ;;  %399 = vrot.lane.b32.xlu1 %v366_v18, %s8032_s6  ;;  %397 = vrot.lane.b32.xlu0 %v362_v17, %s8032_s6  ;;  %v1425_v17 = vstv %s4115_s12  ;;  %v552_v18 = vrot.slane %v4342_v58, %v4106_v13 }
  0x5f   : > { %s4166_s24 = sld [smem:[#allocation4 + $0x6d]] }
  0x60   : > { %8324 = sst [smem:[#allocation22_spill]] %s4159_s5 }
  0x61   : > { %8325 = sst [smem:[#allocation23_spill]] %s4162_s17  ;;  %s8057_s17 = smov 16  }
  0x62   : > { %s4173_s22 = sld [smem:[#allocation4 + $0x1b]]  ;;  %484 = vrot.lane.b32.xlu1 %v475_v22, %s8057_s17  ;;  %486 = vrot.lane.b32.xlu0 %v479_v23, %s8057_s17  ;;  %v659_v22 = vrot.slane %v4348_v60, %v4106_v13  ;;  %v4396_v23 = vmul.f32 %v857_v6, %v4239_v38 }
  0x63   : > { %s4175_s25 = sld [smem:[#allocation4 + $0x1d]] }
  0x64   : > { %8326 = sst [smem:[#allocation24_spill]] %s4164_s23  ;;  %v863_v41 = vrot.slane %v4396_v23, %v4103_v12 }
  0x65   : > { %s4177_s13 = sld [smem:[#allocation4 + $0x1e]]  ;;  %v1743_v61 = vstv %s4166_s24 }
  0x66   : > { %s4179_s23 = sld [smem:[#allocation4 + $0x24]]  ;;  %488 = vrot.lane.b32.xlu1 %v483_v25, %s8057_s17  ;;  %592 = vrot.lane.b32.xlu0 %v583_v26, %s8057_s17  ;;  %v1531_v25 = vstv %s4127_s15  ;;  %v1219_v26 = vrot.slane %v4365_v5, %v4103_v12 }
  0x67   : > { %s4185_s6 = sld [smem:[#allocation4 + $0x26]]  ;;  %v4440_v44 = vmul.f32 %v1531_v25, %v4117_v15 }
  0x68   : > { %8327 = sst [smem:[#allocation25_spill]] %s4173_s22 }
  0x69   : > { %8328 = sst [smem:[#allocation26_spill]] %s4175_s25 }
  0x6a   : > { %s4188_s5 = sld [smem:[#allocation4 + $0x27]]  ;;  %594 = vrot.lane.b32.xlu1 %v587_v28, %s8057_s17  ;;  %596 = vrot.lane.b32.xlu0 %v591_v29, %s8057_s17  ;;  %v1223_v28 = vrot.slane %v4365_v5, %v4113_v14  ;;  %v4409_v29 = vmul.f32 %v1425_v17, %v4117_v15 }
  0x6b   : > { %8329 = sst [smem:[#allocation27_spill]] %s4177_s13 }
  0x6c   : > { %8330 = sst [smem:[#allocation28_spill]] %s4179_s23  ;;  %v1439_v51 = vrot.slane %v4409_v29, %v4106_v13  ;;  %v1435_v52 = vrot.slane %v4409_v29, %v4113_v14 }
  0x6d   : > { %8331 = sst [smem:[#allocation29_spill]] %s4185_s6 }
  0x6e   : > { %s4190_s25 = sld [smem:[#allocation4 + $0x2d]]  ;;  %698 = vrot.lane.b32.xlu1 %v689_v31, %s8057_s17  ;;  %v757_v31 = vrot.slane %v4373_v8, %v4103_v12 }
  0x6f   : > { %s4192_s13 = sld [smem:[#allocation4 + $0x46]] }
  0x70   : > { %8332 = sst [smem:[#allocation30_spill]] %s4188_s5 }
  0x71   : > { %s4199_s23 = sld [smem:[#allocation4 + $0x2f]] }
  0x72   : > { %s4201_s0 = sld [smem:[#allocation4 + $0x30]]  ;;  %702 = vrot.lane.b32.xlu1 %v697_v33, %s8057_s17  ;;  %v765_v33 = vrot.slane %v4373_v8, %v4106_v13 }
  0x73   : > { %s4203_s5 = sld [smem:[#allocation4 + $0x36]] }
  0x74   : > { %8333 = sst [smem:[#allocation31_spill]] %s4190_s25 }
  0x75   : > { %8334 = sst [smem:[#allocation32_spill]] %s4192_s13 }
  0x76   : > { %s4205_s6 = sld [smem:[#allocation4 + $0x76]]  ;;  %806 = vrot.lane.b32.xlu1 %v799_v36, %s8057_s17  ;;  %v4428_v36 = vmul.f32 %v963_v24, %v4239_v38 }
  0x77   : > { %8335 = sst [smem:[#allocation33_spill]] %s4199_s23 }
  0x78   : > { %8336 = sst [smem:[#allocation34_spill]] %s4201_s0  ;;  %v973_v56 = vrot.slane %v4428_v36, %v4113_v14  ;;  %v969_v57 = vrot.slane %v4428_v36, %v4103_v12 }
  0x79   : > { %8337 = sst [smem:[#allocation35_spill]] %s4203_s5  ;;  %s8340_s5 = smov 1  }
  0x7a   : > { %s4210_s25 = sld [smem:[#allocation4 + $0x38]]  ;;  %401 = vrot.lane.b32.xlu0 %v4123_v16, %s8340_s5  ;;  %v4376_v16 = vmul.f32 %v1319_v62, %v4117_v15  ;;  %v1537_v62 = vrot.slane %v4440_v44, %v4103_v12 }
  0x7b   : > { %s4213_s22 = sld [smem:[#allocation4 + $0x39]] }
  0x7c   : > { %s4215_s13 = sld [smem:[#allocation4 + $0x4]]  ;;  %v1325_v32 = vrot.slane %v4376_v16, %v4103_v12  ;;  %v1329_v35 = vrot.slane %v4376_v16, %v4113_v14  ;;  %v1849_v25 = vstv %s4205_s6 }
  0x7d   : > { %s4217_s23 = sld [smem:[#allocation4 + $0xd]] }
  0x7e   : > { %s4225_s0 = sld [smem:[#allocation4 + $0x3f]]  ;;  %700 = vrot.lane.b32.xlu0 %v693_v34, %s8057_s17  ;;  %v1333_v34 = vrot.slane %v4376_v16, %v4106_v13 }
  0x7f   : > { %s4227_s26 = sld [smem:[#allocation4 + $0x41]] }
  0x80   : > { %8338 = sst [smem:[#allocation36_spill]] %s4210_s25 }
  0x81   : > { %8339 = sst [smem:[#allocation37_spill]] %s4213_s22 }
  0x82   : > { %s4229_s22 = sld [smem:[#allocation4 + $0x42]]  ;;  %804 = vrot.lane.b32.xlu0 %v795_v37, %s8057_s17  ;;  %v1069_v37 = vstv %s4140_s20  ;;  %v510_v17 = vstv %s4215_s13 }
  0x83   : > { %s4231_s25 = sld [smem:[#allocation4 + $0x16]] }
  0x84   : > { %8341 = sst [smem:[#allocation38_spill]] %s4225_s0 }
  0x85   : > { %8342 = sst [smem:[#allocation39_spill]] %s4227_s26 }
  0x86   : > { %s4237_s5 = sld [smem:[#allocation4 + $0x4f]]  ;;  %808 = vrot.lane.b32.xlu0 %v803_v40, %s8057_s17  ;;  %s8357_s17 = smov 127   ;;  %v867_v40 = vrot.slane %v4396_v23, %v4113_v14 }
  0x87   : > { %s4241_s0 = sld [smem:[#allocation4 + $0x48]] }
  0x88   : > { %8343 = sst [smem:[#allocation40_spill]] %s4229_s22 }
  0x89   : > { %8344 = sst [smem:[#allocation41_spill]] %s4231_s25 }
  0x8a   : > { %s4243_s26 = sld [smem:[#allocation4 + $0x5]]  ;;  %427 = vrot.lane.b32.xlu0 %v4272_v43, %s8357_s17 }
  0x8b   : > { %s4245_s22 = sld [smem:[#allocation4 + $0xe]] }
  0x8c   : > { %8345 = sst [smem:[#allocation42_spill]] %s4237_s5 }
  0x8d   : > { %8346 = sst [smem:[#allocation43_spill]] %s4241_s0 }
  0x8e   : > { %s4254_s25 = sld [smem:[#allocation4 + $0x7f]] }
  0x8f   : > { %s4257_s5 = sld [smem:[#allocation4 + $0x17]] }
  0x90   : > { %8347 = sst [smem:[#allocation44_spill]] %s4243_s26 }
  0x91   : > { %8348 = sst [smem:[#allocation45_spill]] %s4245_s22  ;;  %s8055_s22 = smov 127  }
  0x92   : > { %s4259_s0 = sld [smem:[#allocation4 + $0x4a]]  ;;  %425 = vrot.lane.b32.xlu1 %v4251_v39, %s8055_s22 }
  0x93   : > { %s4261_s26 = sld [smem:[#allocation4 + $0x4b]] }
  0x94   : > { %8349 = sst [smem:[#allocation46_spill]] %s4254_s25 }
  0x95   : > { %8350 = sst [smem:[#allocation47_spill]] %s4257_s5 }
  0x96   : > { %s4275_s27 = sld [smem:[#allocation4 + $0x1f]]  ;;  %429 = vrot.lane.b32.xlu1 %v4268_v42, %s8357_s17 }
  0x97   : > { %s4281_s22 = sld [smem:[#allocation4 + $0x53]] }
  0x98   : > { %8351 = sst [smem:[#allocation48_spill]] %s4259_s0 }
  0x99   : > { %8352 = sst [smem:[#allocation49_spill]] %s4261_s26 }
  0x9a   : > { %s4277_s26 = sld [smem:[#allocation4 + $0x20]] }
  0x9b   : > { %s4279_s0 = sld [smem:[#allocation4 + $0x51]] }
  0x9c   : > { %8353 = sst [smem:[#allocation50_spill]] %s4275_s27 }
  0x9d   : > { %8356 = sst [smem:[#allocation53_spill]] %s4281_s22  ;;  %s8361_s22 = smov 16  }
  0x9e   : > { %s4289_s5 = sld [smem:[#allocation4 + $0x54]]  ;;  %912 = vrot.lane.b32.xlu1 %v905_v45, %s8361_s22  ;;  %910 = vrot.lane.b32.xlu0 %v901_v46, %s8361_s22  ;;  %v1637_v45 = vstv %s4142_s21  ;;  %v1431_v46 = vrot.slane %v4409_v29, %v4103_v12 }
  0x9f   : > { %s4291_s27 = sld [smem:[#allocation4 + $0x58]]  ;;  %v4468_v59 = vmul.f32 %v1637_v45, %v4117_v15 }
  0xa0   : > { %8354 = sst [smem:[#allocation51_spill]] %s4277_s26 }
  0xa1   : > { %8355 = sst [smem:[#allocation52_spill]] %s4279_s0 }
  0xa2   : > { %s4293_s25 = sld [smem:[#allocation4 + $0x6]]  ;;  %914 = vrot.lane.b32.xlu0 %v909_v47, %s8361_s22  ;;  %v871_v47 = vrot.slane %v4396_v23, %v4106_v13  ;;  %v8492_v23 = vmov 0 }
  0xa3   : > { %s4295_s0 = sld [smem:[#allocation4 + $0xf]]  ;;  %v8493_v23 = vsel %vm4913_vm6, 4294967295, %v8492_v23 }
  0xa4   : > { %8358 = sst [smem:[#allocation54_spill]] %s4289_s5  ;;  %8494 = vst [vmem:[#allocation116_spill] sm:$0xff] %v8493_v23 }
  0xa5   : > { %s4300_s17 = sld [smem:[#allocation4 + $0x28]] }
  0xa6   : > { %s4303_s26 = sld [smem:[#allocation4 + $0x18]] }
  0xa7   : > { %s4305_s5 = sld [smem:[#allocation4 + $0x29]] }
  0xa8   : > { %8359 = sst [smem:[#allocation55_spill]] %s4293_s25 }
  0xa9   : > { %8360 = sst [smem:[#allocation56_spill]] %s4295_s0  ;;  %s8070_s0 = smov 113  }
  0xaa   : > { %s4310_s25 = sld [smem:[#allocation4 + $0x21]]  ;;  %438 = vrot.lane.b32.xlu1 %v4251_v39, %s8070_s0  ;;  %440 = vrot.lane.b32.xlu0 %v4272_v43, %s8070_s0 }
  0xab   : > { %8362 = sst [smem:[#allocation57_spill]] %s4300_s17 }
  0xac   : > { %8363 = sst [smem:[#allocation58_spill]] %s4303_s26 }
  0xad   : > { %8364 = sst [smem:[#allocation59_spill]] %s4305_s5 }
  0xae   : > { %s4316_s17 = sld [smem:[#allocation4 + $0x5a]]  ;;  %442 = vrot.lane.b32.xlu1 %v4268_v42, %s8070_s0  ;;  %1016 = vrot.lane.b32.xlu0 %v1007_v55, %s8361_s22  ;;  %v1175_v55 = vstv %s4153_s4 }
  0xaf   : > { %s4319_s28 = sld [smem:[#allocation4 + $0x88]] }
  0xb0   : > { %8365 = sst [smem:[#allocation60_spill]] %s4310_s25 }
  0xb1   : > { %s4321_s5 = sld [smem:[#allocation4 + $0x2a]] }
  0xb2   : > { %s4327_s25 = sld [smem:[#allocation4 + $0x5c]]  ;;  %1018 = vrot.lane.b32.xlu1 %v1011_v54, %s8361_s22  ;;  %1020 = vrot.lane.b32.xlu0 %v1015_v0, %s8361_s22  ;;  %v4458_v54 = vmul.f32 %v1069_v37, %v4239_v38  ;;  %v4501_v37 = vmul.f32 %v1743_v61, %v4117_v15  ;;  %v4540_v0 = vld [vmem:[#allocation2 + $0x1] sm:$0x3] }
  0xb3   : > { %s4337_s29 = sld [smem:[#allocation4 + $0x5d]] }
  0xb4   : > { %8366 = sst [smem:[#allocation61_spill]] %s4316_s17 }
  0xb5   : > { %s4339_s30 = sld [smem:[#allocation4 + $0x32]] }
  0xb6   : > { %s4352_s0 = sld [smem:[#allocation4 + $0x63]]  ;;  %1122 = vrot.lane.b32.xlu1 %v1113_v63, %s8361_s22  ;;  %1124 = vrot.lane.b32.xlu0 %v1117_v4, %s8361_s22  ;;  %v977_v63 = vrot.slane %v4428_v36, %v4106_v13  ;;  %v573_v4 = vstv %s4146_s1 }
  0xb7   : > { %8367 = sst [smem:[#allocation62_spill]] %s4321_s5 }
  0xb8   : > { %8368 = sst [smem:[#allocation63_spill]] %s4327_s25 }
  0xb9   : > { %8369 = sst [smem:[#allocation64_spill]] %s4337_s29 }
  0xba   : > { %s4345_s25 = sld [smem:[#allocation4 + $0x33]]  ;;  %1126 = vrot.lane.b32.xlu1 %v1121_v3, %s8361_s22  ;;  %451 = vrot.lane.b32.xlu0 %v4251_v39, %s8078_s16  ;;  %v4491_v39 = vmul.f32 %v1175_v55, %v4239_v38  ;;  %v617_v55 = vstv %s4217_s23 }
  0xbb   : > { %8370 = sst [smem:[#allocation65_spill]] %s4339_s30  ;;  %v4583_v61 = vmul.f32 %v617_v55, %v4540_v0 }
  0xbc   : > { %8372 = sst [smem:[#allocation67_spill]] %s4352_s0 }
  0xbd   : > { %s4360_s7 = sld [smem:[#allocation4 + $0x65]] }
  0xbe   : > { %s4368_s8 = sld [smem:[#allocation4 + $0x61]]  ;;  %453 = vrot.lane.b32.xlu1 %v4272_v43, %s8078_s16  ;;  %455 = vrot.lane.b32.xlu0 %v4268_v42, %s8392_s3 }
  0xbf   : > { %s4379_s9 = sld [smem:[#allocation4 + $0x8]] }
  0xc0   : > { %8371 = sst [smem:[#allocation66_spill]] %s4345_s25 }
  0xc1   : > { %s4389_s10 = sld [smem:[#allocation4 + $0x11]] }
  0xc2   : > { %s4400_s11 = sld [smem:[#allocation4 + $0x31]] }
  0xc3   : > { %8373 = sst [smem:[#allocation68_spill]] %s4360_s7 }
  0xc4   : > { %s4411_s12 = sld [smem:[#allocation4 + $0x6a]] }
  0xc5   : > { %8374 = sst [smem:[#allocation69_spill]] %s4379_s9 }
  0xc6   : > { %s4421_s14 = sld [smem:[#allocation4 + $0x1a]] }
  0xc7   : > { %8375 = sst [smem:[#allocation70_spill]] %s4389_s10 }
  0xc8   : > { %s4431_s15 = sld [smem:[#allocation6]] }
  0xc9   : > { %s4451_s20 = sld [smem:[#allocation6 + $0x2]] }
  0xca   : > { %s4461_s21 = sld [smem:[#allocation6 + $0x3]]  ;;  %v1705_v45 = vstv %s4411_s12 }
  0xcb   : > { %s4471_s18 = sld [smem:[#allocation6 + $0x4]] }
  0xcc   : > { %8376 = sst [smem:[#allocation71_spill]] %s4421_s14 }
  0xcd   : > { %s4443_s14 = sld [smem:[#allocation6 + $0x1]] }
  0xce   : > { %8377 = sst [smem:[#allocation72_spill]] %s4431_s15  ;;  %s8405_s15 = smov 112  }
  0xcf   : > { %8379 = sst [smem:[#allocation74_spill]] %s4451_s20  ;;  %555 = vrot.lane.b32.xlu0 %v548_v19, %s8405_s15 }
  0xd0   : > { %8380 = sst [smem:[#allocation75_spill]] %s4461_s21 }
  0xd1   : > { %8381 = sst [smem:[#allocation76_spill]] %s4471_s18 }
  0xd2   : > { %s8382_s4 = sld [smem:[#allocation22_spill]] }
  0xd3   : > { %8378 = sst [smem:[#allocation73_spill]] %s4443_s14  ;;  %660 = vrot.lane.b32.xlu0 %v651_v21, %s8405_s15 }
  0xd4   : > { %s4484_s18 = sld [smem:[#allocation6 + $0x5]] }
  0xd5   : > { %s4493_s16 = sld [smem:[#allocation6 + $0x6]] }
  0xd6   : > { %s8387_s20 = sld [smem:[#allocation32_spill]] }
  0xd7   : > { %s4503_s19 = sld [smem:[#allocation6 + $0x7]]  ;;  %664 = vrot.lane.b32.xlu0 %v659_v22, %s8405_s15 }
  0xd8   : > { %v679_v3 = vstv %s8382_s4  ;;  %s4511_s1 = sld [smem:[#allocation6 + $0x8]] }
  0xd9   : > { %s4525_s4 = sld [smem:[#allocation4 + $0x73]] }
  0xda   : > { %8384 = sst [smem:[#allocation77_spill]] %s4484_s18  ;;  %s8092_s18 = smov 112  }
  0xdb   : > { %8385 = sst [smem:[#allocation78_spill]] %s4493_s16  ;;  %553 = vrot.lane.b32.xlu1 %v544_v7, %s8092_s18  ;;  %1230 = vrot.lane.b32.xlu0 %v1223_v28, %s8361_s22  ;;  %v4777_v28 = vmul.f32 %v1705_v45, %v4239_v38 }
  0xdc   : > { %v1281_v24 = vstv %s8387_s20  ;;  %s4534_s18 = sld [smem:[#allocation6 + $0x9]] }
  0xdd   : > { %8388 = sst [smem:[#allocation32_spill]] %s4503_s19  ;;  %v4549_v43 = vmul.f32 %v1281_v24, %v4239_v38  ;;  %v4565_v24 = vmul.f32 %v1849_v25, %v4117_v15  ;;  %8454 = vst [vmem:[#allocation99_spill] sm:$0xff] %v4777_v28 }
  0xde   : > { %8390 = sst [smem:[#allocation79_spill]] %s4511_s1 }
  0xdf   : > { %s8395_s3 = sld [smem:[#allocation28_spill]]  ;;  %557 = vrot.lane.b32.xlu1 %v552_v18, %s8405_s15  ;;  %v4574_v18 = vmul.f32 %v510_v17, %v4540_v0  ;;  %766 = vrot.lane.b32.xlu0 %v757_v31, %s8405_s15 }
  0xe0   : > { %s4543_s19 = sld [smem:[#allocation6 + $0xa]] }
  0xe1   : > { %s8400_s6 = sld [smem:[#allocation41_spill]] }
  0xe2   : > { %8394 = sst [smem:[#allocation80_spill]] %s4534_s18 }
  0xe3   : > { %s8401_s18 = sld [smem:[#allocation42_spill]]  ;;  %662 = vrot.lane.b32.xlu1 %v655_v20, %s8405_s15  ;;  %770 = vrot.lane.b32.xlu0 %v765_v33, %s8405_s15 }
  0xe4   : > { %s4552_s16 = sld [smem:[#allocation6 + $0xb]] }
  0xe5   : > { %v891_v7 = vstv %s8395_s3  ;;  %s4569_s24 = sld [smem:[#allocation6 + $0xc]] }
  0xe6   : > { %8399 = sst [smem:[#allocation81_spill]] %s4543_s19 }
  0xe7   : > { %s4576_s19 = sld [smem:[#allocation6 + $0xd]]  ;;  %v723_v58 = vstv %s8400_s6  ;;  %1228 = vrot.lane.b32.xlu1 %v1219_v26, %s8361_s22  ;;  %1336 = vrot.lane.b32.xlu0 %v1329_v35, %s8361_s22 }
  0xe8   : > { %s4585_s3 = sld [smem:[#allocation6 + $0xe]]  ;;  %v4610_v50 = vmul.f32 %v723_v58, %v4540_v0  ;;  %v1493_v58 = vstv %s4291_s27 }
  0xe9   : > { %v1387_v19 = vstv %s8401_s18  ;;  %s4593_s1 = sld [smem:[#allocation6 + $0xf]]  ;;  %v4691_v26 = vmul.f32 %v1493_v58, %v4239_v38  ;;  %v1041_v58 = vstv %s4400_s11 }
  0xea   : > { %8404 = sst [smem:[#allocation41_spill]] %s4552_s16  ;;  %v4615_v25 = vmul.f32 %v1387_v19, %v4239_v38  ;;  %v4764_v55 = vmul.f32 %v1041_v58, %v4540_v0  ;;  %v372_v58 = vpop.permute.xlu0 %371 }
  0xeb   : > { %8408 = sst [smem:[#allocation42_spill]] %s4569_s24  ;;  %1232 = vrot.lane.b32.xlu1 %v1227_v27, %s8361_s22  ;;  %8435 = vst [vmem:[#allocation87_spill] sm:$0xff] %v4691_v26  ;;  %872 = vrot.lane.b32.xlu0 %v863_v41, %s8405_s15  ;;  %v8483_v41 = vmov 0 }
  0xec   : > { %s8409_s16 = sld [smem:[#allocation46_spill]]  ;;  %8450 = vst [vmem:[#allocation98_spill] sm:$0xff] %v4764_v55  ;;  %v8484_v41 = vsel %vm4868_vm4, 4294967295, %v8483_v41 }
  0xed   : > { %8410 = sst [smem:[#allocation46_spill]] %s4576_s19  ;;  %8485 = vst [vmem:[#allocation110_spill] sm:$0xff] %v8484_v41 }
  0xee   : > { %8412 = sst [smem:[#allocation82_spill]] %s4585_s3 }
  0xef   : > { %8415 = sst [smem:[#allocation83_spill]] %s4593_s1  ;;  %768 = vrot.lane.b32.xlu1 %v761_v30, %s8405_s15  ;;  %876 = vrot.lane.b32.xlu0 %v871_v47, %s8405_s15  ;;  %v8495_v47 = vmov 0 }
  0xf0   : > { %s8416_s18 = sld [smem:[#allocation50_spill]]  ;;  %v8496_v47 = vsel %vm4919_vm7, 4294967295, %v8495_v47 }
  0xf1   : > { %s4607_s13 = sld [smem:[#allocation6 + $0x10]]  ;;  %8497 = vst [vmem:[#allocation117_spill] sm:$0xff] %v8496_v47 }
  0xf2   : > { %v1955_v17 = vstv %s8409_s16  ;;  %s4619_s23 = sld [smem:[#allocation6 + $0x11]] }
  0xf3   : > { %s4627_s10 = sld [smem:[#allocation4 + $0x7c]]  ;;  %v4633_v21 = vmul.f32 %v1955_v17, %v4117_v15  ;;  %v2061_v17 = vstv %s4319_s28  ;;  %1334 = vrot.lane.b32.xlu1 %v1325_v32, %s8361_s22  ;;  %1442 = vrot.lane.b32.xlu0 %v1435_v52, %s8361_s22 }
  0xf4   : > { %s8425_s20 = sld [smem:[#allocation57_spill]]  ;;  %v4716_v27 = vmul.f32 %v2061_v17, %v4117_v15  ;;  %v1811_v15 = vstv %s4525_s4 }
  0xf5   : > { %s4661_s1 = sld [smem:[#allocation4 + $0x85]] }
  0xf6   : > { %v829_v19 = vstv %s8416_s18  ;;  %s4671_s16 = sld [smem:[#allocation4 + $0x35]]  ;;  %8442 = vst [vmem:[#allocation91_spill] sm:$0xff] %v4716_v27 }
  0xf7   : > { %8418 = sst [smem:[#allocation50_spill]] %s4607_s13  ;;  %v4664_v22 = vmul.f32 %v829_v19, %v4540_v0  ;;  %1338 = vrot.lane.b32.xlu1 %v1333_v34, %s8361_s22  ;;  %v376_v34 = vpop.permute.xlu1 %375  ;;  %978 = vrot.lane.b32.xlu0 %v969_v57, %s8405_s15 }
  0xf8   : > { %8420 = sst [smem:[#allocation84_spill]] %s4619_s23 }
  0xf9   : > { %s4638_s23 = sld [smem:[#allocation4 + $0x23]]  ;;  %v1917_v16 = vstv %s4627_s10 }
  0xfa   : > { %s4654_s13 = sld [smem:[#allocation4 + $0x2c]]  ;;  %v935_v6 = vstv %s8425_s20  ;;  %v4856_v30 = vmul.f32 %v1917_v16, %v4239_v38 }
  0xfb   : > { %s4678_s3 = sld [smem:[#allocation4 + $0x66]]  ;;  %v4705_v19 = vmul.f32 %v935_v6, %v4540_v0  ;;  %v1599_v6 = vstv %s4368_s8  ;;  %v2023_v45 = vstv %s4661_s1  ;;  %874 = vrot.lane.b32.xlu1 %v867_v40, %s8405_s15  ;;  %v8480_v40 = vmov 0  ;;  %v385_v53 = vpop.permute.xlu1 %384  ;;  %982 = vrot.lane.b32.xlu0 %v977_v63, %s8405_s15 }
  0xfc   : > { %8431 = sst [smem:[#allocation86_spill]] %s4671_s16  ;;  %v4749_v17 = vmul.f32 %v1599_v6, %v4239_v38  ;;  %v4818_v6 = vmul.f32 %v1811_v15, %v4239_v38  ;;  %8477 = vst [vmem:[#allocation107_spill] sm:$0xff] %v4856_v30  ;;  %v8481_v40 = vsel %vm4862_vm3, 4294967295, %v8480_v40  ;;  %v4883_v31 = vmul.f32 %v2023_v45, %v4239_v38 }
  0xfd   : > { %s4694_s14 = sld [smem:[#allocation6 + $0x12]]  ;;  %8482 = vst [vmem:[#allocation109_spill] sm:$0xff] %v8481_v40 }
  0xfe   : > { %s4697_s21 = sld [smem:[#allocation6 + $0x13]]  ;;  %8447 = vst [vmem:[#allocation95_spill] sm:$0xff] %v4749_v17  ;;  %8466 = vst [vmem:[#allocation102_spill] sm:$0xff] %v4818_v6 }
  0xff   : > { %8424 = sst [smem:[#allocation85_spill]] %s4638_s23  ;;  %8488 = vst [vmem:[#allocation112_spill] sm:$0xff] %v4883_v31  ;;  %1440 = vrot.lane.b32.xlu1 %v1431_v46, %s8361_s22  ;;  %v389_v46 = vpop.permute.xlu1 %388 }
 0x100   : > { %8429 = sst [smem:[#allocation57_spill]] %s4654_s13 }
 0x101   : > { %s4712_s28 = sld [smem:[#allocation6 + $0x14]] }
 0x102   : > { %s4721_s27 = sld [smem:[#allocation6 + $0x15]] }
 0x103   : > { %8437 = sst [smem:[#allocation88_spill]] %s4694_s14  ;;  %1444 = vrot.lane.b32.xlu1 %v1439_v51, %s8361_s22 }
 0x104   : > { %8438 = sst [smem:[#allocation89_spill]] %s4697_s21 }
 0x105   : > { %s4735_s8 = sld [smem:[#allocation6 + $0x16]] }
 0x106   : > { %s4740_s23 = sld [smem:[#allocation6 + $0x17]] }
 0x107   : > { %8440 = sst [smem:[#allocation90_spill]] %s4712_s28  ;;  %980 = vrot.lane.b32.xlu1 %v973_v56, %s8405_s15 }
 0x108   : > { %8443 = sst [smem:[#allocation92_spill]] %s4721_s27 }
 0x109   : > { %s4751_s13 = sld [smem:[#allocation6 + $0x18]] }
 0x10a   : > { %s4760_s11 = sld [smem:[#allocation6 + $0x19]] }
 0x10b   : > { %8444 = sst [smem:[#allocation93_spill]] %s4735_s8  ;;  %1546 = vrot.lane.b32.xlu1 %v1537_v62, %s8361_s22 }
 0x10c   : > { %8446 = sst [smem:[#allocation94_spill]] %s4740_s23 }
 0x10d   : > { %s4779_s26 = sld [smem:[#allocation6 + $0x1a]] }
 0x10e   : > { %s4784_s17 = sld [smem:[#allocation4 + $0x8e]] }
 0x10f   : > { %8448 = sst [smem:[#allocation96_spill]] %s4751_s13 }
 0x110   : > { %8449 = sst [smem:[#allocation97_spill]] %s4760_s11 }
 0x111   : > { %s4795_s29 = sld [smem:[#allocation4 + $0x3a]] }
 0x112   : > { %s4802_s30 = sld [smem:[#allocation4 + $0x3b]] }
 0x113   : > { %8456 = sst [smem:[#allocation100_spill]] %s4779_s26 }
 0x114   : > { %s4820_s12 = sld [smem:[#allocation4 + $0x3c]]  ;;  %v2129_v35 = vstv %s4784_s17 }
 0x115   : > { %s4827_s7 = sld [smem:[#allocation4 + $0x3e]]  ;;  %v4925_v5 = vmul.f32 %v2129_v35, %v4239_v38 }
 0x116   : > { %s4835_s0 = sld [smem:[#allocation6 + $0x1b]] }
 0x117   : > { %s4841_s11 = sld [smem:[#allocation6 + $0x1c]]  ;;  %v1147_v20 = vstv %s4795_s29  ;;  %8498 = vst [vmem:[#allocation118_spill] sm:$0xff] %v4925_v5 }
 0x118   : > { %8462 = sst [smem:[#allocation101_spill]] %s4802_s30  ;;  %v4938_v15 = vmul.f32 %v1147_v20, %v4540_v0  ;;  %v374_v20 = vpop.permute.xlu0 %373 }
 0x119   : > { %s4858_s5 = sld [smem:[#allocation6 + $0x1d]]  ;;  %v378_v35 = vsel %vm377_vm2, %v372_v58, %v374_v20  ;;  %v379_v29 = vsel %vm377_vm2, %v374_v20, %v376_v34 }
 0x11a   : > { %8467 = sst [smem:[#allocation103_spill]] %s4820_s12  ;;  %8502 = vst [vmem:[#allocation121_spill] sm:$0xff] %v4938_v15  ;;  %v4977_v16 = vsel %vm4862_vm3, %v378_v35, 0.0  ;;  %v4981_v49 = vsel %vm4868_vm4, %v379_v29, 0.0 }
 0x11b   : > { %8470 = sst [smem:[#allocation104_spill]] %s4827_s7  ;;  %8505 = vst [vmem:[#allocation122_spill] sm:$0xff] %v4977_v16  ;;  %8506 = vst [vmem:[#allocation123_spill] sm:$0xff] %v4981_v49  ;;  %v466_v56 = vmul.f32 %v465_v48, %v4977_v16  ;;  %v5003_v38 = vmul.f32 %v465_v48, %v4981_v49  ;;  %v5008_v57 = vmul.f32 %v573_v4, %v4977_v16 }
 0x11c   : > { %8471 = sst [smem:[#allocation105_spill]] %s4835_s0  ;;  %v387_v51 = vpop.permute.xlu0 %386  ;;  %v5018_v35 = vmul.f32 %v573_v4, %v4981_v49  ;;  %v5023_v48 = vmul.f32 %v679_v3, %v4977_v16  ;;  %v5046_v4 = vmul.f32 %v679_v3, %v4981_v49  ;;  %v5063_v36 = vmul.f32 %v891_v7, %v4977_v16 }
 0x11d   : > { %8473 = sst [smem:[#allocation106_spill]] %s4841_s11  ;;  %v391_v29 = vsel %vm390_vm5, %v385_v53, %v387_v51  ;;  %v392_v2 = vsel %vm390_vm5, %v387_v51, %v389_v46  ;;  %v5068_v63 = vmul.f32 %v891_v7, %v4981_v49 }
 0x11e   : > { %s4877_s9 = sld [smem:[#allocation6 + $0x1e]]  ;;  %v5029_v20 = vsel %vm4913_vm6, %v391_v29, 0.0  ;;  %v5033_v46 = vsel %vm4919_vm7, %v392_v2, 0.0 }
 0x11f   : > { %8479 = sst [smem:[#allocation108_spill]] %s4858_s5  ;;  %8512 = vst [vmem:[#allocation124_spill] sm:$0xff] %v5029_v20  ;;  %8514 = vst [vmem:[#allocation125_spill] sm:$0xff] %v5033_v46 }
 0x120   : > { %s4886_s4 = sld [smem:[#allocation6 + $0x1f]] }
 0x121   : > { %s4891_s10 = sld [smem:[#allocation6 + $0x20]] }
 0x122   : > { %s4908_s17 = sld [smem:[#allocation6 + $0x21]] }
 0x123   : > { %s4927_s29 = sld [smem:[#allocation6 + $0x22]] }
 0x124   : > { %8486 = sst [smem:[#allocation111_spill]] %s4877_s9 }
 0x125   : > { %s4935_s1 = sld [smem:[#allocation6 + $0x23]] }
 0x126   : > { %8489 = sst [smem:[#allocation113_spill]] %s4886_s4 }
 0x127   : > { %8490 = sst [smem:[#allocation114_spill]] %s4891_s10 }
 0x128   : > { %8491 = sst [smem:[#allocation115_spill]] %s4908_s17 }
 0x129   : > { %8499 = sst [smem:[#allocation119_spill]] %s4927_s29 }
 0x12a   : > { %s8508_s0 = sld [smem:[#allocation25_spill]] }
 0x12b   : > { %8501 = sst [smem:[#allocation120_spill]] %s4935_s1 }
 0x12c   : > { %s5011_s29 = sld [smem:[#allocation4 + $0x6c]] }
 0x12d   : > { %s8510_s17 = sld [smem:[#allocation31_spill]] }
 0x12e   : > { %s8511_s26 = sld [smem:[#allocation17_spill]] }
 0x12f   : > { %s5025_s10 = sld [smem:[#allocation6 + $0x24]] }
 0x130   : > { %s8513_s1 = sld [smem:[#allocation20_spill]]  ;;  %v8515_v53 = vstv %s8508_s0 }
 0x131   : > { %v5051_v2 = vmul.f32 %v8515_v53, %v4977_v16  ;;  %s8516_s6 = sld [smem:[#allocation23_spill]]  ;;  %v8517_v51 = vmov %v8515_v53  ;;  %v5077_v53 = vpop.permute.xlu1 %399 }
 0x132   : > { %s5053_s9 = sld [smem:[#allocation6 + $0x25]]  ;;  %v5058_v62 = vmul.f32 %v8517_v51, %v4981_v49  ;;  %v398_v51 = vpop.permute.xlu0 %397 }
 0x133   : > { %v8518_v3 = vstv %s8510_s17  ;;  %s5075_s11 = sld [smem:[#allocation6 + $0x26]]  ;;  %v8526_v52 = vstv %s8510_s17 }
 0x134   : > { %v5073_v29 = vmul.f32 %v8518_v3, %v4977_v16  ;;  %s8521_s5 = sld [smem:[#allocation26_spill]]  ;;  %v8522_v34 = vstv %s8511_s26  ;;  %v5095_v1 = vmul.f32 %v8526_v52, %v4981_v49 }
 0x135   : > { %s8523_s0 = sld [smem:[#allocation29_spill]]  ;;  %v499_v58 = vmul.f32 %v8522_v34, %v5029_v20  ;;  %v8524_v45 = vmov %v8522_v34  ;;  %v404_v34 = vsel %vm403_vm8, %v398_v51, %v5077_v53  ;;  %v8538_v51 = vrot.slane %v4440_v44, %v4106_v13  ;;  %v485_v30 = vpop.permute.xlu1 %484 }
 0x136   : > { %8519 = vst [vmem:[#allocation126_spill] sm:$0xff] %v5073_v29  ;;  %v5085_v32 = vmul.f32 %v8524_v45, %v5033_v46  ;;  %v8525_v7 = vstv %s8513_s1  ;;  %s8527_s4 = sld [smem:[#allocation33_spill]]  ;;  %8528 = vst [vmem:[#allocation127_spill] sm:$0xff] %v5095_v1  ;;  %v5120_v60 = vsel %vm4862_vm3, %v404_v34, 0.0  ;;  %v487_v28 = vpop.permute.xlu0 %486 }
 0x137   : > { %v5090_v3 = vmul.f32 %v8525_v7, %v5029_v20  ;;  %s5097_s13 = sld [smem:[#allocation6 + $0x27]]  ;;  %v8531_v45 = vmov %v8525_v7  ;;  %v8532_v8 = vstv %s8516_s6  ;;  %8537 = vst [vmem:[#allocation128_spill] sm:$0xff] %v5120_v60  ;;  %1550 = vrot.lane.b32.xlu1 %v8538_v51, %s8361_s22 }
 0x138   : > { %s8530_s23 = sld [smem:[#allocation35_spill]]  ;;  %v5104_v33 = vmul.f32 %v8531_v45, %v5033_v46  ;;  %v5109_v7 = vmul.f32 %v8532_v8, %v5029_v20  ;;  %v8533_v42 = vmov %v8532_v8  ;;  %v8540_v8 = vrot.slane %v4440_v44, %v4113_v14 }
 0x139   : > { %8520 = sst [smem:[#allocation16_spill]] %s5075_s11  ;;  %v5114_v52 = vmul.f32 %v8533_v42, %v5033_v46 }
 0x13a   : > { %s8534_s17 = sld [smem:[#allocation18_spill]]  ;;  %1548 = vrot.lane.b32.xlu0 %v8540_v8, %s8361_s22  ;;  %v8541_v42 = vstv %s8521_s5 }
 0x13b   : > { %s5116_s26 = sld [smem:[#allocation6 + $0x28]]  ;;  %v5133_v45 = vmul.f32 %v8541_v42, %v5029_v20  ;;  %v8542_v10 = vmov %v8541_v42  ;;  %v8543_v9 = vstv %s8523_s0 }
 0x13c   : > { %s8536_s8 = sld [smem:[#allocation21_spill]]  ;;  %v5138_v34 = vmul.f32 %v8542_v10, %v5033_v46  ;;  %v5143_v11 = vmul.f32 %v8543_v9, %v5029_v20  ;;  %v8546_v44 = vmov %v8543_v9  ;;  %v8548_v8 = vstv %s8527_s4 }
 0x13d   : > { %8529 = sst [smem:[#allocation19_spill]] %s5097_s13  ;;  %v5150_v51 = vmul.f32 %v8546_v44, %v5033_v46  ;;  %v5155_v42 = vmul.f32 %v8548_v8, %v5029_v20  ;;  %v8550_v10 = vmov %v8548_v8 }
 0x13e   : > { %s8539_s1 = sld [smem:[#allocation24_spill]]  ;;  %v5160_v5 = vmul.f32 %v8550_v10, %v5033_v46  ;;  %v8552_v31 = vstv %s8530_s23 }
 0x13f   : > { %s8544_s6 = sld [smem:[#allocation27_spill]]  ;;  %8549 = vst [vmem:[#allocation129_spill] sm:$0xff] %v5155_v42  ;;  %v5165_v9 = vmul.f32 %v8552_v31, %v4977_v16  ;;  %v5185_v27 = vmul.f32 %v8552_v31, %v4981_v49  ;;  %v489_v42 = vpop.permute.xlu1 %488 }
 0x140   : > { %s8545_s27 = sld [smem:[#allocation30_spill]]  ;;  %8551 = vst [vmem:[#allocation130_spill] sm:$0xff] %v5160_v5  ;;  %v8555_v6 = vstv %s8534_s17 }
 0x141   : > { %8535 = sst [smem:[#allocation22_spill]] %s5116_s26  ;;  %8553 = vst [vmem:[#allocation131_spill] sm:$0xff] %v5165_v9  ;;  %v505_v44 = vmul.f32 %v8555_v6, %v5120_v60  ;;  %8560 = vst [vmem:[#allocation132_spill] sm:$0xff] %v5185_v27  ;;  %v491_v6 = vsel %vm490_vm9, %v485_v30, %v487_v28  ;;  %v8568_v30 = vrot.slane %v4458_v54, %v4113_v14 }
 0x142   : > { %s5145_s28 = sld [smem:[#allocation6 + $0x29]]  ;;  %v8556_v8 = vstv %s8536_s8  ;;  %v495_v31 = vadd.f32 %v491_v6, %v466_v56 }
 0x143   : > { %s8547_s21 = sld [smem:[#allocation34_spill]]  ;;  %v5175_v17 = vmul.f32 %v8556_v8, %v5120_v60  ;;  %1086 = vrot.lane.b32.xlu1 %v8568_v30, %s8405_s15 }
 0x144   : > { %s5167_s5 = sld [smem:[#allocation6 + $0x2a]]  ;;  %v8557_v10 = vstv %s8539_s1  ;;  %v501_v56 = vadd.f32 %v499_v58, %v495_v31  ;;  %v492_v58 = vsel %vm490_vm9, %v487_v28, %v489_v42  ;;  %v8600_v42 = vrot.slane %v4468_v59, %v4103_v12 }
 0x145   : > { %s8554_s14 = sld [smem:[#allocation36_spill]]  ;;  %v5180_v15 = vmul.f32 %v8557_v10, %v5120_v60  ;;  %v8563_v9 = vstv %s8544_s6  ;;  %v496_v28 = vadd.f32 %v492_v58, %v5003_v38 }
 0x146   : > { %s8558_s0 = sld [smem:[#allocation37_spill]]  ;;  %v5193_v8 = vmul.f32 %v8563_v9, %v5120_v60  ;;  %v8564_v55 = vstv %s8545_s27  ;;  %v8570_v9 = vrot.slane %v4458_v54, %v4103_v12 }
 0x147   : > { %s8559_s4 = sld [smem:[#allocation38_spill]]  ;;  %v5198_v5 = vmul.f32 %v8564_v55, %v5120_v60  ;;  %1652 = vrot.lane.b32.xlu1 %v8600_v42, %s8361_s22 }
 0x148   : > { %s5187_s25 = sld [smem:[#allocation6 + $0x2b]]  ;;  %1084 = vrot.lane.b32.xlu0 %v8570_v9, %s8405_s15 }
 0x149   : > { %s8562_s19 = sld [smem:[#allocation39_spill]]  ;;  %v8565_v10 = vstv %s8547_s21 }
 0x14a   : > { %v5203_v26 = vmul.f32 %v8565_v10, %v5120_v60  ;;  %s5205_s23 = sld [smem:[#allocation6 + $0x2c]] }
 0x14b   : > { %s8569_s24 = sld [smem:[#allocation40_spill]]  ;;  %v8572_v55 = vstv %s8554_s14 }
 0x14c   : > { %8566 = vst [vmem:[#allocation133_spill] sm:$0xff] %v5203_v26  ;;  %s8571_s18 = sld [smem:[#allocation43_spill]]  ;;  %v5218_v10 = vmul.f32 %v8572_v55, %v5029_v20  ;;  %v8574_v27 = vmov %v8572_v55  ;;  %v8577_v6 = vstv %s8558_s0 }
 0x14d   : > { %v5223_v1 = vmul.f32 %v8574_v27, %v5033_v46  ;;  %s5225_s7 = sld [smem:[#allocation6 + $0x2d]]  ;;  %v5231_v30 = vmul.f32 %v8577_v6, %v5120_v60  ;;  %v8579_v9 = vstv %s8559_s4  ;;  %v593_v6 = vpop.permute.xlu0 %592 }
 0x14e   : > { %8561 = sst [smem:[#allocation25_spill]] %s5187_s25  ;;  %8573 = vst [vmem:[#allocation134_spill] sm:$0xff] %v5218_v10  ;;  %v5236_v26 = vmul.f32 %v8579_v9, %v4977_v16  ;;  %v8580_v55 = vmov %v8579_v9 }
 0x14f   : > { %8575 = vst [vmem:[#allocation135_spill] sm:$0xff] %v5223_v1  ;;  %s8576_s16 = sld [smem:[#allocation48_spill]]  ;;  %8578 = vst [vmem:[#allocation136_spill] sm:$0xff] %v5231_v30  ;;  %v5241_v10 = vmul.f32 %v8580_v55, %v4981_v49  ;;  %v8582_v27 = vstv %s8562_s19 }
 0x150   : > { %8567 = sst [smem:[#allocation28_spill]] %s5205_s23  ;;  %v5246_v1 = vmul.f32 %v8582_v27, %v5029_v20  ;;  %v8586_v30 = vmov %v8582_v27 }
 0x151   : > { %8581 = vst [vmem:[#allocation137_spill] sm:$0xff] %v5241_v10  ;;  %s5248_s14 = sld [smem:[#allocation6 + $0x2e]]  ;;  %v5253_v29 = vmul.f32 %v8586_v30, %v5033_v46  ;;  %v8588_v9 = vstv %s8569_s24 }
 0x152   : > { %8583 = vst [vmem:[#allocation138_spill] sm:$0xff] %v5246_v1  ;;  %s8585_s20 = sld [smem:[#allocation49_spill]]  ;;  %v5258_v55 = vmul.f32 %v8588_v9, %v5120_v60  ;;  %v8591_v10 = vstv %s8571_s18 }
 0x153   : > { %8587 = vst [vmem:[#allocation139_spill] sm:$0xff] %v5253_v29  ;;  %s8589_s4 = sld [smem:[#allocation52_spill]]  ;;  %v5263_v27 = vmul.f32 %v8591_v10, %v4977_v16  ;;  %v8593_v31 = vmov %v8591_v10  ;;  %v507_v10 = vadd.f32 %v505_v44, %v501_v56 }
 0x154   : > { %8590 = vst [vmem:[#allocation140_spill] sm:$0xff] %v5258_v55  ;;  %s8592_s2 = sld [smem:[#allocation53_spill]]  ;;  %v5271_v30 = vmul.f32 %v8593_v31, %v4981_v49 }
 0x155   : > { %s5265_s12 = sld [smem:[#allocation6 + $0x2f]]  ;;  %v8595_v29 = vstv %s8576_s16 }
 0x156   : > { %8594 = vst [vmem:[#allocation141_spill] sm:$0xff] %v5271_v30  ;;  %v5276_v1 = vmul.f32 %v8595_v29, %v5029_v20  ;;  %v8597_v9 = vmov %v8595_v29  ;;  %s8599_s19 = sld [smem:[#allocation54_spill]]  ;;  %v8601_v29 = vrot.slane %v4458_v54, %v4106_v13 }
 0x157   : > { %8584 = sst [smem:[#allocation31_spill]] %s5248_s14  ;;  %v5281_v55 = vmul.f32 %v8597_v9, %v5033_v46 }
 0x158   : > { %8596 = vst [vmem:[#allocation142_spill] sm:$0xff] %v5276_v1  ;;  %s5283_s30 = sld [smem:[#allocation6 + $0x30]]  ;;  %1088 = vrot.lane.b32.xlu0 %v8601_v29, %s8405_s15  ;;  %v8602_v31 = vstv %s8585_s20 }
 0x159   : > { %8598 = vst [vmem:[#allocation143_spill] sm:$0xff] %v5281_v55  ;;  %v5297_v9 = vmul.f32 %v8602_v31, %v5120_v60  ;;  %s5300_s16 = sld [smem:[#allocation6 + $0x31]]  ;;  %v8604_v38 = vstv %s8589_s4  ;;  %v595_v55 = vpop.permute.xlu1 %594 }
 0x15a   : > { %v5305_v44 = vmul.f32 %v8604_v38, %v4977_v16  ;;  %v8606_v56 = vmov %v8604_v38  ;;  %v8608_v42 = vstv %s8592_s2  ;;  %s5322_s18 = sld [smem:[#allocation6 + $0x32]] }
 0x15b   : > { %8603 = vst [vmem:[#allocation144_spill] sm:$0xff] %v5297_v9  ;;  %v5310_v58 = vmul.f32 %v8606_v56, %v4981_v49  ;;  %v5315_v54 = vmul.f32 %v8608_v42, %v5029_v20  ;;  %v8610_v29 = vmov %v8608_v42  ;;  %v597_v9 = vpop.permute.xlu0 %596  ;;  %s8615_s4 = sld [smem:[#allocation61_spill]]  ;;  %v8617_v56 = vrot.slane %v4468_v59, %v4106_v13 }
 0x15c   : > { %8605 = vst [vmem:[#allocation145_spill] sm:$0xff] %v5305_v44  ;;  %v5320_v31 = vmul.f32 %v8610_v29, %v5033_v46  ;;  %v8613_v38 = vstv %s8599_s19  ;;  %v598_v29 = vsel %vm490_vm9, %v593_v6, %v595_v55  ;;  %s8616_s2 = sld [smem:[#allocation63_spill]]  ;;  %v8619_v6 = vrot.slane %v4574_v18, %v4103_v12 }
 0x15d   : > { %8607 = vst [vmem:[#allocation146_spill] sm:$0xff] %v5310_v58  ;;  %8609 = vst [vmem:[#allocation147_spill] sm:$0xff] %v5315_v54  ;;  %v5327_v44 = vmul.f32 %v8613_v38, %v5120_v60  ;;  %v502_v54 = vadd.f32 %v5085_v32, %v496_v28  ;;  %v602_v30 = vadd.f32 %v598_v29, %v5008_v57  ;;  %1656 = vrot.lane.b32.xlu1 %v8617_v56, %s8361_s22  ;;  %s8620_s26 = sld [smem:[#allocation64_spill]] }
 0x15e   : > { %8611 = vst [vmem:[#allocation148_spill] sm:$0xff] %v5320_v31  ;;  %v599_v31 = vsel %vm490_vm9, %v595_v55, %v597_v9  ;;  %v8618_v32 = vrot.slane %v4468_v59, %v4113_v14  ;;  %v5349_v55 = vadd.f32 %v8619_v6, %v507_v10  ;;  %s5352_s13 = sld [smem:[#allocation6 + $0x33]]  ;;  %v699_v10 = vpop.permute.xlu1 %698  ;;  %v8637_v58 = vstv %s8539_s1 }
 0x15f   : > { %8614 = vst [vmem:[#allocation149_spill] sm:$0xff] %v5327_v44  ;;  %v603_v38 = vadd.f32 %v599_v31, %v5018_v35  ;;  %s5362_s11 = sld [smem:[#allocation4 + $0x6e]]  ;;  %v608_v59 = vadd.f32 %v5090_v3, %v602_v30  ;;  %v402_v29 = vpop.permute.xlu0 %401 }
 0x160   : > { %8612 = sst [smem:[#allocation17_spill]] %s5322_s18  ;;  %1654 = vrot.lane.b32.xlu0 %v8618_v32, %s8361_s22  ;;  %v405_v3 = vsel %vm403_vm8, %v5077_v53, %v402_v29  ;;  %v8633_v53 = vrot.slane %v4491_v39, %v4113_v14  ;;  %v8634_v29 = vrot.slane %v4491_v39, %v4103_v12 }
 0x161   : > { %v8621_v31 = vstv %s8615_s4  ;;  %s5376_s23 = sld [smem:[#allocation4 + $0x6f]]  ;;  %v609_v9 = vadd.f32 %v5104_v33, %v603_v38  ;;  %v5396_v1 = vsel %vm4868_vm4, %v405_v3, 0.0  ;;  %v614_v33 = vadd.f32 %v5175_v17, %v608_v59 }
 0x162   : > { %v5360_v56 = vmul.f32 %v8621_v31, %v4977_v16  ;;  %v8623_v32 = vmov %v8621_v31  ;;  %v8625_v35 = vstv %s8616_s2  ;;  %s8627_s25 = sld [smem:[#allocation67_spill]]  ;;  %8632 = vst [vmem:[#allocation155_spill] sm:$0xff] %v5396_v1  ;;  %1192 = vrot.lane.b32.xlu1 %v8633_v53, %s8405_s15  ;;  %v703_v53 = vpop.permute.xlu1 %702  ;;  %v8639_v17 = vstv %s8536_s8 }
 0x163   : > { %v5368_v6 = vmul.f32 %v8623_v32, %v4981_v49  ;;  %v5373_v28 = vmul.f32 %v8625_v35, %v5029_v20  ;;  %v8628_v30 = vmov %v8625_v35  ;;  %v8630_v32 = vstv %s8620_s26  ;;  %s5391_s4 = sld [smem:[#allocation6 + $0x34]] }
 0x164   : > { %8622 = vst [vmem:[#allocation150_spill] sm:$0xff] %v5360_v56  ;;  %v5383_v31 = vmul.f32 %v8628_v30, %v5033_v46  ;;  %v5388_v57 = vmul.f32 %v8630_v32, %v5120_v60  ;;  %1190 = vrot.lane.b32.xlu0 %v8634_v29, %s8405_s15  ;;  %s5408_s2 = sld [smem:[#allocation6 + $0x35]]  ;;  %v719_v29 = vmul.f32 %v8637_v58, %v5396_v1  ;;  %v701_v32 = vpop.permute.xlu0 %700  ;;  %v8638_v30 = vstv %s8534_s17 }
 0x165   : > { %8624 = vst [vmem:[#allocation151_spill] sm:$0xff] %v5368_v6  ;;  %8626 = vst [vmem:[#allocation152_spill] sm:$0xff] %v5373_v28  ;;  %s5418_s14 = sld [smem:[#allocation6 + $0x36]]  ;;  %v613_v59 = vmul.f32 %v8639_v17, %v5396_v1  ;;  %v704_v38 = vsel %vm490_vm9, %v699_v10, %v701_v32  ;;  %v705_v58 = vsel %vm490_vm9, %v701_v32, %v703_v53  ;;  %v8647_v32 = vstv %s8547_s21 }
 0x166   : > { %8629 = vst [vmem:[#allocation153_spill] sm:$0xff] %v5383_v31  ;;  %8631 = vst [vmem:[#allocation154_spill] sm:$0xff] %v5388_v57  ;;  %v506_v57 = vmul.f32 %v8638_v30, %v5396_v1  ;;  %s5434_s18 = sld [smem:[#allocation6 + $0x37]]  ;;  %v8643_v30 = vstv %s8545_s27  ;;  %v708_v17 = vadd.f32 %v704_v38, %v5023_v48  ;;  %v8645_v10 = vrot.slane %v4501_v37, %v4103_v12  ;;  %v807_v48 = vpop.permute.xlu1 %806 }
 0x167   : > { %v5446_v28 = vmul.f32 %v8643_v30, %v5396_v1  ;;  %s5448_s8 = sld [smem:[#allocation6 + $0x38]]  ;;  %v5463_v53 = vmul.f32 %v8647_v32, %v5396_v1  ;;  %v8652_v6 = vstv %s8569_s24 }
 0x168   : > { %v8635_v35 = vstv %s8627_s25  ;;  %1758 = vrot.lane.b32.xlu1 %v8645_v10, %s8361_s22  ;;  %s5466_s25 = sld [smem:[#allocation6 + $0x39]]  ;;  %v615_v10 = vadd.f32 %v613_v59, %v609_v9 }
 0x169   : > { %v5416_v42 = vmul.f32 %v8635_v35, %v4977_v16  ;;  %v8640_v3 = vmov %v8635_v35  ;;  %s5478_s21 = sld [smem:[#allocation6 + $0x3a]] }
 0x16a   : > { %v5432_v35 = vmul.f32 %v8640_v3, %v4981_v49  ;;  %v709_v3 = vadd.f32 %v705_v58, %v5046_v4  ;;  %v8649_v4 = vstv %s8558_s0  ;;  %v508_v58 = vadd.f32 %v506_v57, %v502_v54  ;;  %s8654_s27 = sld [smem:[#allocation68_spill]] }
 0x16b   : > { %8636 = vst [vmem:[#allocation156_spill] sm:$0xff] %v5416_v42  ;;  %v8642_v42 = vstv %s8544_s6  ;;  %v5471_v38 = vmul.f32 %v8649_v4, %v5396_v1  ;;  %v5485_v4 = vmul.f32 %v8652_v6, %v5396_v1  ;;  %v8653_v54 = vstv %s8585_s20  ;;  %s5492_s17 = sld [smem:[#allocation6 + $0x3b]] }
 0x16c   : > { %8641 = vst [vmem:[#allocation157_spill] sm:$0xff] %v5432_v35  ;;  %v5441_v31 = vmul.f32 %v8642_v42, %v5396_v1  ;;  %v8646_v42 = vrot.slane %v4491_v39, %v4106_v13  ;;  %v8650_v39 = vrot.slane %v4583_v61, %v4103_v12  ;;  %v715_v32 = vadd.f32 %v5114_v52, %v709_v3  ;;  %v805_v35 = vpop.permute.xlu0 %804  ;;  %s5506_s24 = sld [smem:[#allocation6 + $0x3c]] }
 0x16d   : > { %8644 = sst [smem:[#allocation20_spill]] %s5448_s8  ;;  %v5490_v57 = vmul.f32 %v8653_v54, %v5396_v1  ;;  %v810_v9 = vsel %vm490_vm9, %v805_v35, %v807_v48  ;;  %v8661_v35 = vrot.slane %v4501_v37, %v4106_v13  ;;  %v8662_v54 = vrot.slane %v4501_v37, %v4113_v14 }
 0x16e   : > { %1194 = vrot.lane.b32.xlu0 %v8646_v42, %s8405_s15  ;;  %8648 = sst [smem:[#allocation23_spill]] %s5466_s25  ;;  %v5476_v30 = vadd.f32 %v8650_v39, %v614_v33  ;;  %v714_v42 = vadd.f32 %v5109_v7, %v708_v17  ;;  %v8656_v7 = vstv %s8599_s19  ;;  %v8658_v33 = vstv %s8620_s26 }
 0x16f   : > { %8651 = sst [smem:[#allocation26_spill]] %s5478_s21  ;;  %v5498_v52 = vmul.f32 %v8656_v7, %v5396_v1  ;;  %v5503_v59 = vmul.f32 %v8658_v33, %v5396_v1  ;;  %v721_v3 = vadd.f32 %v719_v29, %v715_v32  ;;  %v814_v39 = vadd.f32 %v810_v9, %v5051_v2  ;;  %1762 = vrot.lane.b32.xlu1 %v8661_v35, %s8361_s22 }
 0x170   : > { %v720_v17 = vadd.f32 %v5180_v15, %v714_v42  ;;  %s5519_s20 = sld [smem:[#allocation4 + $0x43]]  ;;  %v8663_v15 = vrot.slane %v4574_v18, %v4113_v14  ;;  %v8664_v29 = vrot.slane %v4583_v61, %v4113_v14  ;;  %v8665_v32 = vstv %s8654_s27  ;;  %v809_v18 = vpop.permute.xlu0 %808 }
 0x171   : > { %8655 = sst [smem:[#allocation29_spill]] %s5492_s17  ;;  %8657 = vst [vmem:[#allocation158_spill] sm:$0xff] %v5498_v52  ;;  %8659 = vst [vmem:[#allocation159_spill] sm:$0xff] %v5503_v59  ;;  %v5534_v9 = vmul.f32 %v8665_v32, %v5029_v20  ;;  %v8667_v37 = vmov %v8665_v32  ;;  %v820_v35 = vadd.f32 %v5133_v45, %v814_v39  ;;  %v811_v32 = vsel %vm490_vm9, %v807_v48, %v809_v18 }
 0x172   : > { %8660 = sst [smem:[#allocation33_spill]] %s5506_s24  ;;  %1760 = vrot.lane.b32.xlu0 %v8662_v54, %s8361_s22  ;;  %v5524_v2 = vadd.f32 %v8663_v15, %v508_v58  ;;  %v5529_v42 = vadd.f32 %v8664_v29, %v615_v10  ;;  %v5539_v33 = vmul.f32 %v8667_v37, %v5033_v46  ;;  %v426_v54 = vpop.permute.xlu1 %425  ;;  %v8669_v58 = vstv %s4678_s3 }
 0x173   : > { %8666 = vst [vmem:[#allocation160_spill] sm:$0xff] %v5534_v9  ;;  %v5545_v15 = vmul.f32 %v8669_v58, %v5120_v60  ;;  %v8671_v61 = vmov %v8669_v58  ;;  %v8673_v7 = vstv %s5011_s29  ;;  %v1771_v39 = vstv %s5362_s11  ;;  %s5577_s3 = sld [smem:[#allocation6 + $0x3d]] }
 0x174   : > { %8668 = vst [vmem:[#allocation161_spill] sm:$0xff] %v5539_v33  ;;  %v5550_v10 = vmul.f32 %v8671_v61, %v5396_v1  ;;  %v5558_v45 = vmul.f32 %v8673_v7, %v4977_v16  ;;  %v815_v58 = vadd.f32 %v811_v32, %v5058_v62  ;;  %v8675_v6 = vrot.slane %v4549_v43, %v4113_v14  ;;  %s8682_s11 = sld [smem:[#allocation44_spill]] }
 0x175   : > { %8670 = vst [vmem:[#allocation162_spill] sm:$0xff] %v5545_v15  ;;  %v8676_v61 = vrot.slane %v4549_v43, %v4103_v12  ;;  %v8677_v48 = vrot.slane %v4610_v50, %v4103_v12  ;;  %v8678_v18 = vrot.slane %v4610_v50, %v4113_v14  ;;  %v826_v62 = vadd.f32 %v5193_v8, %v820_v35  ;;  %s8684_s26 = sld [smem:[#allocation45_spill]] }
 0x176   : > { %8672 = vst [vmem:[#allocation163_spill] sm:$0xff] %v5550_v10  ;;  %8674 = vst [vmem:[#allocation164_spill] sm:$0xff] %v5558_v45  ;;  %1298 = vrot.lane.b32.xlu1 %v8675_v6, %s8405_s15  ;;  %v8680_v45 = vstv %s5011_s29  ;;  %v430_v15 = vpop.permute.xlu1 %429  ;;  %s5593_s1 = sld [smem:[#allocation4 + $0x44]] }
 0x177   : > { %1296 = vrot.lane.b32.xlu0 %v8676_v61, %s8405_s15  ;;  %v736_v7 = vadd.f32 %v8677_v48, %v720_v17  ;;  %v737_v37 = vadd.f32 %v8678_v18, %v721_v3  ;;  %v5585_v10 = vmul.f32 %v8680_v45, %v4981_v49  ;;  %v821_v61 = vadd.f32 %v5138_v34, %v815_v58  ;;  %v428_v17 = vpop.permute.xlu0 %427  ;;  %s8686_s29 = sld [smem:[#allocation47_spill]] }
 0x178   : > { %v5591_v3 = vmul.f32 %v1771_v39, %v5029_v20  ;;  %v432_v8 = vsel %vm431_vm10, %v426_v54, %v428_v17  ;;  %v433_v35 = vsel %vm431_vm10, %v428_v17, %v430_v15  ;;  %v5598_v34 = vmul.f32 %v1771_v39, %v5033_v46  ;;  %s8690_s6 = sld [smem:[#allocation51_spill]] }
 0x179   : > { %8679 = sst [smem:[#allocation35_spill]] %s5577_s3  ;;  %8681 = vst [vmem:[#allocation165_spill] sm:$0xff] %v5585_v10  ;;  %v1777_v45 = vstv %s5376_s23  ;;  %v827_v58 = vadd.f32 %v5441_v31, %v821_v61  ;;  %v5604_v18 = vsel %vm4913_vm6, %v432_v8, 0.0  ;;  %v5608_v50 = vsel %vm4919_vm7, %v433_v35, 0.0 }
 0x17a   : > { %8683 = vst [vmem:[#allocation166_spill] sm:$0xff] %v5591_v3  ;;  %8685 = vst [vmem:[#allocation167_spill] sm:$0xff] %v5598_v34  ;;  %v8688_v54 = vrot.slane %v4565_v24, %v4103_v12  ;;  %v8689_v15 = vrot.slane %v4549_v43, %v4106_v13  ;;  %s5618_s0 = sld [smem:[#allocation6 + $0x3e]]  ;;  %v1253_v31 = vstv %s5519_s20  ;;  %v8692_v39 = vstv %s8682_s11  ;;  %v913_v43 = vpop.permute.xlu1 %912 }
 0x17b   : > { %8687 = vst [vmem:[#allocation168_spill] sm:$0xff] %v5604_v18  ;;  %v527_v61 = vmul.f32 %v8692_v39, %v5604_v18  ;;  %v8693_v17 = vmov %v8692_v39  ;;  %v8694_v35 = vstv %s8684_s26  ;;  %s5633_s23 = sld [smem:[#allocation4 + $0x45]] }
 0x17c   : > { %1864 = vrot.lane.b32.xlu1 %v8688_v54, %s8361_s22  ;;  %1300 = vrot.lane.b32.xlu0 %v8689_v15, %s8405_s15  ;;  %v528_v8 = vmul.f32 %v8693_v17, %v5608_v50  ;;  %v634_v48 = vmul.f32 %v8694_v35, %v5604_v18  ;;  %v8695_v54 = vmov %v8694_v35  ;;  %v911_v15 = vpop.permute.xlu0 %910  ;;  %v8698_v17 = vrot.slane %v4664_v22, %v4103_v12  ;;  %s5647_s19 = sld [smem:[#allocation4 + $0x47]] }
 0x17d   : > { %v635_v32 = vmul.f32 %v8695_v54, %v5608_v50  ;;  %v8696_v6 = vstv %s8686_s29  ;;  %v5645_v35 = vmul.f32 %v1777_v45, %v5120_v60  ;;  %v916_v54 = vsel %vm490_vm9, %v911_v15, %v913_v43  ;;  %s5659_s27 = sld [smem:[#allocation6 + $0x3f]] }
 0x17e   : > { %v740_v29 = vmul.f32 %v8696_v6, %v5604_v18  ;;  %v8697_v34 = vmov %v8696_v6  ;;  %v842_v3 = vadd.f32 %v8698_v17, %v826_v62  ;;  %v8700_v10 = vstv %s8690_s6  ;;  %s8706_s20 = sld [smem:[#allocation59_spill]] }
 0x17f   : > { %v741_v39 = vmul.f32 %v8697_v34, %v5608_v50  ;;  %8699 = vst [vmem:[#allocation169_spill] sm:$0xff] %v5645_v35  ;;  %v846_v33 = vmul.f32 %v8700_v10, %v5604_v18  ;;  %v5654_v6 = vmul.f32 %v1777_v45, %v5396_v1  ;;  %v5657_v34 = vmul.f32 %v1253_v31, %v4540_v0  ;;  %s5677_s11 = sld [smem:[#allocation6 + $0x40]]  ;;  %v8743_v35 = vld [vmem:[#allocation126_spill] sm:$0xff] }
 0x180   : > { %8691 = sst [smem:[#allocation18_spill]] %s5618_s0  ;;  %v920_v62 = vadd.f32 %v916_v54, %v5063_v36  ;;  %v8703_v17 = vrot.slane %v4565_v24, %v4106_v13  ;;  %v8704_v15 = vrot.slane %v4565_v24, %v4113_v14  ;;  %v5671_v10 = vadd.f32 %v527_v61, %v5349_v55 }
 0x181   : > { %8701 = vst [vmem:[#allocation170_spill] sm:$0xff] %v5654_v6  ;;  %v8705_v0 = vrot.slane %v4664_v22, %v4113_v14  ;;  %v5680_v36 = vadd.f32 %v528_v8, %v5524_v2  ;;  %v5683_v54 = vadd.f32 %v634_v48, %v5476_v30  ;;  %v5686_v24 = vadd.f32 %v635_v32, %v5529_v42  ;;  %s5691_s26 = sld [smem:[#allocation6 + $0x41]] }
 0x182   : > { %1868 = vrot.lane.b32.xlu1 %v8703_v17, %s8361_s22  ;;  %1866 = vrot.lane.b32.xlu0 %v8704_v15, %s8361_s22  ;;  %v8708_v55 = vstv %s8690_s6  ;;  %v926_v22 = vadd.f32 %v5143_v11, %v920_v62  ;;  %s8710_s29 = sld [smem:[#allocation65_spill]]  ;;  %v915_v17 = vpop.permute.xlu0 %914  ;;  %v5694_v15 = vadd.f32 %v740_v29, %v736_v7  ;;  %v5696_v2 = vadd.f32 %v741_v39, %v737_v37 }
 0x183   : > { %8702 = sst [smem:[#allocation21_spill]] %s5659_s27  ;;  %v843_v45 = vadd.f32 %v8705_v0, %v827_v58  ;;  %v847_v61 = vmul.f32 %v8708_v55, %v5608_v50  ;;  %v439_v58 = vpop.permute.xlu1 %438  ;;  %v8221_v30 = vstv %s5593_s1  ;;  %v917_v42 = vsel %vm490_vm9, %v913_v43, %v915_v17 }
 0x184   : > { %s8711_s3 = sld [smem:[#allocation101_spill]]  ;;  %v5702_v32 = vadd.f32 %v846_v33, %v842_v3  ;;  %v8713_v11 = vstv %s8706_s20  ;;  %v932_v29 = vadd.f32 %v5198_v5, %v926_v22  ;;  %v921_v37 = vadd.f32 %v917_v42, %v5068_v63 }
 0x185   : > { %8707 = sst [smem:[#allocation24_spill]] %s5677_s11  ;;  %v952_v48 = vmul.f32 %v8713_v11, %v5604_v18  ;;  %v8714_v8 = vmov %v8713_v11  ;;  %v8716_v33 = vrot.slane %v4615_v25, %v4113_v14  ;;  %v8717_v7 = vrot.slane %v4615_v25, %v4103_v12 }
 0x186   : > { %s5699_s24 = sld [smem:[#allocation6 + $0x42]]  ;;  %v5710_v62 = vmul.f32 %v8714_v8, %v5608_v50  ;;  %v849_v63 = vadd.f32 %v847_v61, %v843_v45  ;;  %v927_v11 = vadd.f32 %v5150_v51, %v921_v37  ;;  %v5753_v61 = vmul.f32 %v8221_v30, %v5604_v18 }
 0x187   : > { %8709 = sst [smem:[#allocation27_spill]] %s5691_s26  ;;  %1404 = vrot.lane.b32.xlu1 %v8716_v33, %s8405_s15  ;;  %1402 = vrot.lane.b32.xlu0 %v8717_v7, %s8405_s15  ;;  %v443_v8 = vpop.permute.xlu1 %442  ;;  %v441_v33 = vpop.permute.xlu0 %440  ;;  %v8728_v5 = vrot.slane %v4633_v21, %v4103_v12 }
 0x188   : > { %s5712_s6 = sld [smem:[#allocation6 + $0x43]]  ;;  %v8718_v3 = vstv %s8710_s29 }
 0x189   : > { %v5727_v43 = vmul.f32 %v8718_v3, %v5604_v18  ;;  %s5730_s20 = sld [smem:[#allocation6 + $0x44]]  ;;  %v8720_v39 = vmov %v8718_v3  ;;  %v445_v3 = vsel %vm444_vm11, %v439_v58, %v441_v33  ;;  %v8729_v58 = vrot.slane %v4615_v25, %v4106_v13 }
 0x18a   : > { %v5735_v0 = vmul.f32 %v8720_v39, %v5608_v50  ;;  %v8721_v55 = vstv %s8711_s3  ;;  %s8723_s0 = sld [smem:[#allocation55_spill]]  ;;  %v446_v39 = vsel %vm444_vm11, %v441_v33, %v443_v8  ;;  %v5762_v37 = vsel %vm4862_vm3, %v445_v3, 0.0 }
 0x18b   : > { %v5740_v22 = vmul.f32 %v8721_v55, %v5604_v18  ;;  %v8722_v17 = vmov %v8721_v55  ;;  %s8724_s29 = sld [smem:[#allocation56_spill]]  ;;  %8726 = vst [vmem:[#allocation171_spill] sm:$0xff] %v5762_v37  ;;  %1970 = vrot.lane.b32.xlu1 %v8728_v5, %s8361_s22  ;;  %1406 = vrot.lane.b32.xlu0 %v8729_v58, %s8405_s15  ;;  %v8730_v8 = vrot.slane %v4705_v19, %v4103_v12  ;;  %v1019_v30 = vpop.permute.xlu1 %1018 }
 0x18c   : > { %8712 = sst [smem:[#allocation30_spill]] %s5699_s24  ;;  %v5745_v42 = vmul.f32 %v8722_v17, %v5608_v50  ;;  %v5766_v17 = vsel %vm4868_vm4, %v446_v39, 0.0  ;;  %v933_v55 = vadd.f32 %v5446_v28, %v927_v11 }
 0x18d   : > { %s8725_s3 = sld [smem:[#allocation58_spill]]  ;;  %8727 = vst [vmem:[#allocation172_spill] sm:$0xff] %v5766_v17  ;;  %v948_v33 = vadd.f32 %v8730_v8, %v932_v29  ;;  %v1017_v29 = vpop.permute.xlu0 %1016 }
 0x18e   : > { %8715 = sst [smem:[#allocation34_spill]] %s5712_s6 }
 0x18f   : > { %8719 = sst [smem:[#allocation36_spill]] %s5730_s20 }
 0x190   : > { %s8731_s27 = sld [smem:[#allocation60_spill]]  ;;  %v8733_v39 = vstv %s8723_s0 }
 0x191   : > { %s5780_s17 = sld [smem:[#allocation6 + $0x45]]  ;;  %v533_v51 = vmul.f32 %v8733_v39, %v5762_v37  ;;  %v8734_v5 = vmov %v8733_v39  ;;  %v8735_v45 = vstv %s8724_s29  ;;  %v8769_v39 = vld [vmem:[#allocation91_spill] sm:$0xff] }
 0x192   : > { %v534_v31 = vmul.f32 %v8734_v5, %v5766_v17  ;;  %v640_v25 = vmul.f32 %v8735_v45, %v5762_v37  ;;  %v8736_v8 = vmov %v8735_v45  ;;  %s5800_s11 = sld [smem:[#allocation6 + $0x46]]  ;;  %v1022_v5 = vsel %vm490_vm9, %v1017_v29, %v1019_v30 }
 0x193   : > { %v641_v3 = vmul.f32 %v8736_v8, %v5766_v17  ;;  %v8737_v7 = vstv %s8725_s3  ;;  %s8739_s0 = sld [smem:[#allocation62_spill]]  ;;  %v1026_v8 = vadd.f32 %v1022_v5, %v8743_v35  ;;  %v8745_v29 = vrot.slane %v4633_v21, %v4113_v14 }
 0x194   : > { %v746_v40 = vmul.f32 %v8737_v7, %v5762_v37  ;;  %v8740_v45 = vmov %v8737_v7  ;;  %v8744_v7 = vrot.slane %v4633_v21, %v4106_v13  ;;  %s5823_s29 = sld [smem:[#allocation4 + $0x75]]  ;;  %v5829_v35 = vadd.f32 %v534_v31, %v5680_v36  ;;  %v8748_v21 = vld [vmem:[#allocation129_spill] sm:$0xff] }
 0x195   : > { %v747_v58 = vmul.f32 %v8740_v45, %v5766_v17  ;;  %1972 = vrot.lane.b32.xlu0 %v8745_v29, %s8361_s22  ;;  %v954_v45 = vadd.f32 %v952_v48, %v948_v33  ;;  %v5832_v5 = vadd.f32 %v640_v25, %v5683_v54  ;;  %v1032_v48 = vadd.f32 %v8748_v21, %v1026_v8  ;;  %v1123_v33 = vpop.permute.xlu1 %1122  ;;  %v1021_v29 = vpop.permute.xlu0 %1020  ;;  %s8749_s3 = sld [smem:[#allocation66_spill]] }
 0x196   : > { %v8741_v28 = vstv %s8731_s27  ;;  %1974 = vrot.lane.b32.xlu1 %v8744_v7, %s8361_s22  ;;  %s5837_s27 = sld [smem:[#allocation6 + $0x47]]  ;;  %v5844_v31 = vadd.f32 %v746_v40, %v5694_v15  ;;  %v8750_v36 = vrot.slane %v4705_v19, %v4113_v14  ;;  %v8752_v40 = vld [vmem:[#allocation133_spill] sm:$0xff] }
 0x197   : > { %8732 = sst [smem:[#allocation37_spill]] %s5780_s17  ;;  %v852_v11 = vmul.f32 %v8741_v28, %v5762_v37  ;;  %v8742_v41 = vmov %v8741_v28  ;;  %v5853_v25 = vadd.f32 %v747_v58, %v5696_v2  ;;  %v1038_v15 = vadd.f32 %v8752_v40, %v1032_v48 }
 0x198   : > { %8738 = sst [smem:[#allocation38_spill]] %s5800_s11  ;;  %v853_v6 = vmul.f32 %v8742_v41, %v5766_v17  ;;  %v5826_v41 = vadd.f32 %v533_v51, %v5671_v10  ;;  %v5841_v10 = vadd.f32 %v641_v3, %v5686_v24  ;;  %v949_v54 = vadd.f32 %v8750_v36, %v933_v55  ;;  %v8753_v3 = vld [vmem:[#allocation127_spill] sm:$0xff]  ;;  %v8754_v55 = vld [vmem:[#allocation87_spill] sm:$0xff]  ;;  %v8760_v36 = vld [vmem:[#allocation130_spill] sm:$0xff] }
 0x199   : > { %v8746_v28 = vstv %s8739_s0  ;;  %s5849_s20 = sld [smem:[#allocation4 + $0x77]]  ;;  %v1023_v51 = vsel %vm490_vm9, %v1019_v30, %v1021_v29  ;;  %v5856_v8 = vadd.f32 %v852_v11, %v5702_v32  ;;  %v8756_v2 = vrot.slane %v8754_v55, %v4103_v12  ;;  %v1127_v40 = vpop.permute.xlu1 %1126 }
 0x19a   : > { %v958_v7 = vmul.f32 %v8746_v28, %v5762_v37  ;;  %s8751_s6 = sld [smem:[#allocation103_spill]]  ;;  %v5858_v24 = vadd.f32 %v853_v6, %v849_v63  ;;  %v1027_v19 = vadd.f32 %v1023_v51, %v8753_v3  ;;  %v8755_v28 = vrot.slane %v8754_v55, %v4113_v14  ;;  %v1125_v3 = vpop.permute.xlu0 %1124 }
 0x19b   : > { %1508 = vrot.lane.b32.xlu0 %v8756_v2, %s8405_s15  ;;  %v8757_v30 = vstv %s8739_s0  ;;  %v955_v58 = vadd.f32 %v5710_v62, %v949_v54  ;;  %v8758_v11 = vstv %s8749_s3  ;;  %s5893_s0 = sld [smem:[#allocation4 + $0x78]]  ;;  %v1128_v54 = vsel %vm490_vm9, %v1123_v33, %v1125_v3  ;;  %v8768_v62 = vld [vmem:[#allocation132_spill] sm:$0xff] }
 0x19c   : > { %8747 = sst [smem:[#allocation39_spill]] %s5837_s27  ;;  %1510 = vrot.lane.b32.xlu1 %v8755_v28, %s8405_s15  ;;  %v959_v6 = vmul.f32 %v8757_v30, %v5766_v17  ;;  %v5874_v63 = vadd.f32 %v958_v7, %v954_v45  ;;  %v1064_v21 = vmul.f32 %v8758_v11, %v5762_v37  ;;  %v8759_v48 = vmov %v8758_v11  ;;  %v8761_v28 = vld [vmem:[#allocation98_spill] sm:$0xff] }
 0x19d   : > { %v1065_v29 = vmul.f32 %v8759_v48, %v5766_v17  ;;  %v1033_v51 = vadd.f32 %v8760_v36, %v1027_v19  ;;  %v8762_v2 = vrot.slane %v8761_v28, %v4103_v12  ;;  %v1129_v11 = vsel %vm490_vm9, %v1125_v3, %v1127_v40  ;;  %s5947_s3 = sld [smem:[#allocation4 + $0x4e]] }
 0x19e   : > { %v8765_v36 = vstv %s5633_s23  ;;  %v1133_v9 = vadd.f32 %v1129_v11, %v8768_v62  ;;  %v8770_v33 = vrot.slane %v8769_v39, %v4103_v12  ;;  %v8771_v40 = vrot.slane %v8754_v55, %v4106_v13  ;;  %v8773_v11 = vld [vmem:[#allocation134_spill] sm:$0xff]  ;;  %v452_v59 = vpop.permute.xlu0 %451  ;;  %s5964_s27 = sld [smem:[#allocation4 + $0x4c]] }
 0x19f   : > { %v1054_v30 = vadd.f32 %v8762_v2, %v1038_v15  ;;  %v5905_v32 = vmul.f32 %v8765_v36, %v5762_v37  ;;  %v1039_v15 = vadd.f32 %v5463_v53, %v1033_v51  ;;  %v8767_v2 = vld [vmem:[#allocation131_spill] sm:$0xff]  ;;  %v1845_v3 = vstv %s5823_s29  ;;  %s8780_s29 = sld [smem:[#allocation69_spill]] }
 0x1a0   : > { %v8763_v45 = vstv %s8751_s6  ;;  %2076 = vrot.lane.b32.xlu1 %v8770_v33, %s8361_s22  ;;  %1512 = vrot.lane.b32.xlu0 %v8771_v40, %s8405_s15  ;;  %v5919_v53 = vadd.f32 %v959_v6, %v955_v58  ;;  %v8774_v36 = vld [vmem:[#allocation135_spill] sm:$0xff]  ;;  %v454_v33 = vpop.permute.xlu1 %453  ;;  %v8775_v55 = vrot.slane %v8761_v28, %v4113_v14  ;;  %v1877_v52 = vstv %s5849_s20  ;;  %s5931_s6 = sld [smem:[#allocation4 + $0x4d]]  ;;  %v8781_v28 = vld [vmem:[#allocation136_spill] sm:$0xff] }
 0x1a1   : > { %v5890_v7 = vmul.f32 %v8763_v45, %v5762_v37  ;;  %v8764_v19 = vmov %v8763_v45  ;;  %8766 = vst [vmem:[#allocation126_spill] sm:$0xff] %v5905_v32  ;;  %v1132_v45 = vadd.f32 %v1128_v54, %v8767_v2  ;;  %v1060_v51 = vadd.f32 %v5727_v43, %v1054_v30  ;;  %s8782_s20 = sld [smem:[#allocation70_spill]] }
 0x1a2   : > { %v5900_v48 = vmul.f32 %v8764_v19, %v5766_v17  ;;  %8772 = vst [vmem:[#allocation129_spill] sm:$0xff] %v5919_v53  ;;  %v1139_v2 = vadd.f32 %v8774_v36, %v1133_v9  ;;  %v1055_v40 = vadd.f32 %v8775_v55, %v1039_v15  ;;  %v458_v6 = vsel %vm457_vm12, %v452_v59, %v454_v33  ;;  %s8791_s11 = sld [smem:[#allocation57_spill]] }
 0x1a3   : > { %v1138_v19 = vadd.f32 %v8773_v11, %v1132_v45  ;;  %v8776_v43 = vstv %s5593_s1  ;;  %v8777_v30 = vstv %s5633_s23  ;;  %v5945_v9 = vmul.f32 %v1845_v3, %v4977_v16  ;;  %s8786_s1 = sld [smem:[#allocation71_spill]] }
 0x1a4   : > { %v5937_v58 = vmul.f32 %v8776_v43, %v5608_v50  ;;  %v5942_v45 = vmul.f32 %v8777_v30, %v5766_v17  ;;  %v1145_v11 = vadd.f32 %v5471_v38, %v1139_v2  ;;  %v5953_v59 = vsel %vm4913_vm6, %v458_v6, 0.0  ;;  %s8787_s23 = sld [smem:[#allocation85_spill]]  ;;  %v456_v30 = vpop.permute.xlu0 %455 }
 0x1a5   : > { %8779 = vst [vmem:[#allocation127_spill] sm:$0xff] %v5945_v9  ;;  %v1144_v15 = vadd.f32 %v8781_v28, %v1138_v19  ;;  %8783 = vst [vmem:[#allocation87_spill] sm:$0xff] %v5953_v59  ;;  %v8784_v36 = vrot.slane %v8769_v39, %v4106_v13  ;;  %v8785_v55 = vrot.slane %v8769_v39, %v4113_v14  ;;  %s8793_s17 = sld [smem:[#allocation86_spill]]  ;;  %v554_v39 = vpop.permute.xlu1 %553 }
 0x1a6   : > { %8778 = vst [vmem:[#allocation133_spill] sm:$0xff] %v5942_v45  ;;  %v1061_v19 = vadd.f32 %v5735_v0, %v1055_v40  ;;  %v5966_v38 = vadd.f32 %v1064_v21, %v1060_v51  ;;  %v5969_v2 = vmul.f32 %v1845_v3, %v4981_v49  ;;  %v5972_v6 = vmul.f32 %v1877_v52, %v5029_v20  ;;  %s5977_s24 = sld [smem:[#allocation4 + $0x50]]  ;;  %v8797_v51 = vld [vmem:[#allocation121_spill] sm:$0xff] }
 0x1a7   : > { %2080 = vrot.lane.b32.xlu1 %v8784_v36, %s8361_s22  ;;  %2078 = vrot.lane.b32.xlu0 %v8785_v55, %s8361_s22  ;;  %v5975_v43 = vmul.f32 %v1877_v52, %v5033_v46  ;;  %v8794_v0 = vstv %s8780_s29  ;;  %v8795_v21 = vstv %s8782_s20  ;;  %s8796_s22 = sld [smem:[#allocation104_spill]]  ;;  %v8798_v28 = vrot.slane %v8797_v51, %v4103_v12 }
 0x1a8   : > { %8788 = vst [vmem:[#allocation130_spill] sm:$0xff] %v5966_v38  ;;  %8789 = vst [vmem:[#allocation98_spill] sm:$0xff] %v5969_v2  ;;  %v568_v40 = vmul.f32 %v8794_v0, %v5953_v59  ;;  %v5985_v3 = vmul.f32 %v8795_v21, %v5953_v59  ;;  %v1883_v52 = vstv %s5893_s0  ;;  %v459_v55 = vsel %vm457_vm12, %v454_v33, %v456_v30  ;;  %v8803_v33 = vld [vmem:[#allocation95_spill] sm:$0xff]  ;;  %s6029_s0 = sld [smem:[#allocation6 + $0x48]] }
 0x1a9   : > { %8790 = vst [vmem:[#allocation131_spill] sm:$0xff] %v5972_v6  ;;  %8792 = vst [vmem:[#allocation132_spill] sm:$0xff] %v5975_v43  ;;  %v1160_v36 = vadd.f32 %v8798_v28, %v1144_v15  ;;  %v8799_v54 = vstv %s8786_s1  ;;  %v8801_v21 = vrot.slane %v8797_v51, %v4113_v14  ;;  %v6007_v15 = vsel %vm4919_vm7, %v459_v55, 0.0  ;;  %s6045_s26 = sld [smem:[#allocation6 + $0x49]] }
 0x1aa   : > { %v5995_v62 = vmul.f32 %v8799_v54, %v5953_v59  ;;  %v8800_v23 = vstv %s8787_s23  ;;  %8802 = vst [vmem:[#allocation91_spill] sm:$0xff] %v6007_v15  ;;  %v8804_v30 = vrot.slane %v8803_v33, %v4113_v14  ;;  %v8806_v54 = vstv %s8791_s11  ;;  %s6248_s21 = sld [smem:[#allocation6 + $0x4e]] }
 0x1ab   : > { %v6000_v0 = vmul.f32 %v8800_v23, %v5953_v59  ;;  %v1161_v46 = vadd.f32 %v8801_v21, %v1145_v11  ;;  %v8805_v23 = vrot.slane %v8803_v33, %v4103_v12  ;;  %v6020_v51 = vmul.f32 %v8806_v54, %v5953_v59  ;;  %s6258_s25 = sld [smem:[#allocation6 + $0x4f]] }
 0x1ac   : > { %1616 = vrot.lane.b32.xlu1 %v8804_v30, %s8405_s15  ;;  %v8808_v11 = vstv %s8793_s17  ;;  %v6027_v55 = vadd.f32 %v1065_v29, %v1061_v19  ;;  %v1166_v21 = vadd.f32 %v5740_v22, %v1160_v36  ;;  %v6043_v54 = vmul.f32 %v1883_v52, %v5120_v60  ;;  %v558_v29 = vpop.permute.xlu1 %557  ;;  %v556_v36 = vpop.permute.xlu0 %555  ;;  %s6272_s8 = sld [smem:[#allocation6 + $0x50]] }
 0x1ad   : > { %1614 = vrot.lane.b32.xlu0 %v8805_v23, %s8405_s15  ;;  %8807 = vst [vmem:[#allocation134_spill] sm:$0xff] %v6020_v51  ;;  %v6025_v28 = vmul.f32 %v8808_v11, %v5953_v59  ;;  %v8812_v30 = vstv %s8796_s22  ;;  %v8814_v23 = vstv %s5647_s19  ;;  %v8818_v19 = vstv %s8780_s29  ;;  %s8830_s29 = sld [smem:[#allocation72_spill]] }
 0x1ae   : > { %8810 = vst [vmem:[#allocation136_spill] sm:$0xff] %v6027_v55  ;;  %8811 = sst [smem:[#allocation40_spill]] %s6029_s0  ;;  %v6035_v47 = vmul.f32 %v8812_v30, %v5953_v59  ;;  %v6040_v20 = vmul.f32 %v8814_v23, %v5953_v59  ;;  %8816 = vst [vmem:[#allocation173_spill] sm:$0xff] %v6043_v54  ;;  %v569_v22 = vmul.f32 %v8818_v19, %v6007_v15  ;;  %v8819_v11 = vstv %s8782_s20 }
 0x1af   : > { %8809 = vst [vmem:[#allocation135_spill] sm:$0xff] %v6025_v28  ;;  %8817 = sst [smem:[#allocation43_spill]] %s6045_s26  ;;  %v6053_v30 = vmul.f32 %v8819_v11, %v6007_v15  ;;  %v8820_v23 = vstv %s8786_s1  ;;  %v6061_v54 = vmul.f32 %v1883_v52, %v5396_v1  ;;  %v560_v49 = vsel %vm559_vm13, %v554_v39, %v556_v36 }
 0x1b0   : > { %8813 = vst [vmem:[#allocation121_spill] sm:$0xff] %v6035_v47  ;;  %8815 = vst [vmem:[#allocation95_spill] sm:$0xff] %v6040_v20  ;;  %v6058_v60 = vmul.f32 %v8820_v23, %v6007_v15  ;;  %v561_v16 = vsel %vm559_vm13, %v556_v36, %v558_v29  ;;  %v8822_v19 = vstv %s8787_s23  ;;  %v1167_v6 = vadd.f32 %v5745_v42, %v1161_v46  ;;  %v8823_v23 = vld [vmem:[#allocation99_spill] sm:$0xff]  ;;  %s6116_s20 = sld [smem:[#allocation6 + $0x4b]] }
 0x1b1   : > { %8821 = vst [vmem:[#allocation174_spill] sm:$0xff] %v6061_v54  ;;  %v6068_v43 = vmul.f32 %v8822_v19, %v6007_v15  ;;  %v564_v11 = vadd.f32 %v560_v49, %v5826_v41  ;;  %v565_v2 = vadd.f32 %v561_v16, %v5829_v35  ;;  %v8824_v52 = vrot.slane %v8823_v23, %v4103_v12  ;;  %s8847_s1 = sld [smem:[#allocation77_spill]] }
 0x1b2   : > { %v8825_v39 = vrot.slane %v8803_v33, %v4106_v13  ;;  %v8826_v29 = vstv %s8791_s11  ;;  %v1359_v46 = vstv %s5964_s27  ;;  %v8828_v49 = vstv %s8793_s17  ;;  %v663_v33 = vpop.permute.xlu1 %662  ;;  %s8833_s17 = sld [smem:[#allocation73_spill]] }
 0x1b3   : > { %1720 = vrot.lane.b32.xlu1 %v8824_v52, %s8405_s15  ;;  %v6084_v36 = vmul.f32 %v8826_v29, %v6007_v15  ;;  %v6090_v42 = vmul.f32 %v8828_v49, %v6007_v15  ;;  %v8259_v16 = vstv %s5931_s6  ;;  %v8262_v41 = vstv %s5947_s3  ;;  %s6103_s11 = sld [smem:[#allocation6 + $0x4a]] }
 0x1b4   : > { %1618 = vrot.lane.b32.xlu0 %v8825_v39, %s8405_s15  ;;  %v8265_v35 = vstv %s5977_s24  ;;  %v570_v19 = vadd.f32 %v568_v40, %v564_v11  ;;  %v571_v52 = vadd.f32 %v569_v22, %v565_v2  ;;  %v661_v39 = vpop.permute.xlu0 %660  ;;  %v6096_v29 = vadd.f32 %v5890_v7, %v1166_v21  ;;  %s8838_s27 = sld [smem:[#allocation74_spill]]  ;;  %v3907_v7 = vld [vmem:[#allocation2 + $0x1] sm:$0x3] }
 0x1b5   : > { %8827 = vst [vmem:[#allocation99_spill] sm:$0xff] %v6084_v36  ;;  %8829 = vst [vmem:[#allocation175_spill] sm:$0xff] %v6090_v42  ;;  %v8832_v1 = vstv %s8796_s22  ;;  %v666_v40 = vsel %vm559_vm13, %v661_v39, %v663_v33  ;;  %v6107_v2 = vadd.f32 %v5900_v48, %v1167_v6  ;;  %v8837_v22 = vstv %s5647_s19  ;;  %s8840_s22 = sld [smem:[#allocation75_spill]] }
 0x1b6   : > { %8831 = vst [vmem:[#allocation176_spill] sm:$0xff] %v6096_v29  ;;  %v6101_v49 = vmul.f32 %v8832_v1, %v6007_v15  ;;  %v6112_v11 = vmul.f32 %v8837_v22, %v6007_v15  ;;  %v6114_v21 = vmul.f32 %v3907_v7, %v1359_v46  ;;  %8841 = sst [smem:[#allocation49_spill]] %s6116_s20  ;;  %v8842_v1 = vrot.slane %v8823_v23, %v4106_v13 }
 0x1b7   : > { %8836 = vst [vmem:[#allocation178_spill] sm:$0xff] %v6107_v2  ;;  %v6125_v48 = vmul.f32 %v8259_v16, %v5604_v18  ;;  %s8844_s19 = sld [smem:[#allocation76_spill]]  ;;  %v6130_v6 = vmul.f32 %v8262_v41, %v5762_v37  ;;  %v6135_v46 = vmul.f32 %v8265_v35, %v5953_v59  ;;  %v8848_v22 = vstv %s8830_s29 }
 0x1b8   : > { %8834 = vst [vmem:[#allocation177_spill] sm:$0xff] %v6101_v49  ;;  %8839 = vst [vmem:[#allocation179_spill] sm:$0xff] %v6112_v11  ;;  %1724 = vrot.lane.b32.xlu1 %v8842_v1, %s8405_s15  ;;  %v2164_v7 = vmul.f32 %v8848_v22, %v570_v19  ;;  %v8849_v1 = vmov %v8848_v22  ;;  %s8850_s23 = sld [smem:[#allocation78_spill]]  ;;  %v8851_v16 = vstv %s8833_s17  ;;  %v8852_v41 = vrot.slane %v8823_v23, %v4113_v14  ;;  %v665_v20 = vpop.permute.xlu0 %664 }
 0x1b9   : > { %8835 = sst [smem:[#allocation48_spill]] %s6103_s11  ;;  %8843 = vst [vmem:[#allocation180_spill] sm:$0xff] %v6125_v48  ;;  %8845 = vst [vmem:[#allocation181_spill] sm:$0xff] %v6130_v6  ;;  %v6142_v54 = vmul.f32 %v8849_v1, %v571_v52  ;;  %v2322_v18 = vmul.f32 %v8851_v16, %v570_v19  ;;  %v8853_v9 = vmov %v8851_v16  ;;  %v1229_v16 = vpop.permute.xlu1 %1228  ;;  %v8862_v6 = vstv %s8847_s1 }
 0x1ba   : > { %8846 = vst [vmem:[#allocation182_spill] sm:$0xff] %v6135_v46  ;;  %1722 = vrot.lane.b32.xlu0 %v8852_v41, %s8405_s15  ;;  %v6153_v35 = vmul.f32 %v8853_v9, %v571_v52  ;;  %v8854_v39 = vstv %s8838_s27  ;;  %s8855_s0 = sld [smem:[#allocation32_spill]]  ;;  %v8863_v47 = vmov %v8862_v6  ;;  %v670_v48 = vadd.f32 %v666_v40, %v5832_v5 }
 0x1bb   : > { %v2443_v59 = vmul.f32 %v8854_v39, %v570_v19  ;;  %v8856_v22 = vmov %v8854_v39  ;;  %v8857_v1 = vstv %s8840_s22  ;;  %s8858_s29 = sld [smem:[#allocation79_spill]]  ;;  %v2874_v39 = vmul.f32 %v8862_v6, %v570_v19 }
 0x1bc   : > { %v6159_v46 = vmul.f32 %v8856_v22, %v571_v52  ;;  %v2601_v11 = vmul.f32 %v8857_v1, %v570_v19  ;;  %v8859_v49 = vmov %v8857_v1  ;;  %v6177_v22 = vmul.f32 %v8863_v47, %v571_v52  ;;  %s8868_s17 = sld [smem:[#allocation80_spill]] }
 0x1bd   : > { %v6165_v23 = vmul.f32 %v8859_v49, %v571_v52  ;;  %v8860_v41 = vstv %s8844_s19  ;;  %v667_v42 = vsel %vm559_vm13, %v663_v33, %v665_v20  ;;  %v8865_v49 = vld [vmem:[#allocation102_spill] sm:$0xff]  ;;  %s8870_s27 = sld [smem:[#allocation81_spill]] }
 0x1be   : > { %v2759_v37 = vmul.f32 %v8860_v41, %v570_v19  ;;  %v8861_v9 = vmov %v8860_v41  ;;  %v8864_v29 = vstv %s8850_s23  ;;  %v8866_v28 = vrot.slane %v8865_v49, %v4113_v14  ;;  %s8872_s22 = sld [smem:[#allocation41_spill]] }
 0x1bf   : > { %v6171_v2 = vmul.f32 %v8861_v9, %v571_v52  ;;  %v3032_v1 = vmul.f32 %v8864_v29, %v570_v19  ;;  %v8867_v41 = vmov %v8864_v29  ;;  %s8873_s19 = sld [smem:[#allocation42_spill]]  ;;  %v671_v5 = vadd.f32 %v667_v42, %v5841_v10 }
 0x1c0   : > { %1828 = vrot.lane.b32.xlu1 %v8866_v28, %s8405_s15  ;;  %v3033_v9 = vmul.f32 %v8867_v41, %v571_v52  ;;  %v8869_v6 = vstv %s8855_s0  ;;  %v8874_v20 = vrot.slane %v8865_v49, %v4103_v12  ;;  %s8877_s1 = sld [smem:[#allocation46_spill]]  ;;  %v676_v41 = vadd.f32 %v5985_v3, %v670_v48  ;;  %v8885_v48 = vld [vmem:[#allocation107_spill] sm:$0xff] }
 0x1c1   : > { %v3190_v45 = vmul.f32 %v8869_v6, %v570_v19  ;;  %v8871_v47 = vmov %v8869_v6  ;;  %v8875_v33 = vstv %s8858_s29  ;;  %s8878_s23 = sld [smem:[#allocation82_spill]]  ;;  %v1233_v6 = vpop.permute.xlu1 %1232  ;;  %v677_v10 = vadd.f32 %v6053_v30, %v671_v5 }
 0x1c2   : > { %v6193_v55 = vmul.f32 %v8871_v47, %v571_v52  ;;  %1826 = vrot.lane.b32.xlu0 %v8874_v20, %s8405_s15  ;;  %v3311_v28 = vmul.f32 %v8875_v33, %v570_v19  ;;  %v8876_v29 = vmov %v8875_v33  ;;  %s8879_s0 = sld [smem:[#allocation83_spill]]  ;;  %v1231_v47 = vpop.permute.xlu0 %1230  ;;  %v8881_v19 = vstv %s8868_s17 }
 0x1c3   : > { %v6204_v40 = vmul.f32 %v8876_v29, %v571_v52  ;;  %s8880_s26 = sld [smem:[#allocation50_spill]]  ;;  %v1234_v42 = vsel %vm490_vm9, %v1229_v16, %v1231_v47  ;;  %v1235_v20 = vsel %vm490_vm9, %v1231_v47, %v1233_v6  ;;  %v2168_v33 = vmul.f32 %v8881_v19, %v676_v41 }
 0x1c4   : > { %v8882_v32 = vstv %s8870_s27  ;;  %v8883_v29 = vstv %s8872_s22  ;;  %v8886_v53 = vrot.slane %v8885_v48, %v4103_v12  ;;  %s6224_s29 = sld [smem:[#allocation6 + $0x4c]]  ;;  %v8896_v38 = vstv %s8872_s22 }
 0x1c5   : > { %v2326_v52 = vmul.f32 %v8882_v32, %v676_v41  ;;  %v2447_v56 = vmul.f32 %v8883_v29, %v676_v41  ;;  %v8884_v36 = vstv %s8873_s19  ;;  %s8891_s20 = sld [smem:[#allocation84_spill]]  ;;  %v2448_v51 = vmul.f32 %v8896_v38, %v677_v10 }
 0x1c6   : > { %v2605_v3 = vmul.f32 %v8884_v36, %v676_v41  ;;  %1932 = vrot.lane.b32.xlu1 %v8886_v53, %s8405_s15  ;;  %v8887_v30 = vstv %s8877_s1  ;;  %v8892_v36 = vrot.slane %v8865_v49, %v4106_v13  ;;  %s6238_s11 = sld [smem:[#allocation6 + $0x4d]]  ;;  %v6240_v53 = vadd.f32 %v2168_v33, %v2164_v7 }
 0x1c7   : > { %v2763_v16 = vmul.f32 %v8887_v30, %v676_v41  ;;  %v8888_v5 = vstv %s8878_s23  ;;  %v6242_v29 = vadd.f32 %v2326_v52, %v2322_v18  ;;  %v6244_v30 = vadd.f32 %v2447_v56, %v2443_v59  ;;  %s8917_s22 = sld [smem:[#allocation93_spill]] }
 0x1c8   : > { %v2878_v6 = vmul.f32 %v8888_v5, %v676_v41  ;;  %v8889_v47 = vstv %s8879_s0  ;;  %1830 = vrot.lane.b32.xlu0 %v8892_v36, %s8405_s15  ;;  %v6246_v5 = vadd.f32 %v2605_v3, %v2601_v11  ;;  %v8894_v11 = vstv %s8868_s17  ;;  %s8915_s17 = sld [smem:[#allocation90_spill]] }
 0x1c9   : > { %v3036_v44 = vmul.f32 %v8889_v47, %v676_v41  ;;  %v8890_v19 = vstv %s8880_s26  ;;  %v769_v47 = vpop.permute.xlu1 %768  ;;  %v6250_v49 = vadd.f32 %v2763_v16, %v2759_v37  ;;  %v2169_v33 = vmul.f32 %v8894_v11, %v677_v10 }
 0x1ca   : > { %v3194_v32 = vmul.f32 %v8890_v19, %v676_v41  ;;  %v767_v19 = vpop.permute.xlu0 %766  ;;  %v6252_v36 = vadd.f32 %v2878_v6, %v2874_v39  ;;  %v8895_v52 = vstv %s8870_s27  ;;  %v8897_v37 = vrot.slane %v8885_v48, %v4106_v13  ;;  %s8916_s27 = sld [smem:[#allocation92_spill]] }
 0x1cb   : > { %v6254_v7 = vadd.f32 %v3036_v44, %v3032_v1  ;;  %v8893_v56 = vstv %s8891_s20  ;;  %v2327_v3 = vmul.f32 %v8895_v52, %v677_v10  ;;  %v8898_v44 = vstv %s8873_s19  ;;  %s8918_s19 = sld [smem:[#allocation94_spill]] }
 0x1cc   : > { %v6256_v18 = vadd.f32 %v3194_v32, %v3190_v45  ;;  %v3315_v59 = vmul.f32 %v8893_v56, %v676_v41  ;;  %1936 = vrot.lane.b32.xlu1 %v8897_v37, %s8405_s15  ;;  %v2606_v45 = vmul.f32 %v8898_v44, %v677_v10  ;;  %v8899_v39 = vstv %s8877_s1  ;;  %s8920_s1 = sld [smem:[#allocation96_spill]] }
 0x1cd   : > { %v2764_v1 = vmul.f32 %v8899_v39, %v677_v10  ;;  %v8900_v41 = vstv %s8878_s23  ;;  %v8901_v6 = vstv %s8879_s0  ;;  %v8902_v38 = vrot.slane %v8885_v48, %v4113_v14  ;;  %v1335_v44 = vpop.permute.xlu1 %1334  ;;  %s8921_s23 = sld [smem:[#allocation97_spill]] }
 0x1ce   : > { %v2879_v16 = vmul.f32 %v8900_v41, %v677_v10  ;;  %v3037_v32 = vmul.f32 %v8901_v6, %v677_v10  ;;  %v6286_v56 = vadd.f32 %v3315_v59, %v3311_v28  ;;  %v6289_v11 = vadd.f32 %v2169_v33, %v6142_v54  ;;  %v771_v39 = vpop.permute.xlu0 %770  ;;  %s8948_s0 = sld [smem:[#allocation105_spill]] }
 0x1cf   : > { %1934 = vrot.lane.b32.xlu0 %v8902_v38, %s8405_s15  ;;  %v6292_v52 = vadd.f32 %v2327_v3, %v6153_v35  ;;  %v6295_v37 = vadd.f32 %v2448_v51, %v6159_v46  ;;  %v6298_v41 = vadd.f32 %v2606_v45, %v6165_v23  ;;  %v6301_v48 = vadd.f32 %v2764_v1, %v6171_v2  ;;  %v8905_v46 = vld [vmem:[#allocation137_spill] sm:$0xff]  ;;  %v8909_v45 = vld [vmem:[#allocation138_spill] sm:$0xff]  ;;  %v8910_v1 = vld [vmem:[#allocation139_spill] sm:$0xff] }
 0x1d0   : > { %v6304_v28 = vadd.f32 %v2879_v16, %v6177_v22  ;;  %v6306_v54 = vadd.f32 %v3037_v32, %v3033_v9  ;;  %v8903_v35 = vstv %s8880_s26  ;;  %v8904_v33 = vstv %s8891_s20  ;;  %v8906_v38 = vld [vmem:[#allocation112_spill] sm:$0xff]  ;;  %s8913_s26 = sld [smem:[#allocation88_spill]] }
 0x1d1   : > { %v3195_v59 = vmul.f32 %v8903_v35, %v677_v10  ;;  %v3316_v3 = vmul.f32 %v8904_v33, %v677_v10  ;;  %v1238_v51 = vadd.f32 %v1234_v42, %v5236_v26  ;;  %v1239_v6 = vadd.f32 %v1235_v20, %v8905_v46  ;;  %v1339_v16 = vpop.permute.xlu1 %1338  ;;  %s8914_s20 = sld [smem:[#allocation89_spill]] }
 0x1d2   : > { %v8907_v23 = vrot.slane %v8906_v38, %v4113_v14  ;;  %v772_v2 = vsel %vm559_vm13, %v767_v19, %v769_v47  ;;  %v773_v22 = vsel %vm559_vm13, %v769_v47, %v771_v39  ;;  %v8908_v9 = vrot.slane %v8906_v38, %v4103_v12  ;;  %v1337_v32 = vpop.permute.xlu0 %1336 }
 0x1d3   : > { %v6327_v42 = vadd.f32 %v3195_v59, %v6193_v55  ;;  %v6330_v20 = vadd.f32 %v3316_v3, %v6204_v40  ;;  %v1244_v19 = vadd.f32 %v8909_v45, %v1238_v51  ;;  %v1245_v47 = vadd.f32 %v8910_v1, %v1239_v6  ;;  %v8911_v55 = vld [vmem:[#allocation118_spill] sm:$0xff]  ;;  %v8924_v1 = vld [vmem:[#allocation141_spill] sm:$0xff] }
 0x1d4   : > { %2040 = vrot.lane.b32.xlu1 %v8907_v23, %s8405_s15  ;;  %2038 = vrot.lane.b32.xlu0 %v8908_v9, %s8405_s15  ;;  %v776_v39 = vadd.f32 %v772_v2, %v5844_v31  ;;  %v777_v35 = vadd.f32 %v773_v22, %v5853_v25  ;;  %v1340_v33 = vsel %vm490_vm9, %v1335_v44, %v1337_v32  ;;  %v8922_v2 = vstv %s5931_s6  ;;  %v8923_v9 = vld [vmem:[#allocation140_spill] sm:$0xff]  ;;  %s8931_s6 = sld [smem:[#allocation100_spill]] }
 0x1d5   : > { %v1341_v46 = vsel %vm490_vm9, %v1337_v32, %v1339_v16  ;;  %v8912_v40 = vrot.slane %v8911_v55, %v4103_v12  ;;  %v1365_v59 = vrot.slane %v6114_v21, %v4103_v12  ;;  %v8919_v6 = vrot.slane %v8906_v38, %v4106_v13  ;;  %v875_v32 = vpop.permute.xlu1 %874 }
 0x1d6   : > { %v782_v25 = vadd.f32 %v5995_v62, %v776_v39  ;;  %v783_v44 = vadd.f32 %v6058_v60, %v777_v35  ;;  %v6358_v22 = vmul.f32 %v8922_v2, %v5608_v50  ;;  %v1250_v45 = vadd.f32 %v8923_v9, %v1244_v19  ;;  %v873_v38 = vpop.permute.xlu0 %872 }
 0x1d7   : > { %v1251_v62 = vadd.f32 %v5485_v4, %v1245_v47  ;;  %v1344_v60 = vadd.f32 %v1340_v33, %v5263_v27  ;;  %v1345_v16 = vadd.f32 %v1341_v46, %v8924_v1  ;;  %v8925_v39 = vstv %s8913_s26 }
 0x1d8   : > { %2144 = vrot.lane.b32.xlu1 %v8912_v40, %s8405_s15  ;;  %2042 = vrot.lane.b32.xlu0 %v8919_v6, %s8405_s15  ;;  %v2174_v35 = vmul.f32 %v8925_v39, %v782_v25  ;;  %v8926_v40 = vstv %s8914_s20  ;;  %v8927_v31 = vstv %s8915_s17  ;;  %v8934_v46 = vrot.slane %v8911_v55, %v4106_v13 }
 0x1d9   : > { %v2332_v6 = vmul.f32 %v8926_v40, %v782_v25  ;;  %v2453_v51 = vmul.f32 %v8927_v31, %v782_v25  ;;  %v8928_v3 = vstv %s8916_s27  ;;  %v8929_v2 = vstv %s8917_s22 }
 0x1da   : > { %v2611_v26 = vmul.f32 %v8928_v3, %v782_v25  ;;  %v2769_v10 = vmul.f32 %v8929_v2, %v782_v25  ;;  %v8930_v23 = vstv %s8918_s19  ;;  %v8932_v4 = vstv %s8920_s1 }
 0x1db   : > { %v2884_v19 = vmul.f32 %v8930_v23, %v782_v25  ;;  %v3042_v27 = vmul.f32 %v8932_v4, %v782_v25  ;;  %v8933_v47 = vstv %s8921_s23  ;;  %v6385_v3 = vadd.f32 %v2174_v35, %v6240_v53 }
 0x1dc   : > { %v3200_v33 = vmul.f32 %v8933_v47, %v782_v25  ;;  %2148 = vrot.lane.b32.xlu1 %v8934_v46, %s8405_s15  ;;  %v6388_v31 = vadd.f32 %v2332_v6, %v6242_v29  ;;  %v6391_v23 = vadd.f32 %v2453_v51, %v6244_v30  ;;  %v6394_v9 = vadd.f32 %v2611_v26, %v6246_v5  ;;  %v1441_v51 = vpop.permute.xlu1 %1440  ;;  %v877_v5 = vpop.permute.xlu0 %876 }
 0x1dd   : > { %v8935_v1 = vrot.slane %v8911_v55, %v4113_v14  ;;  %v6401_v53 = vadd.f32 %v2769_v10, %v6250_v49  ;;  %v6404_v39 = vadd.f32 %v2884_v19, %v6252_v36  ;;  %v6407_v29 = vadd.f32 %v3042_v27, %v6254_v7 }
 0x1de   : > { %v6410_v30 = vadd.f32 %v3200_v33, %v6256_v18  ;;  %v8936_v26 = vstv %s8931_s6  ;;  %v8937_v40 = vstv %s8913_s26  ;;  %v8938_v55 = vstv %s8914_s20  ;;  %s8949_s26 = sld [smem:[#allocation106_spill]] }
 0x1df   : > { %2146 = vrot.lane.b32.xlu0 %v8935_v1, %s8405_s15  ;;  %v3321_v35 = vmul.f32 %v8936_v26, %v782_v25  ;;  %v2175_v6 = vmul.f32 %v8937_v40, %v783_v44  ;;  %v2333_v2 = vmul.f32 %v8938_v55, %v783_v44  ;;  %v8939_v4 = vstv %s8915_s17  ;;  %s8950_s20 = sld [smem:[#allocation108_spill]] }
 0x1e0   : > { %v2454_v49 = vmul.f32 %v8939_v4, %v783_v44  ;;  %v8940_v10 = vstv %s8916_s27  ;;  %v8941_v19 = vstv %s8917_s22  ;;  %v8942_v27 = vstv %s8918_s19  ;;  %s8952_s17 = sld [smem:[#allocation111_spill]] }
 0x1e1   : > { %v2612_v36 = vmul.f32 %v8940_v10, %v783_v44  ;;  %v2770_v7 = vmul.f32 %v8941_v19, %v783_v44  ;;  %v2885_v47 = vmul.f32 %v8942_v27, %v783_v44  ;;  %v8943_v18 = vstv %s8920_s1  ;;  %v8947_v10 = vld [vmem:[#allocation143_spill] sm:$0xff]  ;;  %s8954_s27 = sld [smem:[#allocation113_spill]] }
 0x1e2   : > { %v3043_v33 = vmul.f32 %v8943_v18, %v783_v44  ;;  %v6429_v46 = vadd.f32 %v3321_v35, %v6286_v56  ;;  %v6432_v25 = vadd.f32 %v2175_v6, %v6289_v11  ;;  %v6435_v1 = vadd.f32 %v2333_v2, %v6292_v52  ;;  %v1445_v11 = vpop.permute.xlu1 %1444  ;;  %v1443_v35 = vpop.permute.xlu0 %1442  ;;  %s8956_s22 = sld [smem:[#allocation114_spill]]  ;;  %v8959_v18 = vld [vmem:[#allocation144_spill] sm:$0xff] }
 0x1e3   : > { %v6438_v26 = vadd.f32 %v2454_v49, %v6295_v37  ;;  %v6441_v40 = vadd.f32 %v2612_v36, %v6298_v41  ;;  %v6444_v55 = vadd.f32 %v2770_v7, %v6301_v48  ;;  %v6447_v4 = vadd.f32 %v2885_v47, %v6304_v28  ;;  %v8946_v49 = vld [vmem:[#allocation142_spill] sm:$0xff]  ;;  %s8958_s19 = sld [smem:[#allocation115_spill]] }
 0x1e4   : > { %v6450_v56 = vadd.f32 %v3043_v33, %v6306_v54  ;;  %v8944_v6 = vstv %s8921_s23  ;;  %v8945_v2 = vstv %s8931_s6  ;;  %v1350_v41 = vadd.f32 %v8946_v49, %v1344_v60  ;;  %s8960_s1 = sld [smem:[#allocation119_spill]] }
 0x1e5   : > { %v3201_v52 = vmul.f32 %v8944_v6, %v783_v44  ;;  %v3322_v37 = vmul.f32 %v8945_v2, %v783_v44  ;;  %v1351_v36 = vadd.f32 %v8947_v10, %v1345_v16  ;;  %v878_v48 = vsel %vm559_vm13, %v873_v38, %v875_v32  ;;  %s8983_s23 = sld [smem:[#allocation19_spill]] }
 0x1e6   : > { %v879_v28 = vsel %vm559_vm13, %v875_v32, %v877_v5  ;;  %v1446_v19 = vsel %vm490_vm9, %v1441_v51, %v1443_v35  ;;  %v1447_v54 = vsel %vm490_vm9, %v1443_v35, %v1445_v11  ;;  %v882_v44 = vadd.f32 %v878_v48, %v5856_v8  ;;  %v981_v16 = vpop.permute.xlu1 %980  ;;  %v979_v38 = vpop.permute.xlu0 %978  ;;  %v8961_v35 = vld [vmem:[#allocation145_spill] sm:$0xff]  ;;  %s8984_s6 = sld [smem:[#allocation22_spill]] }
 0x1e7   : > { %v6463_v7 = vadd.f32 %v3201_v52, %v6327_v42  ;;  %v6466_v27 = vadd.f32 %v3322_v37, %v6330_v20  ;;  %v883_v60 = vadd.f32 %v879_v28, %v5858_v24  ;;  %v8951_v32 = vrot.slane %v5657_v34, %v4103_v12  ;;  %v8962_v52 = vld [vmem:[#allocation146_spill] sm:$0xff] }
 0x1e8   : > { %v8953_v42 = vrot.slane %v5657_v34, %v4113_v14  ;;  %v8955_v5 = vstv %s5947_s3  ;;  %v8957_v24 = vstv %s5977_s24  ;;  %v1356_v33 = vadd.f32 %v8959_v18, %v1350_v41  ;;  %s8967_s24 = sld [smem:[#allocation120_spill]] }
 0x1e9   : > { %v1266_v51 = vadd.f32 %v8951_v32, %v1250_v45  ;;  %v6479_v8 = vmul.f32 %v8955_v5, %v5766_v17  ;;  %v6484_v47 = vmul.f32 %v8957_v24, %v6007_v15  ;;  %v888_v45 = vadd.f32 %v6000_v0, %v882_v44  ;;  %s8982_s3 = sld [smem:[#allocation16_spill]]  ;;  %v9013_v15 = vld [vmem:[#allocation151_spill] sm:$0xff] }
 0x1ea   : > { %v1267_v20 = vadd.f32 %v8953_v42, %v1251_v62  ;;  %v889_v11 = vadd.f32 %v6068_v43, %v883_v60  ;;  %v984_v34 = vsel %vm559_vm13, %v979_v38, %v981_v16  ;;  %v6491_v62 = vadd.f32 %v5490_v57, %v1351_v36  ;;  %v1547_v42 = vpop.permute.xlu1 %1546  ;;  %v983_v5 = vpop.permute.xlu0 %982 }
 0x1eb   : > { %v6494_v6 = vadd.f32 %v1446_v19, %v8961_v35  ;;  %v6497_v2 = vadd.f32 %v1447_v54, %v8962_v52  ;;  %v988_v37 = vadd.f32 %v984_v34, %v5874_v63  ;;  %v8963_v49 = vstv %s8948_s0 }
 0x1ec   : > { %v2180_v10 = vmul.f32 %v8963_v49, %v888_v45  ;;  %v8964_v41 = vstv %s8949_s26  ;;  %v8965_v0 = vstv %s8950_s20  ;;  %v8966_v43 = vstv %s8952_s17 }
 0x1ed   : > { %v2338_v48 = vmul.f32 %v8964_v41, %v888_v45  ;;  %v2459_v28 = vmul.f32 %v8965_v0, %v888_v45  ;;  %v2617_v44 = vmul.f32 %v8966_v43, %v888_v45  ;;  %v8968_v60 = vstv %s8954_s27 }
 0x1ee   : > { %v2775_v57 = vmul.f32 %v8968_v60, %v888_v45  ;;  %v8969_v36 = vstv %s8956_s22  ;;  %v8970_v38 = vstv %s8958_s19  ;;  %v8971_v32 = vstv %s8960_s1 }
 0x1ef   : > { %v2890_v19 = vmul.f32 %v8969_v36, %v888_v45  ;;  %v3048_v54 = vmul.f32 %v8970_v38, %v888_v45  ;;  %v3206_v63 = vmul.f32 %v8971_v32, %v888_v45  ;;  %v2182_v24 = vadd.f32 %v2180_v10, %v6385_v3 }
 0x1f0   : > { %v2340_v18 = vadd.f32 %v2338_v48, %v6388_v31  ;;  %v2461_v34 = vadd.f32 %v2459_v28, %v6391_v23  ;;  %v2619_v35 = vadd.f32 %v2617_v44, %v6394_v9  ;;  %v2777_v52 = vadd.f32 %v2775_v57, %v6401_v53  ;;  %v1551_v57 = vpop.permute.xlu1 %1550 }
 0x1f1   : > { %v2892_v49 = vadd.f32 %v2890_v19, %v6404_v39  ;;  %v3050_v41 = vadd.f32 %v3048_v54, %v6407_v29  ;;  %v3208_v0 = vadd.f32 %v3206_v63, %v6410_v30  ;;  %v8972_v43 = vstv %s8967_s24  ;;  %v1549_v30 = vpop.permute.xlu0 %1548 }
 0x1f2   : > { %v3327_v60 = vmul.f32 %v8972_v43, %v888_v45  ;;  %v8973_v36 = vstv %s8948_s0  ;;  %v8974_v32 = vstv %s8949_s26  ;;  %v8975_v10 = vstv %s8950_s20  ;;  %s8986_s0 = sld [smem:[#allocation25_spill]] }
 0x1f3   : > { %v2181_v38 = vmul.f32 %v8973_v36, %v889_v11  ;;  %v2339_v3 = vmul.f32 %v8974_v32, %v889_v11  ;;  %v2460_v31 = vmul.f32 %v8975_v10, %v889_v11  ;;  %v8976_v23 = vstv %s8952_s17  ;;  %s8994_s26 = sld [smem:[#allocation28_spill]] }
 0x1f4   : > { %v2618_v9 = vmul.f32 %v8976_v23, %v889_v11  ;;  %v8977_v48 = vstv %s8954_s27  ;;  %v8978_v28 = vstv %s8956_s22  ;;  %v8979_v44 = vstv %s8958_s19  ;;  %s9089_s20 = sld [smem:[#allocation30_spill]] }
 0x1f5   : > { %v2776_v53 = vmul.f32 %v8977_v48, %v889_v11  ;;  %v2891_v39 = vmul.f32 %v8978_v28, %v889_v11  ;;  %v3049_v29 = vmul.f32 %v8979_v44, %v889_v11  ;;  %v3329_v45 = vadd.f32 %v3327_v60, %v6429_v46  ;;  %v1087_v60 = vpop.permute.xlu1 %1086  ;;  %s9090_s17 = sld [smem:[#allocation34_spill]] }
 0x1f6   : > { %v2183_v19 = vadd.f32 %v2181_v38, %v6432_v25  ;;  %v2341_v54 = vadd.f32 %v2339_v3, %v6435_v1  ;;  %v2462_v63 = vadd.f32 %v2460_v31, %v6438_v26  ;;  %v2620_v43 = vadd.f32 %v2618_v9, %v6441_v40  ;;  %v8985_v26 = vld [vmem:[#allocation134_spill] sm:$0xff]  ;;  %s9091_s27 = sld [smem:[#allocation36_spill]] }
 0x1f7   : > { %v2778_v36 = vadd.f32 %v2776_v53, %v6444_v55  ;;  %v2893_v32 = vadd.f32 %v2891_v39, %v6447_v4  ;;  %v3051_v10 = vadd.f32 %v3049_v29, %v6450_v56  ;;  %v8980_v23 = vstv %s8960_s1  ;;  %s9092_s22 = sld [smem:[#allocation37_spill]] }
 0x1f8   : > { %v3207_v48 = vmul.f32 %v8980_v23, %v889_v11  ;;  %v8981_v28 = vstv %s8967_s24  ;;  %v1272_v25 = vadd.f32 %v5753_v61, %v1266_v51  ;;  %v6554_v1 = vadd.f32 %v5937_v58, %v1267_v20  ;;  %v8987_v51 = vld [vmem:[#allocation129_spill] sm:$0xff]  ;;  %s9094_s19 = sld [smem:[#allocation38_spill]] }
 0x1f9   : > { %v3328_v46 = vmul.f32 %v8981_v28, %v889_v11  ;;  %v994_v40 = vadd.f32 %v8985_v26, %v988_v37  ;;  %v985_v55 = vsel %vm559_vm13, %v981_v16, %v983_v5  ;;  %v1552_v4 = vsel %vm490_vm9, %v1547_v42, %v1549_v30  ;;  %v1085_v11 = vpop.permute.xlu0 %1084  ;;  %s9101_s1 = sld [smem:[#allocation39_spill]] }
 0x1fa   : > { %v1553_v56 = vsel %vm490_vm9, %v1549_v30, %v1551_v57  ;;  %v3209_v38 = vadd.f32 %v3207_v48, %v6463_v7  ;;  %v989_v58 = vadd.f32 %v985_v55, %v8987_v51  ;;  %v6566_v20 = vadd.f32 %v1365_v59, %v1356_v33  ;;  %s6836_s24 = sld [smem:[#allocation4 + $0x80]] }
 0x1fb   : > { %v3330_v61 = vadd.f32 %v3328_v46, %v6466_v27  ;;  %v8988_v37 = vstv %s5025_s10  ;;  %v8989_v5 = vstv %s5053_s9  ;;  %v8990_v42 = vstv %s8982_s3  ;;  %v1653_v46 = vpop.permute.xlu1 %1652 }
 0x1fc   : > { %v2186_v16 = vmul.f32 %v8988_v37, %v994_v40  ;;  %v2344_v3 = vmul.f32 %v8989_v5, %v994_v40  ;;  %v2465_v31 = vmul.f32 %v8990_v42, %v994_v40  ;;  %v8991_v9 = vstv %s8983_s23 }
 0x1fd   : > { %v2623_v53 = vmul.f32 %v8991_v9, %v994_v40  ;;  %v8992_v39 = vstv %s8984_s6  ;;  %v8993_v7 = vstv %s5145_s28  ;;  %v8995_v29 = vstv %s5167_s5  ;;  %v1089_v26 = vpop.permute.xlu0 %1088  ;;  %v9002_v9 = vld [vmem:[#allocation126_spill] sm:$0xff] }
 0x1fe   : > { %v2781_v44 = vmul.f32 %v8992_v39, %v994_v40  ;;  %v2896_v27 = vmul.f32 %v8993_v7, %v994_v40  ;;  %v3054_v57 = vmul.f32 %v8995_v29, %v994_v40  ;;  %v8996_v30 = vstv %s8986_s0 }
 0x1ff   : > { %v3212_v23 = vmul.f32 %v8996_v30, %v994_v40  ;;  %v6584_v48 = vadd.f32 %v2186_v16, %v2182_v24  ;;  %v6586_v59 = vadd.f32 %v2344_v3, %v2340_v18  ;;  %v6588_v33 = vadd.f32 %v2465_v31, %v2461_v34  ;;  %v8997_v18 = vld [vmem:[#allocation147_spill] sm:$0xff]  ;;  %v1657_v29 = vpop.permute.xlu1 %1656 }
 0x200   : > { %v6590_v28 = vadd.f32 %v2623_v53, %v2619_v35  ;;  %v6592_v55 = vadd.f32 %v2781_v44, %v2777_v52  ;;  %v6594_v51 = vadd.f32 %v2896_v27, %v2892_v49  ;;  %v6596_v37 = vadd.f32 %v3054_v57, %v3050_v41  ;;  %v8998_v35 = vld [vmem:[#allocation148_spill] sm:$0xff]  ;;  %v9001_v49 = vld [vmem:[#allocation150_spill] sm:$0xff] }
 0x201   : > { %v6598_v24 = vadd.f32 %v3212_v23, %v3208_v0  ;;  %v1456_v34 = vadd.f32 %v8997_v18, %v6494_v6  ;;  %v1457_v16 = vadd.f32 %v8998_v35, %v6497_v2  ;;  %v8999_v5 = vstv %s8994_s26  ;;  %v9000_v52 = vld [vmem:[#allocation99_spill] sm:$0xff] }
 0x202   : > { %v3333_v3 = vmul.f32 %v8999_v5, %v994_v40  ;;  %v995_v42 = vadd.f32 %v9000_v52, %v989_v58  ;;  %v1556_v31 = vadd.f32 %v1552_v4, %v9001_v49  ;;  %v1090_v41 = vsel %vm559_vm13, %v1085_v11, %v1087_v60  ;;  %v1655_v58 = vpop.permute.xlu0 %1654 }
 0x203   : > { %v1091_v0 = vsel %vm559_vm13, %v1087_v60, %v1089_v26  ;;  %v6611_v53 = vadd.f32 %v9002_v9, %v1272_v25  ;;  %v9003_v39 = vstv %s5025_s10  ;;  %v9004_v2 = vstv %s5053_s9  ;;  %v6639_v17 = vpop.permute.xlu1 %1192  ;;  %s9017_s9 = sld [smem:[#allocation31_spill]] }
 0x204   : > { %v6613_v6 = vadd.f32 %v3333_v3, %v3329_v45  ;;  %v2187_v44 = vmul.f32 %v9003_v39, %v995_v42  ;;  %v2345_v7 = vmul.f32 %v9004_v2, %v995_v42  ;;  %v9005_v27 = vstv %s8982_s3  ;;  %v9011_v2 = vld [vmem:[#allocation149_spill] sm:$0xff]  ;;  %s9055_s10 = sld [smem:[#allocation33_spill]] }
 0x205   : > { %v2466_v40 = vmul.f32 %v9005_v27, %v995_v42  ;;  %v9006_v4 = vstv %s8983_s23  ;;  %v9007_v11 = vstv %s8984_s6  ;;  %v9008_v23 = vstv %s5145_s28  ;;  %s9021_s28 = sld [smem:[#allocation17_spill]] }
 0x206   : > { %v2624_v57 = vmul.f32 %v9006_v4, %v995_v42  ;;  %v2782_v30 = vmul.f32 %v9007_v11, %v995_v42  ;;  %v2897_v60 = vmul.f32 %v9008_v23, %v995_v42  ;;  %v9009_v26 = vstv %s5167_s5  ;;  %s9056_s5 = sld [smem:[#allocation35_spill]] }
 0x207   : > { %v3055_v25 = vmul.f32 %v9009_v26, %v995_v42  ;;  %v2189_v18 = vadd.f32 %v2187_v44, %v2183_v19  ;;  %v2347_v45 = vadd.f32 %v2345_v7, %v2341_v54  ;;  %v2468_v35 = vadd.f32 %v2466_v40, %v2462_v63  ;;  %v1191_v19 = vpop.permute.xlu0 %1190  ;;  %v9014_v54 = vld [vmem:[#allocation130_spill] sm:$0xff]  ;;  %v9015_v44 = vld [vmem:[#allocation136_spill] sm:$0xff]  ;;  %s9115_s3 = sld [smem:[#allocation40_spill]] }
 0x208   : > { %v9010_v5 = vstv %s8986_s0  ;;  %v2626_v52 = vadd.f32 %v2624_v57, %v2620_v43  ;;  %v2784_v49 = vadd.f32 %v2782_v30, %v2778_v36  ;;  %v2899_v9 = vadd.f32 %v2897_v60, %v2893_v32  ;;  %v9016_v32 = vld [vmem:[#allocation158_spill] sm:$0xff]  ;;  %v9025_v57 = vld [vmem:[#allocation156_spill] sm:$0xff]  ;;  %v9026_v60 = vld [vmem:[#allocation157_spill] sm:$0xff]  ;;  %s6873_s23 = sld [smem:[#allocation4 + $0x81]] }
 0x209   : > { %v3213_v3 = vmul.f32 %v9010_v5, %v995_v42  ;;  %v3057_v39 = vadd.f32 %v3055_v25, %v3051_v10  ;;  %v6632_v27 = vadd.f32 %v9011_v2, %v1456_v34  ;;  %v9012_v4 = vstv %s8994_s26  ;;  %v9018_v34 = vld [vmem:[#allocation152_spill] sm:$0xff]  ;;  %v6663_v5 = vpop.permute.xlu1 %1758  ;;  %s9117_s6 = sld [smem:[#allocation43_spill]] }
 0x20a   : > { %v3334_v11 = vmul.f32 %v9012_v4, %v995_v42  ;;  %v1557_v23 = vadd.f32 %v1553_v56, %v9013_v15  ;;  %v1094_v63 = vadd.f32 %v1090_v41, %v9014_v54  ;;  %v1095_v7 = vadd.f32 %v1091_v0, %v9015_v44  ;;  %v9019_v56 = vld [vmem:[#allocation133_spill] sm:$0xff]  ;;  %v9020_v41 = vld [vmem:[#allocation135_spill] sm:$0xff]  ;;  %v9027_v26 = vld [vmem:[#allocation176_spill] sm:$0xff]  ;;  %s9119_s0 = sld [smem:[#allocation48_spill]] }
 0x20b   : > { %v6634_v13 = vadd.f32 %v3213_v3, %v3209_v38  ;;  %v1658_v43 = vsel %vm490_vm9, %v1653_v46, %v1655_v58  ;;  %v1659_v36 = vsel %vm490_vm9, %v1655_v58, %v1657_v29  ;;  %v6646_v10 = vadd.f32 %v9016_v32, %v1457_v16  ;;  %v9022_v0 = vld [vmem:[#allocation175_spill] sm:$0xff]  ;;  %v9024_v58 = vld [vmem:[#allocation153_spill] sm:$0xff]  ;;  %v1195_v3 = vpop.permute.xlu0 %1194  ;;  %s9121_s26 = sld [smem:[#allocation49_spill]] }
 0x20c   : > { %v3336_v38 = vadd.f32 %v3334_v11, %v3330_v61  ;;  %v1562_v15 = vadd.f32 %v9018_v34, %v1556_v31  ;;  %v6651_v42 = vadd.f32 %v9019_v56, %v6554_v1  ;;  %v1100_v46 = vadd.f32 %v9020_v41, %v1094_v63  ;;  %v9023_v61 = vld [vmem:[#allocation180_spill] sm:$0xff] }
 0x20d   : > { %v1101_v40 = vadd.f32 %v9022_v0, %v1095_v7  ;;  %v1196_v16 = vsel %vm559_vm13, %v1191_v19, %v6639_v17  ;;  %v1378_v29 = vadd.f32 %v9023_v61, %v6566_v20  ;;  %v1563_v31 = vadd.f32 %v9024_v58, %v1557_v23 }
 0x20e   : > { %v1662_v30 = vadd.f32 %v1658_v43, %v9025_v57  ;;  %v1663_v1 = vadd.f32 %v1659_v36, %v9026_v60  ;;  %v1200_v25 = vadd.f32 %v1196_v16, %v9027_v26  ;;  %v9028_v2 = vstv %s5225_s7 }
 0x20f   : > { %v2192_v4 = vmul.f32 %v9028_v2, %v1100_v46  ;;  %v9029_v11 = vstv %s9017_s9  ;;  %v9030_v63 = vstv %s5265_s12  ;;  %v9031_v44 = vstv %s5283_s30 }
 0x210   : > { %v2350_v54 = vmul.f32 %v9029_v11, %v1100_v46  ;;  %v2471_v19 = vmul.f32 %v9030_v63, %v1100_v46  ;;  %v2629_v20 = vmul.f32 %v9031_v44, %v1100_v46  ;;  %v9032_v7 = vstv %s5300_s16  ;;  %v1763_v11 = vpop.permute.xlu1 %1762  ;;  %v1761_v63 = vpop.permute.xlu0 %1760 }
 0x211   : > { %v2787_v23 = vmul.f32 %v9032_v7, %v1100_v46  ;;  %v9033_v43 = vstv %s9021_s28  ;;  %v9034_v32 = vstv %s5352_s13  ;;  %v9035_v56 = vstv %s5391_s4  ;;  %s9051_s13 = sld [smem:[#allocation26_spill]] }
 0x212   : > { %v2902_v36 = vmul.f32 %v9033_v43, %v1100_v46  ;;  %v3060_v34 = vmul.f32 %v9034_v32, %v1100_v46  ;;  %v3218_v41 = vmul.f32 %v9035_v56, %v1100_v46  ;;  %v2194_v0 = vadd.f32 %v2192_v4, %v6584_v48 }
 0x213   : > { %v2352_v16 = vadd.f32 %v2350_v54, %v6586_v59  ;;  %v2473_v61 = vadd.f32 %v2471_v19, %v6588_v33  ;;  %v2631_v58 = vadd.f32 %v2629_v20, %v6590_v28  ;;  %v2789_v57 = vadd.f32 %v2787_v23, %v6592_v55 }
 0x214   : > { %v2904_v60 = vadd.f32 %v2902_v36, %v6594_v51  ;;  %v3062_v26 = vadd.f32 %v3060_v34, %v6596_v37  ;;  %v3220_v2 = vadd.f32 %v3218_v41, %v6598_v24  ;;  %v9036_v44 = vstv %s5408_s2 }
 0x215   : > { %v3339_v48 = vmul.f32 %v9036_v44, %v1100_v46  ;;  %v9037_v4 = vstv %s5225_s7  ;;  %v9038_v59 = vstv %s9017_s9  ;;  %v9039_v43 = vstv %s5265_s12  ;;  %s9046_s7 = sld [smem:[#allocation23_spill]] }
 0x216   : > { %v2193_v7 = vmul.f32 %v9037_v4, %v1101_v40  ;;  %v2351_v54 = vmul.f32 %v9038_v59, %v1101_v40  ;;  %v2472_v33 = vmul.f32 %v9039_v43, %v1101_v40  ;;  %v9040_v19 = vstv %s5283_s30  ;;  %v1299_v59 = vpop.permute.xlu1 %1298  ;;  %s9044_s30 = sld [smem:[#allocation20_spill]]  ;;  %v1297_v43 = vpop.permute.xlu0 %1296 }
 0x217   : > { %v2630_v28 = vmul.f32 %v9040_v19, %v1101_v40  ;;  %v9041_v20 = vstv %s5300_s16  ;;  %v9042_v51 = vstv %s9021_s28  ;;  %v9043_v23 = vmov %v9034_v32  ;;  %v9045_v19 = vld [vmem:[#allocation154_spill] sm:$0xff]  ;;  %s9053_s12 = sld [smem:[#allocation29_spill]] }
 0x218   : > { %v2788_v55 = vmul.f32 %v9041_v20, %v1101_v40  ;;  %v2903_v37 = vmul.f32 %v9042_v51, %v1101_v40  ;;  %v3061_v24 = vmul.f32 %v9043_v23, %v1101_v40  ;;  %v3341_v36 = vadd.f32 %v3339_v48, %v6613_v6  ;;  %v9047_v51 = vld [vmem:[#allocation159_spill] sm:$0xff]  ;;  %s9064_s16 = sld [smem:[#allocation18_spill]] }
 0x219   : > { %v2195_v32 = vadd.f32 %v2193_v7, %v2189_v18  ;;  %v2353_v46 = vadd.f32 %v2351_v54, %v2347_v45  ;;  %v2474_v34 = vadd.f32 %v2472_v33, %v2468_v35  ;;  %v2632_v56 = vadd.f32 %v2630_v28, %v2626_v52  ;;  %v9052_v52 = vld [vmem:[#allocation160_spill] sm:$0xff]  ;;  %v9058_v33 = vld [vmem:[#allocation161_spill] sm:$0xff]  ;;  %s6892_s9 = sld [smem:[#allocation4 + $0x87]] }
 0x21a   : > { %v2790_v41 = vadd.f32 %v2788_v55, %v2784_v49  ;;  %v2905_v44 = vadd.f32 %v2903_v37, %v2899_v9  ;;  %v3063_v4 = vadd.f32 %v3061_v24, %v3057_v39  ;;  %v6707_v20 = vadd.f32 %v9045_v19, %v1562_v15  ;;  %v9054_v9 = vld [vmem:[#allocation121_spill] sm:$0xff]  ;;  %v9059_v55 = vld [vmem:[#allocation178_spill] sm:$0xff]  ;;  %s6901_s28 = sld [smem:[#allocation4 + $0x55]] }
 0x21b   : > { %v6710_v23 = vadd.f32 %v9047_v51, %v1563_v31  ;;  %v9049_v6 = vstv %s5391_s4  ;;  %v9050_v45 = vstv %s5408_s2  ;;  %v1668_v49 = vadd.f32 %v9052_v52, %v1662_v30  ;;  %v9057_v15 = vld [vmem:[#allocation181_spill] sm:$0xff]  ;;  %s6781_s4 = sld [smem:[#allocation4 + $0x7e]] }
 0x21c   : > { %v3219_v18 = vmul.f32 %v9049_v6, %v1101_v40  ;;  %v3340_v35 = vmul.f32 %v9050_v45, %v1101_v40  ;;  %v1206_v39 = vadd.f32 %v9054_v9, %v1200_v25  ;;  %v1197_v48 = vsel %vm559_vm13, %v6639_v17, %v1195_v3  ;;  %v1865_v17 = vpop.permute.xlu1 %1864  ;;  %v1301_v3 = vpop.permute.xlu0 %1300  ;;  %s9087_s2 = sld [smem:[#allocation27_spill]] }
 0x21d   : > { %9048 = vst [vmem:[#allocation102_spill] sm:$0xff] %v6710_v23  ;;  %v6721_v7 = vadd.f32 %v9057_v15, %v1378_v29  ;;  %v1669_v28 = vadd.f32 %v9058_v33, %v1663_v1  ;;  %v1201_v40 = vadd.f32 %v1197_v48, %v9059_v55  ;;  %v9060_v37 = vstv %s5418_s14 }
 0x21e   : > { %v3221_v31 = vadd.f32 %v3219_v18, %v6634_v13  ;;  %v3342_v54 = vadd.f32 %v3340_v35, %v3336_v38  ;;  %v2198_v24 = vmul.f32 %v9060_v37, %v1206_v39  ;;  %v9061_v30 = vstv %s5434_s18 }
 0x21f   : > { %v2356_v19 = vmul.f32 %v9061_v30, %v1206_v39  ;;  %v9062_v51 = vstv %s9044_s30  ;;  %v9063_v6 = vstv %s9046_s7  ;;  %v9065_v29 = vstv %s9051_s13 }
 0x220   : > { %v2477_v25 = vmul.f32 %v9062_v51, %v1206_v39  ;;  %v2635_v45 = vmul.f32 %v9063_v6, %v1206_v39  ;;  %v2793_v52 = vmul.f32 %v9065_v29, %v1206_v39  ;;  %v9066_v9 = vstv %s9053_s12  ;;  %v9069_v29 = vld [vmem:[#allocation162_spill] sm:$0xff] }
 0x221   : > { %v2908_v13 = vmul.f32 %v9066_v9, %v1206_v39  ;;  %v9067_v38 = vstv %s9055_s10  ;;  %v9068_v1 = vstv %s9056_s5  ;;  %v6742_v48 = vadd.f32 %v2198_v24, %v2194_v0 }
 0x222   : > { %v3066_v18 = vmul.f32 %v9067_v38, %v1206_v39  ;;  %v3224_v35 = vmul.f32 %v9068_v1, %v1206_v39  ;;  %v6744_v15 = vadd.f32 %v2356_v19, %v2352_v16  ;;  %v6746_v33 = vadd.f32 %v2477_v25, %v2473_v61  ;;  %v1867_v19 = vpop.permute.xlu0 %1866 }
 0x223   : > { %v6748_v55 = vadd.f32 %v2635_v45, %v2631_v58  ;;  %v6750_v37 = vadd.f32 %v2793_v52, %v2789_v57  ;;  %v6752_v30 = vadd.f32 %v2908_v13, %v2904_v60  ;;  %v6759_v0 = vadd.f32 %v9069_v29, %v1668_v49  ;;  %v9072_v58 = vld [vmem:[#allocation177_spill] sm:$0xff]  ;;  %v1869_v57 = vpop.permute.xlu1 %1868 }
 0x224   : > { %v6754_v51 = vadd.f32 %v3066_v18, %v3062_v26  ;;  %v6756_v6 = vadd.f32 %v3224_v35, %v3220_v2  ;;  %v9071_v16 = vstv %s9064_s16  ;;  %v1207_v24 = vadd.f32 %v9072_v58, %v1201_v40 }
 0x225   : > { %9070 = vst [vmem:[#allocation107_spill] sm:$0xff] %v6759_v0  ;;  %v3345_v61 = vmul.f32 %v9071_v16, %v1206_v39  ;;  %v9073_v60 = vrot.slane %v6114_v21, %v4113_v14  ;;  %v1764_v2 = vsel %vm490_vm9, %v6663_v5, %v1761_v63  ;;  %v1765_v49 = vsel %vm490_vm9, %v1761_v63, %v1763_v11 }
 0x226   : > { %v1302_v25 = vsel %vm559_vm13, %v1297_v43, %v1299_v59  ;;  %v1303_v39 = vsel %vm559_vm13, %v1299_v59, %v1301_v3  ;;  %v9074_v40 = vstv %s5418_s14  ;;  %v9075_v9 = vstv %s5434_s18  ;;  %s9085_s14 = sld [smem:[#allocation21_spill]] }
 0x227   : > { %v1373_v26 = vadd.f32 %v9073_v60, %v6491_v62  ;;  %v6773_v45 = vadd.f32 %v3345_v61, %v3341_v36  ;;  %v2199_v52 = vmul.f32 %v9074_v40, %v1207_v24  ;;  %v2357_v13 = vmul.f32 %v9075_v9, %v1207_v24  ;;  %v1403_v61 = vpop.permute.xlu0 %1402  ;;  %s9086_s18 = sld [smem:[#allocation24_spill]] }
 0x228   : > { %v9076_v38 = vstv %s9044_s30  ;;  %v9077_v21 = vstv %s9046_s7  ;;  %v9078_v5 = vstv %s9051_s13  ;;  %v9079_v11 = vstv %s9053_s12  ;;  %s6911_s30 = sld [smem:[#allocation4 + $0x56]] }
 0x229   : > { %v2478_v18 = vmul.f32 %v9076_v38, %v1207_v24  ;;  %v2636_v62 = vmul.f32 %v9077_v21, %v1207_v24  ;;  %v2794_v1 = vmul.f32 %v9078_v5, %v1207_v24  ;;  %v2909_v63 = vmul.f32 %v9079_v11, %v1207_v24  ;;  %v1405_v38 = vpop.permute.xlu1 %1404  ;;  %s6921_s7 = sld [smem:[#allocation4 + $0x57]] }
 0x22a   : > { %v9080_v43 = vstv %s9055_s10  ;;  %v2201_v59 = vadd.f32 %v2199_v52, %v2195_v32  ;;  %v2359_v36 = vadd.f32 %v2357_v13, %v2353_v46  ;;  %v9081_v29 = vstv %s9056_s5  ;;  %v9084_v46 = vld [vmem:[#allocation164_spill] sm:$0xff]  ;;  %s6931_s13 = sld [smem:[#allocation4 + $0x59]] }
 0x22b   : > { %v3067_v35 = vmul.f32 %v9080_v43, %v1207_v24  ;;  %v2480_v3 = vadd.f32 %v2478_v18, %v2474_v34  ;;  %v3225_v16 = vmul.f32 %v9081_v29, %v1207_v24  ;;  %v2638_v58 = vadd.f32 %v2636_v62, %v2632_v56  ;;  %v9083_v43 = vld [vmem:[#allocation163_spill] sm:$0xff]  ;;  %s6941_s12 = sld [smem:[#allocation6 + $0x51]] }
 0x22c   : > { %v2796_v60 = vadd.f32 %v2794_v1, %v2790_v41  ;;  %v2911_v40 = vadd.f32 %v2909_v63, %v2905_v44  ;;  %v9082_v21 = vstv %s9064_s16  ;;  %v1870_v5 = vsel %vm490_vm9, %v1865_v17, %v1867_v19  ;;  %s6950_s10 = sld [smem:[#allocation6 + $0x52]] }
 0x22d   : > { %v3069_v9 = vadd.f32 %v3067_v35, %v3063_v4  ;;  %v6793_v0 = vadd.f32 %v3225_v16, %v3221_v31  ;;  %v3346_v23 = vmul.f32 %v9082_v21, %v1207_v24  ;;  %v1871_v11 = vsel %vm490_vm9, %v1867_v19, %v1869_v57  ;;  %v9088_v4 = vld [vmem:[#allocation165_spill] sm:$0xff]  ;;  %v1407_v24 = vpop.permute.xlu0 %1406  ;;  %v9093_v57 = vld [vmem:[#allocation95_spill] sm:$0xff]  ;;  %s6956_s5 = sld [smem:[#allocation6 + $0x53]] }
 0x22e   : > { %v6800_v32 = vadd.f32 %v9083_v43, %v1669_v28  ;;  %v1768_v34 = vadd.f32 %v1764_v2, %v9084_v46  ;;  %v1306_v56 = vadd.f32 %v1302_v25, %v6611_v53  ;;  %v1307_v41 = vadd.f32 %v1303_v39, %v6651_v42  ;;  %v9095_v53 = vld [vmem:[#allocation179_spill] sm:$0xff]  ;;  %s6966_s16 = sld [smem:[#allocation6 + $0x54]] }
 0x22f   : > { %v3348_v44 = vadd.f32 %v3346_v23, %v3342_v54  ;;  %v1769_v31 = vadd.f32 %v1765_v49, %v9088_v4  ;;  %v1408_v17 = vsel %vm559_vm13, %v1403_v61, %v1405_v38  ;;  %v1379_v28 = vadd.f32 %v6358_v22, %v1373_v26  ;;  %v9096_v25 = vld [vmem:[#allocation127_spill] sm:$0xff] }
 0x230   : > { %v1312_v19 = vadd.f32 %v9093_v57, %v1306_v56  ;;  %v1313_v2 = vadd.f32 %v9095_v53, %v1307_v41  ;;  %v1874_v42 = vadd.f32 %v1870_v5, %v9096_v25  ;;  %v9097_v39 = vld [vmem:[#allocation98_spill] sm:$0xff]  ;;  %v1412_v54 = vadd.f32 %v1408_v17, %v6721_v7 }
 0x231   : > { %v1875_v23 = vadd.f32 %v1871_v11, %v9097_v39  ;;  %v1385_v49 = vadd.f32 %v6479_v8, %v1379_v28  ;;  %v1409_v52 = vsel %vm559_vm13, %v1405_v38, %v1407_v24  ;;  %v1951_v13 = vstv %s6781_s4  ;;  %s6976_s4 = sld [smem:[#allocation6 + $0x55]] }
 0x232   : > { %v9098_v18 = vstv %s9085_s14  ;;  %v9099_v26 = vstv %s9086_s18  ;;  %v9100_v1 = vstv %s9087_s2  ;;  %v9102_v35 = vstv %s9089_s20  ;;  %s7038_s14 = sld [smem:[#allocation4 + $0x8a]] }
 0x233   : > { %v2204_v22 = vmul.f32 %v9098_v18, %v1312_v19  ;;  %v2362_v62 = vmul.f32 %v9099_v26, %v1312_v19  ;;  %v2483_v63 = vmul.f32 %v9100_v1, %v1312_v19  ;;  %v2641_v29 = vmul.f32 %v9102_v35, %v1312_v19  ;;  %s7047_s18 = sld [smem:[#allocation4 + $0x5e]] }
 0x234   : > { %v9103_v16 = vstv %s9090_s17  ;;  %v9104_v21 = vstv %s9091_s27  ;;  %v9105_v8 = vstv %s9092_s22  ;;  %v9106_v5 = vstv %s9094_s19  ;;  %s7063_s2 = sld [smem:[#allocation4 + $0x5f]] }
 0x235   : > { %v2799_v61 = vmul.f32 %v9103_v16, %v1312_v19  ;;  %v2914_v7 = vmul.f32 %v9104_v21, %v1312_v19  ;;  %v3072_v38 = vmul.f32 %v9105_v8, %v1312_v19  ;;  %v3230_v11 = vmul.f32 %v9106_v5, %v1312_v19  ;;  %s7078_s20 = sld [smem:[#allocation4 + $0x60]] }
 0x236   : > { %v2206_v43 = vadd.f32 %v2204_v22, %v6742_v48  ;;  %v2364_v46 = vadd.f32 %v2362_v62, %v6744_v15  ;;  %v2485_v56 = vadd.f32 %v2483_v63, %v6746_v33  ;;  %v2643_v41 = vadd.f32 %v2641_v29, %v6748_v55  ;;  %s7083_s17 = sld [smem:[#allocation4 + $0x62]] }
 0x237   : > { %v2801_v4 = vadd.f32 %v2799_v61, %v6750_v37  ;;  %v2916_v17 = vadd.f32 %v2914_v7, %v6752_v30  ;;  %v3074_v28 = vadd.f32 %v3072_v38, %v6754_v51  ;;  %v3232_v24 = vadd.f32 %v3230_v11, %v6756_v6  ;;  %v1971_v7 = vpop.permute.xlu1 %1970  ;;  %v9123_v38 = vld [vmem:[#allocation131_spill] sm:$0xff]  ;;  %s7092_s27 = sld [smem:[#allocation6 + $0x5a]] }
 0x238   : > { %v9107_v57 = vstv %s9101_s1  ;;  %v9108_v48 = vmov %v9098_v18  ;;  %v9109_v39 = vmov %v9099_v26  ;;  %v9110_v18 = vmov %v9100_v1  ;;  %s7101_s22 = sld [smem:[#allocation6 + $0x5b]] }
 0x239   : > { %v3351_v53 = vmul.f32 %v9107_v57, %v1312_v19  ;;  %v2205_v25 = vmul.f32 %v9108_v48, %v1313_v2  ;;  %v2363_v15 = vmul.f32 %v9109_v39, %v1313_v2  ;;  %v2484_v33 = vmul.f32 %v9110_v18, %v1313_v2  ;;  %s7106_s19 = sld [smem:[#allocation6 + $0x5c]] }
 0x23a   : > { %v9111_v22 = vmov %v9102_v35  ;;  %v9112_v26 = vmov %v9103_v16  ;;  %v9113_v37 = vmov %v9104_v21  ;;  %v9114_v1 = vmov %v9105_v8  ;;  %s7116_s1 = sld [smem:[#allocation6 + $0x5d]] }
 0x23b   : > { %v2642_v55 = vmul.f32 %v9111_v22, %v1313_v2  ;;  %v2800_v62 = vmul.f32 %v9112_v26, %v1313_v2  ;;  %v2915_v30 = vmul.f32 %v9113_v37, %v1313_v2  ;;  %v3073_v51 = vmul.f32 %v9114_v1, %v1313_v2  ;;  %v1973_v1 = vpop.permute.xlu0 %1972 }
 0x23c   : > { %v3353_v6 = vadd.f32 %v3351_v53, %v6773_v45  ;;  %v6859_v63 = vadd.f32 %v2205_v25, %v2201_v59  ;;  %v6861_v19 = vadd.f32 %v2363_v15, %v2359_v36  ;;  %v6863_v35 = vadd.f32 %v2484_v33, %v2480_v3  ;;  %v9116_v45 = vld [vmem:[#allocation166_spill] sm:$0xff]  ;;  %v9118_v36 = vld [vmem:[#allocation167_spill] sm:$0xff] }
 0x23d   : > { %v6865_v29 = vadd.f32 %v2642_v55, %v2638_v58  ;;  %v6867_v16 = vadd.f32 %v2800_v62, %v2796_v60  ;;  %v6869_v61 = vadd.f32 %v2915_v30, %v2911_v40  ;;  %v6871_v21 = vadd.f32 %v3073_v51, %v3069_v9 }
 0x23e   : > { %v6876_v59 = vadd.f32 %v9116_v45, %v1768_v34  ;;  %v6879_v3 = vadd.f32 %v9118_v36, %v1769_v31  ;;  %v9120_v58 = vmov %v9106_v5  ;;  %v9122_v40 = vmov %v9107_v57  ;;  %v9124_v5 = vld [vmem:[#allocation132_spill] sm:$0xff]  ;;  %v9125_v57 = vld [vmem:[#allocation182_spill] sm:$0xff] }
 0x23f   : > { %v3231_v60 = vmul.f32 %v9120_v58, %v1313_v2  ;;  %v3352_v8 = vmul.f32 %v9122_v40, %v1313_v2  ;;  %v6886_v9 = vadd.f32 %v9123_v38, %v1874_v42  ;;  %v6889_v11 = vadd.f32 %v9124_v5, %v1875_v23  ;;  %v9126_v2 = vld [vmem:[#allocation122_spill] sm:$0xff]  ;;  %v9136_v5 = vld [vmem:[#allocation123_spill] sm:$0xff] }
 0x240   : > { %v1418_v34 = vadd.f32 %v9125_v57, %v1412_v54  ;;  %v1413_v53 = vadd.f32 %v1409_v52, %v1385_v49  ;;  %v1952_v25 = vmul.f32 %v1951_v13, %v9126_v2  ;;  %v1983_v42 = vstv %s6836_s24  ;;  %s7126_s24 = sld [smem:[#allocation6 + $0x5e]] }
 0x241   : > { %v3233_v31 = vadd.f32 %v3231_v60, %v6793_v0  ;;  %v6895_v48 = vadd.f32 %v3352_v8, %v3348_v44  ;;  %v9127_v39 = vstv %s9115_s3  ;;  %v9128_v15 = vstv %s9117_s6  ;;  %v1975_v60 = vpop.permute.xlu1 %1974 }
 0x242   : > { %v2210_v23 = vmul.f32 %v9127_v39, %v1418_v34  ;;  %v2368_v18 = vmul.f32 %v9128_v15, %v1418_v34  ;;  %v9129_v33 = vstv %s9119_s0  ;;  %v9130_v22 = vstv %s9121_s26  ;;  %s7166_s0 = sld [smem:[#allocation6 + $0x62]] }
 0x243   : > { %v2489_v54 = vmul.f32 %v9129_v33, %v1418_v34  ;;  %v2647_v49 = vmul.f32 %v9130_v22, %v1418_v34  ;;  %v9131_v52 = vstv %s6224_s29  ;;  %v9132_v44 = vstv %s6238_s11  ;;  %s7003_s11 = sld [smem:[#allocation6 + $0x57]] }
 0x244   : > { %v2805_v0 = vmul.f32 %v9131_v52, %v1418_v34  ;;  %v2920_v55 = vmul.f32 %v9132_v44, %v1418_v34  ;;  %v9133_v26 = vstv %s6248_s21  ;;  %v9134_v37 = vstv %s6258_s25  ;;  %s6989_s21 = sld [smem:[#allocation6 + $0x56]] }
 0x245   : > { %v3078_v62 = vmul.f32 %v9133_v26, %v1418_v34  ;;  %v3236_v30 = vmul.f32 %v9134_v37, %v1418_v34  ;;  %v6923_v51 = vadd.f32 %v2210_v23, %v2206_v43  ;;  %v6925_v45 = vadd.f32 %v2368_v18, %v2364_v46  ;;  %s7015_s29 = sld [smem:[#allocation6 + $0x59]] }
 0x246   : > { %v6927_v36 = vadd.f32 %v2489_v54, %v2485_v56  ;;  %v6929_v58 = vadd.f32 %v2647_v49, %v2643_v41  ;;  %v6933_v40 = vadd.f32 %v2805_v0, %v2801_v4  ;;  %v6935_v8 = vadd.f32 %v2920_v55, %v2916_v17  ;;  %s7177_s26 = sld [smem:[#allocation4 + $0x68]] }
 0x247   : > { %v6937_v38 = vadd.f32 %v3078_v62, %v3074_v28  ;;  %v6939_v43 = vadd.f32 %v3236_v30, %v3232_v24  ;;  %v9135_v46 = vstv %s6272_s8  ;;  %v1419_v41 = vadd.f32 %v6484_v47, %v1413_v53  ;;  %v9137_v28 = vld [vmem:[#allocation124_spill] sm:$0xff]  ;;  %v9138_v24 = vld [vmem:[#allocation125_spill] sm:$0xff] }
 0x248   : > { %v3357_v56 = vmul.f32 %v9135_v46, %v1418_v34  ;;  %v1953_v4 = vmul.f32 %v1951_v13, %v9136_v5  ;;  %v1989_v17 = vstv %s6873_s23  ;;  %v1984_v57 = vmul.f32 %v1983_v42, %v9137_v28  ;;  %s7154_s23 = sld [smem:[#allocation6 + $0x60]] }
 0x249   : > { %v1985_v39 = vmul.f32 %v1983_v42, %v9138_v24  ;;  %v1976_v23 = vsel %vm490_vm9, %v1971_v7, %v1973_v1  ;;  %v1977_v15 = vsel %vm490_vm9, %v1973_v1, %v1975_v60  ;;  %v9139_v34 = vstv %s9115_s3  ;;  %s7140_s3 = sld [smem:[#allocation6 + $0x5f]] }
 0x24a   : > { %v6958_v47 = vadd.f32 %v3357_v56, %v3353_v6  ;;  %v2211_v53 = vmul.f32 %v9139_v34, %v1419_v41  ;;  %v9140_v13 = vstv %s9117_s6  ;;  %v2490_v54 = vmul.f32 %v9129_v33, %v1419_v41  ;;  %v1509_v6 = vpop.permute.xlu0 %1508  ;;  %s7158_s6 = sld [smem:[#allocation6 + $0x61]] }
 0x24b   : > { %v2369_v18 = vmul.f32 %v9140_v13, %v1419_v41  ;;  %v2648_v49 = vmul.f32 %v9130_v22, %v1419_v41  ;;  %v9141_v42 = vmov %v9131_v52  ;;  %v9142_v7 = vmov %v9132_v44 }
 0x24c   : > { %v2806_v52 = vmul.f32 %v9141_v42, %v1419_v41  ;;  %v2921_v0 = vmul.f32 %v9142_v7, %v1419_v41  ;;  %v9143_v44 = vmov %v9133_v26  ;;  %v6979_v26 = vadd.f32 %v2211_v53, %v6859_v63  ;;  %v9153_v7 = vld [vmem:[#allocation155_spill] sm:$0xff] }
 0x24d   : > { %v3079_v55 = vmul.f32 %v9143_v44, %v1419_v41  ;;  %v6982_v62 = vadd.f32 %v2369_v18, %v6861_v19  ;;  %v6985_v37 = vadd.f32 %v2490_v54, %v6863_v35  ;;  %v9144_v30 = vstv %s6258_s25  ;;  %v1511_v35 = vpop.permute.xlu1 %1510  ;;  %s7009_s25 = sld [smem:[#allocation6 + $0x58]] }
 0x24e   : > { %v3237_v1 = vmul.f32 %v9144_v30, %v1419_v41  ;;  %v6992_v60 = vadd.f32 %v2648_v49, %v6865_v29  ;;  %v6995_v63 = vadd.f32 %v2806_v52, %v6867_v16  ;;  %v6998_v46 = vadd.f32 %v2921_v0, %v6869_v61  ;;  %v7020_v49 = vld [vmem:[#allocation2 + $0x1] sm:$0x3]  ;;  %v1513_v42 = vpop.permute.xlu0 %1512  ;;  %v9151_v52 = vld [vmem:[#allocation174_spill] sm:$0xff] }
 0x24f   : > { %v7001_v19 = vadd.f32 %v3079_v55, %v6871_v21  ;;  %v9145_v34 = vstv %s6272_s8  ;;  %v1980_v13 = vadd.f32 %v1976_v23, %v1952_v25  ;;  %v1981_v18 = vadd.f32 %v1977_v15, %v1953_v4  ;;  %s7023_s8 = sld [smem:[#allocation4 + $0x89]]  ;;  %v9146_v25 = vld [vmem:[#allocation169_spill] sm:$0xff]  ;;  %v9147_v4 = vld [vmem:[#allocation170_spill] sm:$0xff]  ;;  %v9156_v30 = vld [vmem:[#allocation171_spill] sm:$0xff] }
 0x250   : > { %v7005_v56 = vadd.f32 %v3237_v1, %v3233_v31  ;;  %v3358_v53 = vmul.f32 %v9145_v34, %v1419_v41  ;;  %v1465_v29 = vstv %s6901_s28  ;;  %v1481_v16 = vstv %s6911_s30  ;;  %v9157_v34 = vld [vmem:[#allocation87_spill] sm:$0xff]  ;;  %s7200_s28 = sld [smem:[#allocation4 + $0x69]] }
 0x251   : > { %v1487_v33 = vstv %s6921_s7  ;;  %v1521_v54 = vstv %s6931_s13  ;;  %v1986_v21 = vadd.f32 %v1984_v57, %v1980_v13  ;;  %v1987_v22 = vadd.f32 %v1985_v39, %v1981_v18  ;;  %v9150_v57 = vld [vmem:[#allocation128_spill] sm:$0xff]  ;;  %v2077_v13 = vpop.permute.xlu1 %2076  ;;  %s7214_s30 = sld [smem:[#allocation4 + $0x6b]] }
 0x252   : > { %v7018_v61 = vadd.f32 %v3358_v53, %v6895_v48  ;;  %v1466_v31 = vmul.f32 %v7020_v49, %v1465_v29  ;;  %v7027_v41 = vadd.f32 %v9146_v25, %v6876_v59  ;;  %v7031_v23 = vadd.f32 %v9147_v4, %v6879_v3  ;;  %v9148_v48 = vld [vmem:[#allocation173_spill] sm:$0xff]  ;;  %s7251_s7 = sld [smem:[#allocation6 + $0x63]] }
 0x253   : > { %v7035_v15 = vadd.f32 %v9148_v48, %v6886_v9  ;;  %v1990_v39 = vmul.f32 %v1989_v17, %v9150_v57  ;;  %v7042_v59 = vadd.f32 %v9151_v52, %v6889_v11  ;;  %v1991_v3 = vmul.f32 %v1989_v17, %v9153_v7  ;;  %v9154_v9 = vld [vmem:[#allocation168_spill] sm:$0xff]  ;;  %s7256_s13 = sld [smem:[#allocation6 + $0x64]] }
 0x254   : > { %v1471_v0 = vrot.slane %v1466_v31, %v4103_v12  ;;  %v1482_v44 = vmul.f32 %v1481_v16, %v9154_v9  ;;  %v1488_v1 = vmul.f32 %v1487_v33, %v9156_v30  ;;  %v1522_v53 = vmul.f32 %v1521_v54, %v9157_v34 }
 0x255   : > { %9149 = vst [vmem:[#allocation137_spill] sm:$0xff] %v7035_v15  ;;  %9152 = vst [vmem:[#allocation112_spill] sm:$0xff] %v7042_v59  ;;  %v7049_v55 = vadd.f32 %v1990_v39, %v1986_v21  ;;  %v7054_v18 = vadd.f32 %v1991_v3, %v1987_v22  ;;  %v1475_v39 = vrot.slane %v1466_v31, %v4113_v14  ;;  %v2057_v11 = vstv %s6892_s9  ;;  %v9158_v21 = vld [vmem:[#allocation172_spill] sm:$0xff]  ;;  %v9159_v31 = vld [vmem:[#allocation91_spill] sm:$0xff]  ;;  %v2081_v59 = vpop.permute.xlu1 %2080  ;;  %s7187_s9 = sld [smem:[#allocation4 + $0x67]] }
 0x256   : > { %v1478_v17 = vadd.f32 %v1471_v0, %v6632_v27  ;;  %v1514_v22 = vsel %vm559_vm13, %v1509_v6, %v1511_v35  ;;  %v1483_v3 = vmul.f32 %v1481_v16, %v5608_v50  ;;  %v2079_v0 = vpop.permute.xlu0 %2078  ;;  %v1489_v4 = vmul.f32 %v1487_v33, %v9158_v21 }
 0x257   : > { %9155 = vst [vmem:[#allocation138_spill] sm:$0xff] %v7049_v55  ;;  %v1479_v27 = vadd.f32 %v1475_v39, %v6646_v10  ;;  %v1523_v25 = vmul.f32 %v1521_v54, %v9159_v31  ;;  %v2089_v29 = vstv %s7023_s8  ;;  %v2058_v15 = vmul.f32 %v2057_v11, %v9126_v2  ;;  %s7341_s8 = sld [smem:[#allocation6 + $0x6a]] }
 0x258   : > { %v1484_v52 = vadd.f32 %v1482_v44, %v1478_v17  ;;  %v1515_v17 = vsel %vm559_vm13, %v1511_v35, %v1513_v42  ;;  %v2095_v55 = vstv %s7038_s14  ;;  %v2059_v6 = vmul.f32 %v2057_v11, %v9136_v5  ;;  %s7353_s14 = sld [smem:[#allocation6 + $0x6b]] }
 0x259   : > { %v1485_v44 = vadd.f32 %v1483_v3, %v1479_v27  ;;  %v2082_v16 = vsel %vm490_vm9, %v2077_v13, %v2079_v0  ;;  %v2090_v35 = vmul.f32 %v2089_v29, %v9137_v28  ;;  %v7087_v2 = vmul.f32 %v2089_v29, %v9138_v24 }
 0x25a   : > { %v1490_v48 = vadd.f32 %v1488_v1, %v1484_v52  ;;  %v1571_v1 = vstv %s7047_s18  ;;  %v7095_v42 = vmul.f32 %v2095_v55, %v9150_v57  ;;  %v7098_v11 = vmul.f32 %v2095_v55, %v9153_v7  ;;  %s7363_s18 = sld [smem:[#allocation6 + $0x6c]] }
 0x25b   : > { %v1491_v33 = vadd.f32 %v1489_v4, %v1485_v44  ;;  %v7090_v54 = vmul.f32 %v7020_v49, %v1571_v1  ;;  %v2083_v28 = vsel %vm490_vm9, %v2079_v0, %v2081_v59  ;;  %v2086_v13 = vadd.f32 %v2082_v16, %v2058_v15 }
 0x25c   : > { %v1518_v10 = vadd.f32 %v1514_v22, %v1490_v48  ;;  %v1587_v4 = vstv %s7063_s2  ;;  %v9161_v48 = vstv %s6950_s10  ;;  %v9162_v52 = vstv %s6956_s5  ;;  %s7394_s2 = sld [smem:[#allocation6 + $0x6d]] }
 0x25d   : > { %v1519_v24 = vadd.f32 %v1515_v17, %v1491_v33  ;;  %v1577_v29 = vrot.slane %v7090_v54, %v4103_v12  ;;  %v9163_v55 = vstv %s6966_s16  ;;  %v9164_v59 = vstv %s6976_s4  ;;  %s7307_s16 = sld [smem:[#allocation6 + $0x67]] }
 0x25e   : > { %v1524_v5 = vadd.f32 %v1522_v53, %v1518_v10  ;;  %v9160_v53 = vstv %s6941_s12  ;;  %v9165_v15 = vstv %s6989_s21  ;;  %v9166_v0 = vstv %s7003_s11  ;;  %s7313_s4 = sld [smem:[#allocation6 + $0x68]] }
 0x25f   : > { %v9167_v17 = vstv %s7009_s25  ;;  %s7321_s21 = sld [smem:[#allocation6 + $0x69]] }
 0x260   : > { %v2216_v57 = vmul.f32 %v9160_v53, %v1524_v5  ;;  %v2374_v39 = vmul.f32 %v9161_v48, %v1524_v5  ;;  %v2495_v7 = vmul.f32 %v9162_v52, %v1524_v5  ;;  %v2653_v22 = vmul.f32 %v9163_v55, %v1524_v5  ;;  %s7328_s11 = sld [smem:[#allocation4 + $0x70]] }
 0x261   : > { %v2811_v27 = vmul.f32 %v9164_v59, %v1524_v5  ;;  %v2926_v3 = vmul.f32 %v9165_v15, %v1524_v5  ;;  %v3084_v44 = vmul.f32 %v9166_v0, %v1524_v5  ;;  %v3242_v10 = vmul.f32 %v9167_v17, %v1524_v5 }
 0x262   : > { %v7129_v16 = vadd.f32 %v2216_v57, %v6923_v51  ;;  %v7132_v1 = vadd.f32 %v2374_v39, %v6925_v45  ;;  %v7135_v33 = vadd.f32 %v2495_v7, %v6927_v36  ;;  %v7138_v53 = vadd.f32 %v2653_v22, %v6929_v58 }
 0x263   : > { %v7143_v48 = vadd.f32 %v2811_v27, %v6933_v40  ;;  %v7146_v51 = vadd.f32 %v2926_v3, %v6935_v8  ;;  %v7149_v45 = vadd.f32 %v3084_v44, %v6937_v38  ;;  %v7152_v36 = vadd.f32 %v3242_v10, %v6939_v43 }
 0x264   : > { %v9168_v58 = vstv %s7015_s29  ;;  %v1525_v40 = vadd.f32 %v1523_v25, %v1519_v24  ;;  %v2087_v39 = vadd.f32 %v2083_v28, %v2059_v6  ;;  %v2092_v8 = vadd.f32 %v2090_v35, %v2086_v13 }
 0x265   : > { %v3363_v57 = vmul.f32 %v9168_v58, %v1524_v5  ;;  %v1584_v38 = vadd.f32 %v1577_v29, %v6707_v20  ;;  %v1588_v52 = vmul.f32 %v1587_v4, %v9154_v9  ;;  %v1593_v43 = vstv %s7078_s20  ;;  %s7401_s20 = sld [smem:[#allocation6 + $0x6e]] }
 0x266   : > { %v1627_v7 = vstv %s7083_s17  ;;  %v9169_v25 = vstv %s6941_s12  ;;  %v9170_v6 = vstv %s6950_s10  ;;  %v9171_v35 = vstv %s6956_s5  ;;  %s7261_s12 = sld [smem:[#allocation6 + $0x65]] }
 0x267   : > { %v7169_v5 = vadd.f32 %v3363_v57, %v6958_v47  ;;  %v2217_v24 = vmul.f32 %v9169_v25, %v1525_v40  ;;  %v2375_v28 = vmul.f32 %v9170_v6, %v1525_v40  ;;  %v2496_v13 = vmul.f32 %v9171_v35, %v1525_v40  ;;  %v1617_v6 = vpop.permute.xlu1 %1616  ;;  %s7271_s10 = sld [smem:[#allocation6 + $0x66]] }
 0x268   : > { %v9172_v20 = vmov %v9163_v55  ;;  %v9173_v55 = vmov %v9164_v59  ;;  %v9174_v59 = vmov %v9165_v15  ;;  %v9175_v15 = vmov %v9166_v0  ;;  %v1615_v0 = vpop.permute.xlu0 %1614  ;;  %s7293_s5 = sld [smem:[#allocation4 + $0x71]] }
 0x269   : > { %v2654_v29 = vmul.f32 %v9172_v20, %v1525_v40  ;;  %v2812_v22 = vmul.f32 %v9173_v55, %v1525_v40  ;;  %v2927_v27 = vmul.f32 %v9174_v59, %v1525_v40  ;;  %v3085_v3 = vmul.f32 %v9175_v15, %v1525_v40  ;;  %s7407_s17 = sld [smem:[#allocation6 + $0x6f]] }
 0x26a   : > { %v7190_v47 = vadd.f32 %v2217_v24, %v6979_v26  ;;  %v7193_v44 = vadd.f32 %v2375_v28, %v6982_v62  ;;  %v7196_v17 = vadd.f32 %v2496_v13, %v6985_v37  ;;  %v9176_v10 = vstv %s7009_s25  ;;  %s7334_s25 = sld [smem:[#allocation4 + $0x72]] }
 0x26b   : > { %v3243_v58 = vmul.f32 %v9176_v10, %v1525_v40  ;;  %v7203_v57 = vadd.f32 %v2654_v29, %v6992_v60  ;;  %v7206_v25 = vadd.f32 %v2812_v22, %v6995_v63  ;;  %v7209_v26 = vadd.f32 %v2927_v27, %v6998_v46  ;;  %v9178_v27 = vld [vmem:[#allocation102_spill] sm:$0xff] }
 0x26c   : > { %v7212_v62 = vadd.f32 %v3085_v3, %v7001_v19  ;;  %v9177_v60 = vstv %s7015_s29  ;;  %v1590_v63 = vadd.f32 %v1588_v52, %v1584_v38  ;;  %v1594_v28 = vmul.f32 %v1593_v43, %v9156_v30  ;;  %s7339_s29 = sld [smem:[#allocation4 + $0x74]] }
 0x26d   : > { %v7217_v37 = vadd.f32 %v3243_v58, %v7005_v56  ;;  %v3364_v24 = vmul.f32 %v9177_v60, %v1525_v40  ;;  %v7223_v46 = vadd.f32 %v7087_v2, %v2087_v39  ;;  %v7226_v19 = vadd.f32 %v7095_v42, %v2092_v8  ;;  %v1619_v39 = vpop.permute.xlu0 %1618 }
 0x26e   : > { %v2221_v35 = vstv %s7092_s27  ;;  %v2379_v13 = vstv %s7101_s22  ;;  %v1596_v40 = vadd.f32 %v1594_v28, %v1590_v63  ;;  %v1628_v38 = vmul.f32 %v1627_v7, %v9157_v34  ;;  %s7419_s27 = sld [smem:[#allocation6 + $0x70]] }
 0x26f   : > { %v7231_v56 = vadd.f32 %v3364_v24, %v7018_v61  ;;  %v2500_v52 = vstv %s7106_s19  ;;  %v8288_v20 = vstv %s7116_s1  ;;  %v2816_v29 = vstv %s7126_s24  ;;  %s7421_s22 = sld [smem:[#allocation6 + $0x71]] }
 0x270   : > { %v1620_v2 = vsel %vm559_vm13, %v1615_v0, %v1617_v6  ;;  %v1581_v42 = vrot.slane %v7090_v54, %v4113_v14  ;;  %v8289_v8 = vstv %s7140_s3  ;;  %v3089_v55 = vstv %s7154_s23  ;;  %s7423_s19 = sld [smem:[#allocation6 + $0x72]] }
 0x271   : > { %v8290_v61 = vstv %s7158_s6  ;;  %v1624_v22 = vadd.f32 %v1620_v2, %v1596_v40  ;;  %v3368_v59 = vstv %s7166_s0  ;;  %v1589_v3 = vmul.f32 %v1587_v4, %v5608_v50  ;;  %v1721_v2 = vpop.permute.xlu1 %1720  ;;  %s7447_s24 = sld [smem:[#allocation6 + $0x74]] }
 0x272   : > { %v1585_v15 = vadd.f32 %v1581_v42, %v9178_v27  ;;  %v1677_v0 = vstv %s7187_s9  ;;  %v1595_v10 = vmul.f32 %v1593_v43, %v9158_v21  ;;  %v1621_v58 = vsel %vm559_vm13, %v1617_v6, %v1619_v39  ;;  %s7451_s23 = sld [smem:[#allocation4 + $0x7a]] }
 0x273   : > { %v1630_v54 = vadd.f32 %v1628_v38, %v1624_v22  ;;  %v1693_v60 = vstv %s7177_s26  ;;  %v1678_v63 = vmul.f32 %v7020_v49, %v1677_v0  ;;  %v1699_v4 = vstv %s7200_s28  ;;  %s7471_s0 = sld [smem:[#allocation4 + $0x7d]] }
 0x274   : > { %v1591_v24 = vadd.f32 %v1589_v3, %v1585_v15  ;;  %v1733_v28 = vstv %s7214_s30  ;;  %s7500_s26 = sld [smem:[#allocation4 + $0x83]] }
 0x275   : > { %v2222_v40 = vmul.f32 %v2221_v35, %v1630_v54  ;;  %v2380_v38 = vmul.f32 %v2379_v13, %v1630_v54  ;;  %v2501_v43 = vmul.f32 %v2500_v52, %v1630_v54  ;;  %v2659_v6 = vmul.f32 %v8288_v20, %v1630_v54  ;;  %s7506_s9 = sld [smem:[#allocation6 + $0x75]] }
 0x276   : > { %v2817_v42 = vmul.f32 %v2816_v29, %v1630_v54  ;;  %v2932_v39 = vmul.f32 %v8289_v8, %v1630_v54  ;;  %v3090_v22 = vmul.f32 %v3089_v55, %v1630_v54  ;;  %v3248_v27 = vmul.f32 %v8290_v61, %v1630_v54  ;;  %s7511_s28 = sld [smem:[#allocation6 + $0x76]] }
 0x277   : > { %v7282_v15 = vadd.f32 %v2222_v40, %v7129_v16  ;;  %v7285_v3 = vadd.f32 %v2380_v38, %v7132_v1  ;;  %v7288_v0 = vadd.f32 %v2501_v43, %v7135_v33  ;;  %v7291_v20 = vadd.f32 %v2659_v6, %v7138_v53  ;;  %v1723_v6 = vpop.permute.xlu0 %1722  ;;  %s7521_s30 = sld [smem:[#allocation6 + $0x77]] }
 0x278   : > { %v7296_v8 = vadd.f32 %v2817_v42, %v7143_v48  ;;  %v7299_v61 = vadd.f32 %v2932_v39, %v7146_v51  ;;  %v7302_v16 = vadd.f32 %v3090_v22, %v7149_v45  ;;  %v7305_v1 = vadd.f32 %v3248_v27, %v7152_v36 }
 0x279   : > { %v3369_v33 = vmul.f32 %v3368_v59, %v1630_v54  ;;  %v1597_v53 = vadd.f32 %v1595_v10, %v1591_v24  ;;  %v1683_v40 = vrot.slane %v1678_v63, %v4103_v12  ;;  %v1687_v38 = vrot.slane %v1678_v63, %v4113_v14  ;;  %v1725_v24 = vpop.permute.xlu1 %1724  ;;  %v9179_v63 = vld [vmem:[#allocation107_spill] sm:$0xff] }
 0x27a   : > { %v1629_v48 = vmul.f32 %v1627_v7, %v9159_v31  ;;  %v1694_v51 = vmul.f32 %v1693_v60, %v9154_v9  ;;  %v1695_v45 = vmul.f32 %v1693_v60, %v5608_v50  ;;  %v1700_v36 = vmul.f32 %v1699_v4, %v9156_v30 }
 0x27b   : > { %v7324_v54 = vadd.f32 %v3369_v33, %v7169_v5  ;;  %v1625_v10 = vadd.f32 %v1621_v58, %v1597_v53  ;;  %v1690_v43 = vadd.f32 %v1683_v40, %v9179_v63  ;;  %v1691_v7 = vadd.f32 %v1687_v38, %v6800_v32 }
 0x27c   : > { %v1701_v60 = vmul.f32 %v1699_v4, %v9158_v21  ;;  %v1734_v42 = vmul.f32 %v1733_v28, %v9157_v34  ;;  %v1735_v39 = vmul.f32 %v1733_v28, %v9159_v31  ;;  %v2227_v5 = vstv %s7251_s7  ;;  %s7531_s7 = sld [smem:[#allocation6 + $0x78]] }
 0x27d   : > { %v1631_v58 = vadd.f32 %v1629_v48, %v1625_v10  ;;  %v2385_v32 = vstv %s7256_s13  ;;  %v2506_v22 = vstv %s7261_s12  ;;  %v2664_v27 = vstv %s7271_s10  ;;  %s7545_s13 = sld [smem:[#allocation6 + $0x79]] }
 0x27e   : > { %v1696_v4 = vadd.f32 %v1694_v51, %v1690_v43  ;;  %v1697_v33 = vadd.f32 %v1695_v45, %v1691_v7  ;;  %v1726_v28 = vsel %vm559_vm13, %v1721_v2, %v1723_v6  ;;  %v1727_v53 = vsel %vm559_vm13, %v1723_v6, %v1725_v24  ;;  %s7555_s12 = sld [smem:[#allocation6 + $0x7a]] }
 0x27f   : > { %v2223_v40 = vmul.f32 %v2221_v35, %v1631_v58  ;;  %v2381_v38 = vmul.f32 %v2379_v13, %v1631_v58  ;;  %v2502_v48 = vmul.f32 %v2500_v52, %v1631_v58  ;;  %v9180_v10 = vstv %s7116_s1  ;;  %s7435_s1 = sld [smem:[#allocation6 + $0x73]] }
 0x280   : > { %v2660_v63 = vmul.f32 %v9180_v10, %v1631_v58  ;;  %v2818_v51 = vmul.f32 %v2816_v29, %v1631_v58  ;;  %v9181_v45 = vstv %s7140_s3  ;;  %v3091_v2 = vmul.f32 %v3089_v55, %v1631_v58  ;;  %s7449_s3 = sld [smem:[#allocation4 + $0x79]] }
 0x281   : > { %v2933_v43 = vmul.f32 %v9181_v45, %v1631_v58  ;;  %v9182_v24 = vstv %s7158_s6  ;;  %v2225_v35 = vadd.f32 %v2223_v40, %v7190_v47  ;;  %v2383_v13 = vadd.f32 %v2381_v38, %v7193_v44  ;;  %s7461_s6 = sld [smem:[#allocation4 + $0x7b]] }
 0x282   : > { %v3249_v7 = vmul.f32 %v9182_v24, %v1631_v58  ;;  %v2504_v52 = vadd.f32 %v2502_v48, %v7196_v17  ;;  %v2662_v29 = vadd.f32 %v2660_v63, %v7203_v57  ;;  %v7370_v6 = vadd.f32 %v2818_v51, %v7206_v25  ;;  %s7561_s10 = sld [smem:[#allocation6 + $0x7b]] }
 0x283   : > { %v7373_v55 = vadd.f32 %v2933_v43, %v7209_v26  ;;  %v7376_v10 = vadd.f32 %v3091_v2, %v7212_v62  ;;  %v3370_v44 = vmul.f32 %v3368_v59, %v1631_v58  ;;  %v1702_v17 = vadd.f32 %v1700_v36, %v1696_v4 }
 0x284   : > { %v7379_v47 = vadd.f32 %v3249_v7, %v7217_v37  ;;  %v1703_v57 = vadd.f32 %v1701_v60, %v1697_v33  ;;  %v1783_v40 = vstv %s7328_s11  ;;  %v2822_v25 = vstv %s7307_s16  ;;  %s7576_s16 = sld [smem:[#allocation6 + $0x7c]] }
 0x285   : > { %v7386_v38 = vmul.f32 %v7020_v49, %v1783_v40  ;;  %v1799_v26 = vstv %s7293_s5  ;;  %v1805_v48 = vstv %s7334_s25  ;;  %v7391_v62 = vadd.f32 %v3370_v44, %v7231_v56  ;;  %s7570_s5 = sld [smem:[#allocation4 + $0x82]] }
 0x286   : > { %v1730_v37 = vadd.f32 %v1726_v28, %v1702_v17  ;;  %v1731_v63 = vadd.f32 %v1727_v53, %v1703_v57  ;;  %v1839_v59 = vstv %s7339_s29  ;;  %v2937_v36 = vstv %s7313_s4  ;;  %s7580_s4 = sld [smem:[#allocation6 + $0x7d]] }
 0x287   : > { %v3095_v60 = vstv %s7321_s21  ;;  %v3253_v58 = vstv %s7341_s8  ;;  %v1789_v4 = vrot.slane %v7386_v38, %v4103_v12  ;;  %v3374_v33 = vstv %s7353_s14  ;;  %s7590_s21 = sld [smem:[#allocation4 + $0x84]] }
 0x288   : > { %v1736_v51 = vadd.f32 %v1734_v42, %v1730_v37  ;;  %v1737_v56 = vadd.f32 %v1735_v39, %v1731_v63  ;;  %v1800_v28 = vmul.f32 %v1799_v26, %v9154_v9  ;;  %v1806_v45 = vmul.f32 %v1805_v48, %v9156_v30  ;;  %s7600_s11 = sld [smem:[#allocation4 + $0x86]] }
 0x289   : > { %v1796_v53 = vadd.f32 %v1789_v4, %v7027_v41  ;;  %v7416_v43 = vmul.f32 %v1839_v59, %v9157_v34  ;;  %v2233_v2 = vstv %s7363_s18  ;;  %s7631_s25 = sld [smem:[#allocation4 + $0x8c]] }
 0x28a   : > { %v2228_v24 = vmul.f32 %v2227_v5, %v1736_v51  ;;  %v2229_v42 = vmul.f32 %v2227_v5, %v1737_v56  ;;  %v2386_v39 = vmul.f32 %v2385_v32, %v1736_v51  ;;  %v2387_v7 = vmul.f32 %v2385_v32, %v1737_v56  ;;  %s7637_s29 = sld [smem:[#allocation6 + $0x7e]] }
 0x28b   : > { %v2507_v44 = vmul.f32 %v2506_v22, %v1736_v51  ;;  %v2508_v17 = vmul.f32 %v2506_v22, %v1737_v56  ;;  %v2665_v57 = vmul.f32 %v2664_v27, %v1736_v51  ;;  %v2666_v41 = vmul.f32 %v2664_v27, %v1737_v56  ;;  %s7641_s8 = sld [smem:[#allocation6 + $0x7f]] }
 0x28c   : > { %v7426_v40 = vadd.f32 %v2228_v24, %v7282_v15  ;;  %v7428_v37 = vadd.f32 %v2229_v42, %v2225_v35  ;;  %v7431_v63 = vadd.f32 %v2386_v39, %v7285_v3  ;;  %v7433_v4 = vadd.f32 %v2387_v7, %v2383_v13  ;;  %v1827_v7 = vpop.permute.xlu0 %1826  ;;  %s7648_s14 = sld [smem:[#allocation6 + $0x80]] }
 0x28d   : > { %v7438_v5 = vadd.f32 %v2507_v44, %v7288_v0  ;;  %v7440_v32 = vadd.f32 %v2508_v17, %v2504_v52  ;;  %v7443_v22 = vadd.f32 %v2665_v57, %v7291_v20  ;;  %v7445_v27 = vadd.f32 %v2666_v41, %v2662_v29  ;;  %s7650_s18 = sld [smem:[#allocation6 + $0x81]] }
 0x28e   : > { %v2823_v15 = vmul.f32 %v2822_v25, %v1736_v51  ;;  %v2824_v35 = vmul.f32 %v2822_v25, %v1737_v56  ;;  %v2938_v3 = vmul.f32 %v2937_v36, %v1736_v51  ;;  %v2939_v24 = vmul.f32 %v2937_v36, %v1737_v56  ;;  %v1829_v36 = vpop.permute.xlu1 %1828 }
 0x28f   : > { %v3096_v13 = vmul.f32 %v3095_v60, %v1736_v51  ;;  %v3097_v42 = vmul.f32 %v3095_v60, %v1737_v56  ;;  %v3254_v39 = vmul.f32 %v3253_v58, %v1736_v51  ;;  %v3255_v0 = vmul.f32 %v3253_v58, %v1737_v56 }
 0x290   : > { %v2825_v20 = vadd.f32 %v2823_v15, %v7296_v8  ;;  %v7455_v52 = vadd.f32 %v2824_v35, %v7370_v6  ;;  %v2940_v29 = vadd.f32 %v2938_v3, %v7299_v61  ;;  %v7459_v25 = vadd.f32 %v2939_v24, %v7373_v55  ;;  %v1831_v35 = vpop.permute.xlu0 %1830 }
 0x291   : > { %v3098_v60 = vadd.f32 %v3096_v13, %v7302_v16  ;;  %v7465_v58 = vadd.f32 %v3097_v42, %v7376_v10  ;;  %v3256_v8 = vadd.f32 %v3254_v39, %v7305_v1  ;;  %v7469_v6 = vadd.f32 %v3255_v0, %v7379_v47 }
 0x292   : > { %v3375_v61 = vmul.f32 %v3374_v33, %v1736_v51  ;;  %v3376_v55 = vmul.f32 %v3374_v33, %v1737_v56  ;;  %v1802_v44 = vadd.f32 %v1800_v28, %v1796_v53  ;;  %v2391_v16 = vstv %s7394_s2  ;;  %s7652_s2 = sld [smem:[#allocation6 + $0x82]] }
 0x293   : > { %v2512_v17 = vstv %s7401_s20  ;;  %v2670_v10 = vstv %s7407_s17  ;;  %v1832_v57 = vsel %vm559_vm13, %v1827_v7, %v1829_v36  ;;  %v1793_v1 = vrot.slane %v7386_v38, %v4113_v14  ;;  %s7664_s20 = sld [smem:[#allocation6 + $0x83]] }
 0x294   : > { %v3377_v47 = vadd.f32 %v3375_v61, %v7324_v54  ;;  %v7481_v41 = vadd.f32 %v3376_v55, %v7391_v62  ;;  %v1808_v33 = vadd.f32 %v1806_v45, %v1802_v44  ;;  %v2828_v51 = vstv %s7419_s27  ;;  %s7676_s17 = sld [smem:[#allocation6 + $0x84]] }
 0x295   : > { %v2943_v56 = vstv %s7421_s22  ;;  %v3101_v28 = vstv %s7423_s19  ;;  %v1797_v53 = vadd.f32 %v1793_v1, %v7031_v23  ;;  %v1801_v15 = vmul.f32 %v1799_v26, %v5608_v50  ;;  %s7678_s27 = sld [smem:[#allocation4 + $0x8b]] }
 0x296   : > { %v8291_v3 = vstv %s7435_s1  ;;  %v3380_v38 = vstv %s7447_s24  ;;  %v1836_v24 = vadd.f32 %v1832_v57, %v1808_v33  ;;  %v1889_v54 = vstv %s7449_s3  ;;  %s7680_s22 = sld [smem:[#allocation6 + $0x85]] }
 0x297   : > { %v1803_v62 = vadd.f32 %v1801_v15, %v1797_v53  ;;  %v1807_v45 = vmul.f32 %v1805_v48, %v9158_v21  ;;  %v1841_v13 = vmul.f32 %v1839_v59, %v9159_v31  ;;  %v1890_v23 = vmul.f32 %v7020_v49, %v1889_v54  ;;  %s7694_s19 = sld [smem:[#allocation6 + $0x86]] }
 0x298   : > { %v1842_v26 = vadd.f32 %v7416_v43, %v1836_v24  ;;  %v1833_v42 = vsel %vm559_vm13, %v1829_v36, %v1831_v35  ;;  %v1905_v39 = vstv %s7451_s23  ;;  %v1911_v0 = vstv %s7461_s6  ;;  %s7757_s24 = sld [smem:[#allocation4 + $0x8f]] }
 0x299   : > { %v1809_v48 = vadd.f32 %v1807_v45, %v1803_v62  ;;  %v1895_v59 = vrot.slane %v1890_v23, %v4103_v12  ;;  %v1899_v7 = vrot.slane %v1890_v23, %v4113_v14  ;;  %v1945_v61 = vstv %s7471_s0  ;;  %s7785_s3 = sld [smem:[#allocation6 + $0x87]] }
 0x29a   : > { %v2234_v55 = vmul.f32 %v2233_v2, %v1842_v26  ;;  %v2392_v43 = vmul.f32 %v2391_v16, %v1842_v26  ;;  %v2513_v36 = vmul.f32 %v2512_v17, %v1842_v26  ;;  %v2671_v44 = vmul.f32 %v2670_v10, %v1842_v26  ;;  %s7799_s23 = sld [smem:[#allocation6 + $0x88]] }
 0x29b   : > { %v2829_v57 = vmul.f32 %v2828_v51, %v1842_v26  ;;  %v2944_v1 = vmul.f32 %v2943_v56, %v1842_v26  ;;  %v3102_v33 = vmul.f32 %v3101_v28, %v1842_v26  ;;  %v3260_v53 = vmul.f32 %v8291_v3, %v1842_v26  ;;  %s7803_s6 = sld [smem:[#allocation6 + $0x89]] }
 0x29c   : > { %v7534_v15 = vadd.f32 %v2234_v55, %v7426_v40  ;;  %v7537_v35 = vadd.f32 %v2392_v43, %v7431_v63  ;;  %v7540_v24 = vadd.f32 %v2513_v36, %v7438_v5  ;;  %v7543_v54 = vadd.f32 %v2671_v44, %v7443_v22  ;;  %v1933_v63 = vpop.permute.xlu1 %1932  ;;  %v9183_v55 = vld [vmem:[#allocation137_spill] sm:$0xff]  ;;  %s7807_s0 = sld [smem:[#allocation6 + $0x8a]] }
 0x29d   : > { %v7547_v62 = vadd.f32 %v2829_v57, %v2825_v20  ;;  %v7549_v45 = vadd.f32 %v2944_v1, %v2940_v29  ;;  %v7551_v23 = vadd.f32 %v3102_v33, %v3098_v60  ;;  %v7553_v3 = vadd.f32 %v3260_v53, %v3256_v8  ;;  %v9184_v22 = vld [vmem:[#allocation112_spill] sm:$0xff] }
 0x29e   : > { %v3381_v40 = vmul.f32 %v3380_v38, %v1842_v26  ;;  %v1837_v5 = vadd.f32 %v1833_v42, %v1809_v48  ;;  %v1902_v43 = vadd.f32 %v1895_v59, %v9183_v55  ;;  %v1903_v36 = vadd.f32 %v1899_v7, %v9184_v22 }
 0x29f   : > { %v7565_v20 = vadd.f32 %v7098_v11, %v7223_v46  ;;  %v1906_v29 = vmul.f32 %v1905_v39, %v9154_v9  ;;  %v1907_v60 = vmul.f32 %v1905_v39, %v5608_v50  ;;  %v1912_v8 = vmul.f32 %v1911_v0, %v9156_v30 }
 0x2a0   : > { %v7572_v26 = vadd.f32 %v3381_v40, %v3377_v47  ;;  %v1843_v42 = vadd.f32 %v1841_v13, %v1837_v5  ;;  %v1913_v11 = vmul.f32 %v1911_v0, %v9158_v21  ;;  %v1946_v46 = vmul.f32 %v1945_v61, %v9157_v34  ;;  %v1935_v40 = vpop.permute.xlu0 %1934 }
 0x2a1   : > { %v1908_v48 = vadd.f32 %v1906_v29, %v1902_v43  ;;  %v1909_v39 = vadd.f32 %v1907_v60, %v1903_v36  ;;  %v1947_v59 = vmul.f32 %v1945_v61, %v9159_v31  ;;  %v2239_v7 = vstv %s7506_s9  ;;  %s7814_s9 = sld [smem:[#allocation6 + $0x8c]] }
 0x2a2   : > { %v2235_v47 = vmul.f32 %v2233_v2, %v1843_v42  ;;  %v2393_v44 = vmul.f32 %v2391_v16, %v1843_v42  ;;  %v2514_v13 = vmul.f32 %v2512_v17, %v1843_v42  ;;  %v2672_v0 = vmul.f32 %v2670_v10, %v1843_v42 }
 0x2a3   : > { %v2830_v57 = vmul.f32 %v2828_v51, %v1843_v42  ;;  %v2945_v1 = vmul.f32 %v2943_v56, %v1843_v42  ;;  %v3103_v61 = vmul.f32 %v3101_v28, %v1843_v42  ;;  %v9185_v33 = vstv %s7435_s1  ;;  %v1937_v51 = vpop.permute.xlu1 %1936  ;;  %s7712_s1 = sld [smem:[#allocation4 + $0x8d]] }
 0x2a4   : > { %v3261_v53 = vmul.f32 %v9185_v33, %v1843_v42  ;;  %v2237_v2 = vadd.f32 %v2235_v47, %v7428_v37  ;;  %v2395_v16 = vadd.f32 %v2393_v44, %v7433_v4  ;;  %v2516_v17 = vadd.f32 %v2514_v13, %v7440_v32 }
 0x2a5   : > { %v2674_v10 = vadd.f32 %v2672_v0, %v7445_v27  ;;  %v7607_v56 = vadd.f32 %v2830_v57, %v7455_v52  ;;  %v7610_v28 = vadd.f32 %v2945_v1, %v7459_v25  ;;  %v7613_v5 = vadd.f32 %v3103_v61, %v7465_v58 }
 0x2a6   : > { %v7616_v37 = vadd.f32 %v3261_v53, %v7469_v6  ;;  %v3382_v4 = vmul.f32 %v3380_v38, %v1843_v42  ;;  %v1914_v32 = vadd.f32 %v1912_v8, %v1908_v48  ;;  %v1915_v27 = vadd.f32 %v1913_v11, %v1909_v39 }
 0x2a7   : > { %v2397_v52 = vstv %s7511_s28  ;;  %v2518_v55 = vstv %s7521_s30  ;;  %v1938_v25 = vsel %vm559_vm13, %v1933_v63, %v1935_v40  ;;  %v1939_v43 = vsel %vm559_vm13, %v1935_v40, %v1937_v51  ;;  %s7824_s28 = sld [smem:[#allocation6 + $0x8d]] }
 0x2a8   : > { %v1995_v58 = vstv %s7570_s5  ;;  %v7626_v22 = vadd.f32 %v3382_v4, %v7481_v41  ;;  %v1942_v6 = vadd.f32 %v1938_v25, %v1914_v32  ;;  %v1943_v36 = vadd.f32 %v1939_v43, %v1915_v27  ;;  %s7861_s30 = sld [smem:[#allocation6 + $0x8e]]  ;;  %s9193_s5 = smov 16  }
 0x2a9   : > { %v7629_v38 = vmul.f32 %v7020_v49, %v1995_v58  ;;  %v2676_v29 = vstv %s7531_s7  ;;  %v2834_v60 = vstv %s7545_s13  ;;  %v2949_v8 = vstv %s7555_s12  ;;  %s7863_s7 = sld [smem:[#allocation6 + $0x8f]]  ;;  %s9189_s13 = smov 17  }
 0x2aa   : > { %v3107_v63 = vstv %s7561_s10  ;;  %v3265_v42 = vstv %s7576_s16  ;;  %v3386_v11 = vstv %s7580_s4  ;;  %v1948_v41 = vadd.f32 %v1946_v46, %v1942_v6  ;;  %s9191_s12 = smov 15   ;;  %s9192_s10 = smov 1  }
 0x2ab   : > { %v1949_v48 = vadd.f32 %v1947_v59, %v1943_v36  ;;  %v2001_v39 = vrot.slane %v7629_v38, %v4103_v12  ;;  %v2011_v47 = vstv %s7500_s26  ;;  %v2017_v44 = vstv %s7590_s21  ;;  %s7811_s26 = sld [smem:[#allocation6 + $0x8b]]  ;;  %s9194_s16 = smov 127  }
 0x2ac   : > { %v2051_v13 = vstv %s7600_s11  ;;  %v2240_v0 = vmul.f32 %v2239_v7, %v1948_v41  ;;  %v2398_v1 = vmul.f32 %v2397_v52, %v1948_v41  ;;  %v2519_v33 = vmul.f32 %v2518_v55, %v1948_v41  ;;  %s9195_s4 = smov 113   ;;  %s9196_s21 = smov 111  }
 0x2ad   : > { %v2241_v57 = vmul.f32 %v2239_v7, %v1949_v48  ;;  %v2399_v61 = vmul.f32 %v2397_v52, %v1949_v48  ;;  %v2520_v53 = vmul.f32 %v2518_v55, %v1949_v48  ;;  %v2677_v46 = vmul.f32 %v2676_v29, %v1948_v41 }
 0x2ae   : > { %v2678_v59 = vmul.f32 %v2676_v29, %v1949_v48  ;;  %v7655_v51 = vadd.f32 %v2240_v0, %v7534_v15  ;;  %v7660_v4 = vadd.f32 %v2398_v1, %v7537_v35  ;;  %v7667_v7 = vadd.f32 %v2519_v33, %v7540_v24  ;;  %v2039_v29 = vpop.permute.xlu0 %2038 }
 0x2af   : > { %v7657_v40 = vadd.f32 %v2241_v57, %v2237_v2  ;;  %v7662_v32 = vadd.f32 %v2399_v61, %v2395_v16  ;;  %v7669_v27 = vadd.f32 %v2520_v53, %v2516_v17  ;;  %v7672_v52 = vadd.f32 %v2677_v46, %v7543_v54 }
 0x2b0   : > { %v7674_v55 = vadd.f32 %v2678_v59, %v2674_v10  ;;  %v2835_v15 = vmul.f32 %v2834_v60, %v1948_v41  ;;  %v2836_v2 = vmul.f32 %v2834_v60, %v1949_v48  ;;  %v2950_v35 = vmul.f32 %v2949_v8, %v1948_v41 }
 0x2b1   : > { %v2951_v25 = vmul.f32 %v2949_v8, %v1949_v48  ;;  %v3108_v16 = vmul.f32 %v3107_v63, %v1948_v41  ;;  %v3109_v43 = vmul.f32 %v3107_v63, %v1949_v48  ;;  %v3266_v58 = vmul.f32 %v3265_v42, %v1948_v41  ;;  %v2041_v8 = vpop.permute.xlu1 %2040  ;;  %v9186_v63 = vld [vmem:[#allocation138_spill] sm:$0xff] }
 0x2b2   : > { %v3267_v24 = vmul.f32 %v3265_v42, %v1949_v48  ;;  %v7683_v54 = vadd.f32 %v2835_v15, %v7547_v62  ;;  %v7686_v17 = vadd.f32 %v2836_v2, %v7607_v56  ;;  %v7689_v10 = vadd.f32 %v2950_v35, %v7549_v45  ;;  %v2043_v2 = vpop.permute.xlu0 %2042 }
 0x2b3   : > { %v7692_v6 = vadd.f32 %v2951_v25, %v7610_v28  ;;  %v7697_v36 = vadd.f32 %v3108_v16, %v7551_v23  ;;  %v7700_v62 = vadd.f32 %v3109_v43, %v7613_v5  ;;  %v7703_v56 = vadd.f32 %v3266_v58, %v7553_v3 }
 0x2b4   : > { %v7706_v45 = vadd.f32 %v3267_v24, %v7616_v37  ;;  %v3387_v28 = vmul.f32 %v3386_v11, %v1948_v41  ;;  %v3388_v60 = vmul.f32 %v3386_v11, %v1949_v48  ;;  %v2008_v42 = vadd.f32 %v2001_v39, %v9186_v63 }
 0x2b5   : > { %v2012_v23 = vmul.f32 %v2011_v47, %v9154_v9  ;;  %v2018_v3 = vmul.f32 %v2017_v44, %v9156_v30  ;;  %v2052_v5 = vmul.f32 %v2051_v13, %v9157_v34  ;;  %v2245_v37 = vstv %s7637_s29  ;;  %s9203_s29 = sld [smem:[#allocation188_spill]] }
 0x2b6   : > { %v2403_v11 = vstv %s7641_s8  ;;  %v3389_v41 = vadd.f32 %v3387_v28, %v7572_v26  ;;  %v7724_v48 = vadd.f32 %v3388_v60, %v7626_v22  ;;  %v2524_v0 = vstv %s7648_s14 }
 0x2b7   : > { %v2014_v39 = vadd.f32 %v2012_v23, %v2008_v42  ;;  %v2682_v57 = vstv %s7650_s18  ;;  %v2840_v1 = vstv %s7652_s2  ;;  %v2044_v61 = vsel %vm559_vm13, %v2039_v29, %v2041_v8 }
 0x2b8   : > { %v2005_v33 = vrot.slane %v7629_v38, %v4113_v14  ;;  %v2955_v46 = vstv %s7664_s20  ;;  %v3113_v26 = vstv %s7676_s17  ;;  %v2101_v59 = vstv %s7678_s27 }
 0x2b9   : > { %v2020_v53 = vadd.f32 %v2018_v3, %v2014_v39  ;;  %v2013_v15 = vmul.f32 %v2011_v47, %v5608_v50  ;;  %v2102_v35 = vmul.f32 %v7020_v49, %v2101_v59  ;;  %v2117_v25 = vstv %s7631_s25 }
 0x2ba   : > { %v2009_v22 = vadd.f32 %v2005_v33, %v7054_v18  ;;  %v3271_v16 = vstv %s7680_s22  ;;  %v3392_v43 = vstv %s7694_s19  ;;  %v2019_v38 = vmul.f32 %v2017_v44, %v9158_v21 }
 0x2bb   : > { %v2048_v58 = vadd.f32 %v2044_v61, %v2020_v53  ;;  %v2053_v18 = vmul.f32 %v2051_v13, %v9159_v31  ;;  %v2107_v47 = vrot.slane %v2102_v35, %v4103_v12  ;;  %v2111_v49 = vrot.slane %v2102_v35, %v4113_v14 }
 0x2bc   : > { %v2015_v24 = vadd.f32 %v2013_v15, %v2009_v22  ;;  %v2045_v28 = vsel %vm559_vm13, %v2041_v8, %v2043_v2  ;;  %v2118_v60 = vmul.f32 %v2117_v25, %v9154_v9  ;;  %v2123_v63 = vstv %s7712_s1  ;;  %v2145_v2 = vpop.permute.xlu1 %2144 }
 0x2bd   : > { %v2054_v29 = vadd.f32 %v2052_v5, %v2048_v58  ;;  %v2114_v42 = vadd.f32 %v2107_v47, %v7226_v19  ;;  %v2115_v23 = vadd.f32 %v2111_v49, %v7565_v20  ;;  %v2119_v13 = vmul.f32 %v2117_v25, %v5608_v50 }
 0x2be   : > { %v2021_v44 = vadd.f32 %v2019_v38, %v2015_v24  ;;  %v3966_v58 = vmov 1966171168   ;;  %v2157_v49 = vstv %s7757_s24 }
 0x2bf   : > { %v2246_v3 = vmul.f32 %v2245_v37, %v2054_v29  ;;  %v2404_v39 = vmul.f32 %v2403_v11, %v2054_v29  ;;  %v2525_v5 = vmul.f32 %v2524_v0, %v2054_v29  ;;  %v2683_v8 = vmul.f32 %v2682_v57, %v2054_v29 }
 0x2c0   : > { %v2841_v9 = vmul.f32 %v2840_v1, %v2054_v29  ;;  %v2956_v61 = vmul.f32 %v2955_v46, %v2054_v29  ;;  %v3114_v19 = vmul.f32 %v3113_v26, %v2054_v29  ;;  %v3272_v20 = vmul.f32 %v3271_v16, %v2054_v29 }
 0x2c1   : > { %v7774_v50 = vadd.f32 %v2246_v3, %v7655_v51  ;;  %v7777_v33 = vadd.f32 %v2404_v39, %v7660_v4  ;;  %v7780_v53 = vadd.f32 %v2525_v5, %v7667_v7  ;;  %v7783_v59 = vadd.f32 %v2683_v8, %v7672_v52 }
 0x2c2   : > { %v7788_v22 = vadd.f32 %v2841_v9, %v7683_v54  ;;  %v7791_v15 = vadd.f32 %v2956_v61, %v7689_v10  ;;  %v7794_v51 = vadd.f32 %v3114_v19, %v7697_v36  ;;  %v7797_v4 = vadd.f32 %v3272_v20, %v7703_v56  ;;  %v9187_v9 = vld [vmem:[#allocation14_spill] sm:$0xff] }
 0x2c3   : > { %v3393_v7 = vmul.f32 %v3392_v43, %v2054_v29  ;;  %v2049_v52 = vadd.f32 %v2045_v28, %v2021_v44  ;;  %v2120_v35 = vadd.f32 %v2118_v60, %v2114_v42  ;;  %v2121_v54 = vadd.f32 %v2119_v13, %v2115_v23  ;;  %v2149_v44 = vpop.permute.xlu1 %2148  ;;  %v2147_v42 = vpop.permute.xlu0 %2146 }
 0x2c4   : > { %v2124_v10 = vmul.f32 %v2123_v63, %v9156_v30  ;;  %v2125_v36 = vmul.f32 %v2123_v63, %v9158_v21  ;;  %v2260_v38 = vunpack.c.l.s4 %v3966_v58  ;;  %v2409_v3 = vstv %s7799_s23 }
 0x2c5   : > { %v7809_v56 = vadd.f32 %v3393_v7, %v3389_v41  ;;  %v2055_v25 = vadd.f32 %v2053_v18, %v2049_v52  ;;  %v2530_v39 = vstv %s7803_s6  ;;  %v2688_v5 = vstv %s7807_s0 }
 0x2c6   : > { %v2126_v24 = vadd.f32 %v2124_v10, %v2120_v35  ;;  %v2127_v47 = vadd.f32 %v2125_v36, %v2121_v54  ;;  %v2846_v19 = vstv %s7811_s26  ;;  %v2961_v20 = vstv %s7814_s9 }
 0x2c7   : > { %v2247_v30 = vmul.f32 %v2245_v37, %v2055_v25  ;;  %v2405_v21 = vmul.f32 %v2403_v11, %v2055_v25  ;;  %v2526_v29 = vmul.f32 %v2524_v0, %v2055_v25  ;;  %v2684_v41 = vmul.f32 %v2682_v57, %v2055_v25 }
 0x2c8   : > { %v2842_v18 = vmul.f32 %v2840_v1, %v2055_v25  ;;  %v2957_v28 = vmul.f32 %v2955_v46, %v2055_v25  ;;  %v3115_v60 = vmul.f32 %v3113_v26, %v2055_v25  ;;  %v3273_v63 = vmul.f32 %v3271_v16, %v2055_v25 }
 0x2c9   : > { %v2249_v37 = vadd.f32 %v2247_v30, %v7657_v40  ;;  %v2407_v11 = vadd.f32 %v2405_v21, %v7662_v32  ;;  %v2528_v0 = vadd.f32 %v2526_v29, %v7669_v27  ;;  %v2686_v57 = vadd.f32 %v2684_v41, %v7674_v55 }
 0x2ca   : > { %v2844_v1 = vadd.f32 %v2842_v18, %v7686_v17  ;;  %v2959_v46 = vadd.f32 %v2957_v28, %v7692_v6  ;;  %v7839_v26 = vadd.f32 %v3115_v60, %v7700_v62  ;;  %v7842_v16 = vadd.f32 %v3273_v63, %v7706_v45 }
 0x2cb   : > { %v2261_v40 = vunpack.c.0.s8 %v2260_v38  ;;  %v3394_v32 = vmul.f32 %v3392_v43, %v2055_v25  ;;  %v2150_v27 = vsel %vm559_vm13, %v2145_v2, %v2147_v42  ;;  %v2151_v55 = vsel %vm559_vm13, %v2147_v42, %v2149_v44 }
 0x2cc   : > { %v2158_v17 = vmul.f32 %v2157_v49, %v9157_v34  ;;  %v2159_v6 = vmul.f32 %v2157_v49, %v9159_v31  ;;  %v2154_v23 = vadd.f32 %v2150_v27, %v2126_v24  ;;  %v2155_v62 = vadd.f32 %v2151_v55, %v2127_v47 }
 0x2cd   : > { %v3396_v13 = vadd.f32 %v3394_v32, %v7724_v48  ;;  %v2251_v45 = vstv %s7785_s3  ;;  %v7856_v61 = vsub.s32 %v2261_v40, %v9187_v9  ;;  %v3119_v2 = vstv %s7824_s28 }
 0x2ce   : > { %v2160_v8 = vadd.f32 %v2158_v17, %v2154_v23  ;;  %v2161_v43 = vadd.f32 %v2159_v6, %v2155_v62 }
 0x2d0   : > { %v2252_v34 = vmul.f32 %v2251_v45, %v2160_v8  ;;  %v2253_v31 = vmul.f32 %v2251_v45, %v2161_v43  ;;  %v2410_v7 = vmul.f32 %v2409_v3, %v2160_v8  ;;  %v2411_v48 = vmul.f32 %v2409_v3, %v2161_v43 }
 0x2d1   : > { %v2531_v52 = vmul.f32 %v2530_v39, %v2160_v8  ;;  %v2532_v35 = vmul.f32 %v2530_v39, %v2161_v43  ;;  %v2689_v54 = vmul.f32 %v2688_v5, %v2160_v8  ;;  %v2690_v10 = vmul.f32 %v2688_v5, %v2161_v43 }
 0x2d2   : > { %v2254_v36 = vadd.f32 %v2252_v34, %v7774_v50  ;;  %v2255_v25 = vadd.f32 %v2253_v31, %v2249_v37  ;;  %v2412_v58 = vadd.f32 %v2410_v7, %v7777_v33  ;;  %v2413_v38 = vadd.f32 %v2411_v48, %v2407_v11 }
 0x2d3   : > { %v2533_v24 = vadd.f32 %v2531_v52, %v7780_v53  ;;  %v2534_v47 = vadd.f32 %v2532_v35, %v2528_v0  ;;  %v2691_v49 = vadd.f32 %v2689_v54, %v7783_v59  ;;  %v2692_v30 = vadd.f32 %v2690_v10, %v2686_v57 }
 0x2d4   : > { %v2258_v21 = vcombine.low %v2254_v36, %v2255_v25  ;;  %v2416_v29 = vcombine.low %v2412_v58, %v2413_v38  ;;  %v2847_v41 = vmul.f32 %v2846_v19, %v2160_v8  ;;  %v2848_v18 = vmul.f32 %v2846_v19, %v2161_v43 }
 0x2d5   : > { %v2537_v28 = vcombine.low %v2533_v24, %v2534_v47  ;;  %v2695_v60 = vcombine.low %v2691_v49, %v2692_v30  ;;  %v2962_v63 = vmul.f32 %v2961_v20, %v2160_v8  ;;  %v2963_v50 = vmul.f32 %v2961_v20, %v2161_v43 }
 0x2d6   : > { %v2265_v44 = vrot.slane %v2258_v21, %v7856_v61  ;;  %v2849_v33 = vadd.f32 %v2847_v41, %v7788_v22  ;;  %v2850_v42 = vadd.f32 %v2848_v18, %v2844_v1  ;;  %v3277_v37 = vstv %s7861_s30 }
 0x2d7   : > { %v2964_v53 = vadd.f32 %v2962_v63, %v7791_v15  ;;  %v2965_v11 = vadd.f32 %v2963_v50, %v2959_v46  ;;  %v3398_v59 = vstv %s7863_s7  ;;  %v3120_v40 = vmul.f32 %v3119_v2, %v2160_v8 }
 0x2d8   : > { %v2272_v0 = vrot.slane %v2265_v44, %v7856_v61  ;;  %v2853_v57 = vcombine.low %v2849_v33, %v2850_v42  ;;  %v3121_v27 = vmul.f32 %v3119_v2, %v2161_v43  ;;  %v3278_v17 = vmul.f32 %v3277_v37, %v2160_v8 }
 0x2d9   : > { %v2968_v32 = vcombine.low %v2964_v53, %v2965_v11  ;;  %v3122_v55 = vadd.f32 %v3120_v40, %v7794_v51  ;;  %v3279_v6 = vmul.f32 %v3277_v37, %v2161_v43  ;;  %v3399_v1 = vmul.f32 %v3398_v59, %v2160_v8 }
 0x2da   : > { %2274 = vst.msk [vmem:[#allocation2 + $0x1] sm:$0x3] %vm4076_vm1, %v2272_v0  ;;  %v3123_v22 = vadd.f32 %v3121_v27, %v7839_v26  ;;  %v3400_v62 = vmul.f32 %v3398_v59, %v2161_v43  ;;  %v2423_v15 = vrot.slane %v2416_v29, %v7856_v61  ;;  %v3280_v46 = vadd.f32 %v3278_v17, %v7797_v4 }
 0x2db   : > { %v3281_v45 = vadd.f32 %v3279_v6, %v7842_v16  ;;  %v3401_v39 = vadd.f32 %v3399_v1, %v7809_v56  ;;  %v2544_v4 = vrot.slane %v2537_v28, %v7856_v61  ;;  %v9190_v56 = vld [vmem:[#allocation15_spill] sm:$0xff]  ;;  %v2702_v43 = vrot.slane %v2695_v60, %v7856_v61 }
 0x2dc   : > { %v3126_v3 = vcombine.low %v3122_v55, %v3123_v22  ;;  %v3402_v5 = vadd.f32 %v3400_v62, %v3396_v13  ;;  %v2430_v19 = vrot.slane %v2423_v15, %v7856_v61  ;;  %v2860_v52 = vrot.slane %v2853_v57, %v7856_v61 }
 0x2dd   : > { %v3284_v51 = vcombine.low %v3280_v46, %v3281_v45  ;;  %v2551_v13 = vrot.slane %v2544_v4, %v7856_v61  ;;  %v2709_v34 = vrot.slane %v2702_v43, %v7856_v61  ;;  %v2975_v58 = vrot.slane %v2968_v32, %v7856_v61 }
 0x2de   : > { %v3405_v9 = vcombine.low %v3401_v39, %v3402_v5  ;;  %v2867_v54 = vrot.slane %v2860_v52, %v7856_v61  ;;  %v3133_v49 = vrot.slane %v3126_v3, %v7856_v61 }
 0x2df   : > { %v2982_v24 = vrot.slane %v2975_v58, %v7856_v61  ;;  %v3291_v18 = vrot.slane %v3284_v51, %v7856_v61 }
 0x2e0   : > { %v3140_v30 = vrot.slane %v3133_v49, %v7856_v61  ;;  %v3412_v33 = vrot.slane %v3405_v9, %v7856_v61 }
 0x2e1   : > { %v2275_v20 = vld [vmem:[#allocation2] sm:$0x7]  ;;  %v3298_v60 = vrot.slane %v3291_v18, %v7856_v61 }
 0x2e2   : > { %v2284_v2 = vrot.slane %v2275_v20, %v4113_v14  ;;  %2432 = vst.msk [vmem:[#allocation2 + $0x1] sm:$0x3] %vm4076_vm1, %v2430_v19  ;;  %v2280_v26 = vrot.slane %v2275_v20, %v4103_v12  ;;  %v2288_v16 = vrot.slane %v2275_v20, %v9190_v56  ;;  %v3419_v37 = vrot.slane %v3412_v33, %v7856_v61 }
 0x2e4   : > { %2291 = vrot.lane.b32.xlu1 %v2284_v2, %s9189_s13  ;;  %2289 = vrot.lane.b32.xlu0 %v2280_v26, %s9189_s13 }
 0x2e8   : > { %2293 = vrot.lane.b32.xlu0 %v2288_v16, %s9189_s13 }
 0x2e9   : > { %v2433_v8 = vld [vmem:[#allocation2] sm:$0x7] }
 0x2ea   : > { %2553 = vst.msk [vmem:[#allocation2 + $0x1] sm:$0x3] %vm4076_vm1, %v2551_v13 }
 0x2f1   : > { %v2554_v31 = vld [vmem:[#allocation2] sm:$0x7] }
 0x2f2   : > { %v2559_v7 = vrot.slane %v2554_v31, %v4103_v12  ;;  %2711 = vst.msk [vmem:[#allocation2 + $0x1] sm:$0x3] %vm4076_vm1, %v2709_v34  ;;  %v2563_v48 = vrot.slane %v2554_v31, %v4113_v14  ;;  %v2567_v35 = vrot.slane %v2554_v31, %v9190_v56 }
 0x2f4   : > { %2568 = vrot.lane.b32.xlu1 %v2559_v7, %s9191_s12  ;;  %2570 = vrot.lane.b32.xlu0 %v2563_v48, %s9191_s12 }
 0x2f8   : > { %2572 = vrot.lane.b32.xlu1 %v2567_v35, %s9191_s12 }
 0x2f9   : > { %v2712_v10 = vld [vmem:[#allocation2] sm:$0x7] }
 0x2fa   : > { %v2721_v36 = vrot.slane %v2712_v10, %v4113_v14  ;;  %2869 = vst.msk [vmem:[#allocation2 + $0x1] sm:$0x3] %vm4076_vm1, %v2867_v54  ;;  %v2717_v25 = vrot.slane %v2712_v10, %v4103_v12  ;;  %v2725_v38 = vrot.slane %v2712_v10, %v9190_v56 }
 0x2fc   : > { %2728 = vrot.lane.b32.xlu1 %v2721_v36, %s9192_s10  ;;  %2726 = vrot.lane.b32.xlu0 %v2717_v25, %s9192_s10 }
 0x300   : > { %2435 = vrot.lane.b32.xlu1 %v2433_v8, %s9193_s5  ;;  %2730 = vrot.lane.b32.xlu0 %v2725_v38, %s9192_s10 }
 0x301   : > { %v7919_v47 = vld [vmem:[#allocation2 + $0x1] sm:$0x3] }
 0x302   : > { %2984 = vst.msk [vmem:[#allocation2 + $0x1] sm:$0x3] %vm4076_vm1, %v2982_v24  ;;  %v9201_v24 = vld [vmem:[#allocation13_spill] sm:$0xff] }
 0x309   : > { %v2985_v21 = vld [vmem:[#allocation2 + $0x1] sm:$0x7] }
 0x30a   : > { %v2994_v29 = vrot.slane %v2985_v21, %v4113_v14  ;;  %3142 = vst.msk [vmem:[#allocation2 + $0x1] sm:$0x3] %vm4076_vm1, %v3140_v30  ;;  %v2990_v41 = vrot.slane %v2985_v21, %v4103_v12  ;;  %v2998_v28 = vrot.slane %v2985_v21, %v9190_v56 }
 0x30c   : > { %3001 = vrot.lane.b32.xlu1 %v2994_v29, %s9194_s16  ;;  %2999 = vrot.lane.b32.xlu0 %v2990_v41, %s9194_s16 }
 0x310   : > { %3003 = vrot.lane.b32.xlu0 %v2998_v28, %s9194_s16 }
 0x311   : > { %v3143_v63 = vld [vmem:[#allocation2 + $0x1] sm:$0x7] }
 0x312   : > { %v3148_v50 = vrot.slane %v3143_v63, %v4103_v12  ;;  %3300 = vst.msk [vmem:[#allocation2 + $0x1] sm:$0x3] %vm4076_vm1, %v3298_v60  ;;  %v3152_v44 = vrot.slane %v3143_v63, %v4113_v14  ;;  %v3156_v42 = vrot.slane %v3143_v63, %v9190_v56 }
 0x314   : > { %3157 = vrot.lane.b32.xlu1 %v3148_v50, %s9195_s4  ;;  %3159 = vrot.lane.b32.xlu0 %v3152_v44, %s9195_s4 }
 0x318   : > { %3161 = vrot.lane.b32.xlu1 %v3156_v42, %s9195_s4 }
 0x319   : > { %v3301_v53 = vld [vmem:[#allocation2 + $0x1] sm:$0x7] }
 0x31a   : > { %3421 = vst.msk [vmem:[#allocation2 + $0x1] sm:$0x3] %vm4076_vm1, %v3419_v37 }
 0x321   : > { %v3422_v11 = vld [vmem:[#allocation2 + $0x1] sm:$0x7] }
 0x322   : > { %v3431_v59 = vrot.slane %v3422_v11, %v4113_v14  ;;  %v3427_v0 = vrot.slane %v3422_v11, %v4103_v12  ;;  %v3435_v57 = vrot.slane %v3422_v11, %v9190_v56 }
 0x324   : > { %3438 = vrot.lane.b32.xlu1 %v3431_v59, %s9196_s21  ;;  %3436 = vrot.lane.b32.xlu0 %v3427_v0, %s9196_s21 }
 0x328   : > { %3303 = vrot.lane.b32.xlu1 %v3301_v53, %s8405_s15  ;;  %3440 = vrot.lane.b32.xlu0 %v3435_v57, %s9196_s21  ;;  %s9202_s15 = sld [smem:[#allocation11_spill]] }
 0x32e   : > { %s308_s8 = scalar_lea.vmem %s9203_s29, %s9202_s15 }
 0x356   : > { %v2292_v40 = vpop.permute.xlu1 %2291  ;;  %v2290_v32 = vpop.permute.xlu0 %2289 }
 0x357   : > { %v2295_v62 = vsel %vm377_vm2, %v2290_v32, %v2292_v40 }
 0x358   : > { %v2299_v39 = vsel %vm4862_vm3, %v2295_v62, 0.0 }
 0x35a   : > { %v2294_v55 = vpop.permute.xlu0 %2293 }
 0x35b   : > { %v2296_v12 = vsel %vm377_vm2, %v2292_v40, %v2294_v55 }
 0x35c   : > { %v2300_v46 = vsel %vm4868_vm4, %v2296_v12, 0.0 }
 0x35d   : > { %v2303_v51 = vcombine.low %v2299_v39, %v2300_v46 }
 0x35f   : > { %v2310_v20 = vrot.slane %v2303_v51, %v7856_v61 }
 0x361   : > { %v2317_v52 = vrot.slane %v2310_v20, %v7856_v61 }
 0x363   : > { %v2319_v49 = vadd.f32 %v2317_v52, %v9201_v24 }
 0x366   : > { %v2569_v27 = vpop.permute.xlu1 %2568  ;;  %v2571_v17 = vpop.permute.xlu0 %2570 }
 0x367   : > { %v2574_v2 = vsel %vm390_vm5, %v2569_v27, %v2571_v17 }
 0x368   : > { %v2578_v34 = vsel %vm4913_vm6, %v2574_v2, 0.0 }
 0x36a   : > { %v2573_v6 = vpop.permute.xlu1 %2572 }
 0x36b   : > { %v2575_v19 = vsel %vm390_vm5, %v2571_v17, %v2573_v6 }
 0x36c   : > { %v2579_v56 = vsel %vm4919_vm7, %v2575_v19, 0.0 }
 0x36d   : > { %v2582_v48 = vcombine.low %v2578_v34, %v2579_v56 }
 0x36e   : > { %v2727_v22 = vpop.permute.xlu0 %2726  ;;  %v2729_v14 = vpop.permute.xlu1 %2728 }
 0x36f   : > { %v2732_v8 = vsel %vm403_vm8, %v2727_v22, %v2729_v14  ;;  %v2589_v38 = vrot.slane %v2582_v48, %v7856_v61 }
 0x370   : > { %v2736_v35 = vsel %vm4862_vm3, %v2732_v8, 0.0 }
 0x371   : > { %v2596_v50 = vrot.slane %v2589_v38, %v7856_v61 }
 0x372   : > { %v2731_v1 = vpop.permute.xlu0 %2730  ;;  %v2436_v45 = vpop.permute.xlu1 %2435 }
 0x373   : > { %v2733_v26 = vsel %vm403_vm8, %v2729_v14, %v2731_v1  ;;  %v2437_v31 = vrot.slane %v2436_v45, 1 }
 0x374   : > { %v2737_v7 = vsel %vm4868_vm4, %v2733_v26, 0.0 }
 0x375   : > { %v2740_v10 = vcombine.low %v2736_v35, %v2737_v7  ;;  %v2438_v25 = vsel %vm490_vm9, %v2436_v45, %v2437_v31 }
 0x376   : > { %v2440_v41 = vadd.f32 %v2438_v25, %v2319_v49 }
 0x377   : > { %v2747_v18 = vrot.slane %v2740_v10, %v7856_v61 }
 0x378   : > { %v2598_v42 = vadd.f32 %v2596_v50, %v2440_v41 }
 0x379   : > { %v2754_v37 = vrot.slane %v2747_v18, %v7856_v61 }
 0x37b   : > { %v2756_v57 = vadd.f32 %v2754_v37, %v2598_v42 }
 0x37d   : > { %v2871_v6 = vadd.f32 %v7919_v47, %v2756_v57 }
 0x37e   : > { %v3000_v5 = vpop.permute.xlu0 %2999  ;;  %v3002_v9 = vpop.permute.xlu1 %3001 }
 0x37f   : > { %v3005_v30 = vsel %vm431_vm10, %v3000_v5, %v3002_v9 }
 0x380   : > { %v3009_v60 = vsel %vm4913_vm6, %v3005_v30, 0.0 }
 0x382   : > { %v3004_v16 = vpop.permute.xlu0 %3003 }
 0x383   : > { %v3006_v36 = vsel %vm431_vm10, %v3002_v9, %v3004_v16 }
 0x384   : > { %v3010_v29 = vsel %vm4919_vm7, %v3006_v36, 0.0 }
 0x385   : > { %v3013_v44 = vcombine.low %v3009_v60, %v3010_v29 }
 0x386   : > { %v3158_v13 = vpop.permute.xlu1 %3157  ;;  %v3160_v58 = vpop.permute.xlu0 %3159 }
 0x387   : > { %v3163_v28 = vsel %vm444_vm11, %v3158_v13, %v3160_v58  ;;  %v3020_v11 = vrot.slane %v3013_v44, %v7856_v61 }
 0x388   : > { %v3167_v33 = vsel %vm4862_vm3, %v3163_v28, 0.0 }
 0x389   : > { %v3027_v32 = vrot.slane %v3020_v11, %v7856_v61 }
 0x38a   : > { %v3162_v54 = vpop.permute.xlu1 %3161 }
 0x38b   : > { %v3164_v21 = vsel %vm444_vm11, %v3160_v58, %v3162_v54  ;;  %v3029_v15 = vadd.f32 %v3027_v32, %v2871_v6 }
 0x38c   : > { %v3168_v63 = vsel %vm4868_vm4, %v3164_v21, 0.0 }
 0x38d   : > { %v3171_v53 = vcombine.low %v3167_v33, %v3168_v63 }
 0x38f   : > { %v3178_v40 = vrot.slane %v3171_v53, %v7856_v61 }
 0x391   : > { %v3185_v22 = vrot.slane %v3178_v40, %v7856_v61 }
 0x393   : > { %v3187_v3 = vadd.f32 %v3185_v22, %v3029_v15 }
 0x396   : > { %v3439_v59 = vpop.permute.xlu1 %3438  ;;  %v3437_v0 = vpop.permute.xlu0 %3436 }
 0x397   : > { %v3442_v27 = vsel %vm457_vm12, %v3437_v0, %v3439_v59 }
 0x398   : > { %v3446_v1 = vsel %vm4913_vm6, %v3442_v27, 0.0 }
 0x39a   : > { %v3304_v55 = vpop.permute.xlu1 %3303  ;;  %v3441_v17 = vpop.permute.xlu0 %3440 }
 0x39b   : > { %v3305_v14 = vrot.slane %v3304_v55, 1  ;;  %v3443_v12 = vsel %vm457_vm12, %v3439_v59, %v3441_v17 }
 0x39c   : > { %v3447_v62 = vsel %vm4919_vm7, %v3443_v12, 0.0 }
 0x39d   : > { %v3450_v46 = vcombine.low %v3446_v1, %v3447_v62  ;;  %v3306_v45 = vsel %vm559_vm13, %v3304_v55, %v3305_v14 }
 0x39e   : > { %v3308_v5 = vadd.f32 %v3306_v45, %v3187_v3 }
 0x39f   : > { %v3457_v39 = vrot.slane %v3450_v46, %v7856_v61 }
 0x3a1   : > { %v3464_v47 = vrot.slane %v3457_v39, %v7856_v61 }
 0x3a3   : > { %v3466_v51 = vadd.f32 %v3464_v47, %v3308_v5 }
 0x3a5   : > { %3467 = vst.msk [vmem:[%s308_s8] sm:$0x3] %vm4076_vm1, %v3466_v51 }
 0x3a6 PF: > { %s9204_s14 = sld [smem:[#allocation10_spill]] }
 0x3ac   : > { %s19_s23 = sadd.s32 1, %s9204_s14  }
 0x3ad   : > { %p16_p5 = scmp.ge.s32.totalorder %s19_s23, 4  }
 0x3af   :  { %18 = sbr.rel (!%p16_p5) target bundleno = 10 (0xa), region = 89 }
 0x3b4   :  { %3487 = vsyncpa [#allocation5], 1 }
 0x3b5   :  { %3489 = vsyncpa [#allocation5 + $0x1], 1 }
 0x3b6   :  { %3490 = vsyncpa [#allocation7], 1 }

</bundles_post_ra>
